<compile_context>
chip_gen: v7x
topology: tpu7x:2x2x1
jax: 0.10.0
libtpu: 0.0.40
codegen_flags: <defaults>
</compile_context>

<pallas_src>
import functools

import jax
import jax.numpy as jnp
from jax.experimental import pallas as pl
from jax.experimental.pallas import tpu as pltpu

BN_EPS = 1e-5
LANE = 128
SUBLANE = 8
VMEM_LIMIT_BYTES = 32 * 1024 * 1024


def _round_up(x, m):
    return (x + m - 1) // m * m


def _choose_tile_m(m):
    # Large enough for MXU/pipeline efficiency, small enough that double-buffered
    # (tile, K) bf16 patches + (tile, Cout) f32 outputs stay far below v7x's
    # 64 MiB VMEM (and v5e's 16 MiB scoped default).
    if m >= 512:
        return 512
    return _round_up(m, SUBLANE)


# ---------------------------------------------------------------------------
# Pallas kernels
# ---------------------------------------------------------------------------
def conv_matmul_stats_kernel(p_ref, w_ref, b_ref, y_ref, stats_ref):
    """One M-tile: y = patches @ W + b (bf16 inputs, f32 accumulation) plus
    per-tile partial sums sum(y), sum(y*y) for the BatchNorm statistics."""
    y = jnp.dot(p_ref[...], w_ref[...], preferred_element_type=jnp.float32)
    y = y + b_ref[...]
    y_ref[...] = y
    s = jnp.sum(y, axis=0, keepdims=True)
    sq = jnp.sum(y * y, axis=0, keepdims=True)
    pad = jnp.zeros((SUBLANE - 2, y.shape[1]), jnp.float32)
    stats_ref[...] = jnp.concatenate([s, sq, pad], axis=0)[None]


def affine_relu_kernel(y_ref, scale_ref, shift_ref, o_ref):
    """BatchNorm folded to a single per-element FMA, then ReLU."""
    o_ref[...] = jnp.maximum(y_ref[...] * scale_ref[...] + shift_ref[...], 0.0)


def linear_kernel(x_ref, w_ref, b_ref, o_ref):
    o_ref[...] = (
        jnp.dot(x_ref[...], w_ref[...], preferred_element_type=jnp.float32)
        + b_ref[...]
    )


# ---------------------------------------------------------------------------
# pallas_call wrappers
# ---------------------------------------------------------------------------
def conv_matmul_stats_pallas(patches, w2, b_row, tile_m):
    m_pad, k_pad = patches.shape
    c_pad = w2.shape[1]
    mt = m_pad // tile_m
    flops = 2 * m_pad * k_pad * c_pad
    bytes_accessed = (
        patches.size * patches.dtype.itemsize
        + w2.size * w2.dtype.itemsize
        + b_row.size * 4
        + m_pad * c_pad * 4
        + mt * SUBLANE * c_pad * 4
    )
    return pl.pallas_call(
        conv_matmul_stats_kernel,
        out_shape=(
            jax.ShapeDtypeStruct((m_pad, c_pad), jnp.float32),
            jax.ShapeDtypeStruct((mt, SUBLANE, c_pad), jnp.float32),
        ),
        grid=(mt,),
        in_specs=[
            pl.BlockSpec((tile_m, k_pad), lambda i: (i, 0)),
            pl.BlockSpec((k_pad, c_pad), lambda i: (0, 0)),
            pl.BlockSpec((1, c_pad), lambda i: (0, 0)),
        ],
        out_specs=(
            pl.BlockSpec((tile_m, c_pad), lambda i: (i, 0)),
            pl.BlockSpec((1, SUBLANE, c_pad), lambda i: (i, 0, 0)),
        ),
        compiler_params=pltpu.CompilerParams(
            dimension_semantics=("parallel",),
            vmem_limit_bytes=VMEM_LIMIT_BYTES,
        ),
        cost_estimate=pl.CostEstimate(
            flops=flops, transcendentals=0, bytes_accessed=bytes_accessed
        ),
    )(patches, w2, b_row)


def affine_relu_pallas(y, scale_row, shift_row, tile_m):
    m_pad, c_pad = y.shape
    mt = m_pad // tile_m
    return pl.pallas_call(
        affine_relu_kernel,
        out_shape=jax.ShapeDtypeStruct((m_pad, c_pad), jnp.float32),
        grid=(mt,),
        in_specs=[
            pl.BlockSpec((tile_m, c_pad), lambda i: (i, 0)),
            pl.BlockSpec((1, c_pad), lambda i: (0, 0)),
            pl.BlockSpec((1, c_pad), lambda i: (0, 0)),
        ],
        out_specs=pl.BlockSpec((tile_m, c_pad), lambda i: (i, 0)),
        compiler_params=pltpu.CompilerParams(
            dimension_semantics=("parallel",),
            vmem_limit_bytes=VMEM_LIMIT_BYTES,
        ),
        cost_estimate=pl.CostEstimate(
            flops=2 * m_pad * c_pad,
            transcendentals=0,
            bytes_accessed=2 * m_pad * c_pad * 4 + 2 * c_pad * 4,
        ),
    )(y, scale_row, shift_row)


def linear_pallas(x, w, b):
    m, k = x.shape
    n = w.shape[1]
    m_pad = _round_up(m, SUBLANE)
    k_pad = _round_up(k, LANE)
    n_pad = _round_up(n, LANE)
    x_p = jnp.pad(x, ((0, m_pad - m), (0, k_pad - k)))
    w_p = jnp.pad(w, ((0, k_pad - k), (0, n_pad - n)))
    b_p = jnp.pad(b.reshape(1, -1), ((0, 0), (0, n_pad - n)))
    out = pl.pallas_call(
        linear_kernel,
        out_shape=jax.ShapeDtypeStruct((m_pad, n_pad), jnp.float32),
        in_specs=[pl.BlockSpec(memory_space=pltpu.MemorySpace.VMEM)] * 3,
        out_specs=pl.BlockSpec(memory_space=pltpu.MemorySpace.VMEM),
        compiler_params=pltpu.CompilerParams(vmem_limit_bytes=VMEM_LIMIT_BYTES),
        cost_estimate=pl.CostEstimate(
            flops=2 * m_pad * k_pad * n_pad,
            transcendentals=0,
            bytes_accessed=(m_pad * k_pad + k_pad * n_pad + m_pad * n_pad + n_pad) * 4,
        ),
    )(x_p, w_p, b_p)
    return out[:m, :n]


# ---------------------------------------------------------------------------
# JAX glue: im2col, layer composition, parameter init
# ---------------------------------------------------------------------------
def im2col_nhwc(x, kh, kw, stride, pad):
    """x: (N, H, W, C) -> patches (N*Hout*Wout, kh*kw*C) + (Hout, Wout)."""
    # TODO(synk): eliminate this HBM im2col blow-up by accumulating shifted
    # input @ per-tap weight matmuls inside the kernel (stride-2 windows need
    # Element/strided index maps); patches are emitted in bf16 meanwhile.
    n, h, w, c = x.shape
    xp = jnp.pad(x, ((0, 0), (pad, pad), (pad, pad), (0, 0)))
    hout = (h + 2 * pad - kh) // stride + 1
    wout = (w + 2 * pad - kw) // stride + 1
    cols = []
    for i in range(kh):
        for j in range(kw):
            cols.append(
                xp[:, i:i + stride * hout:stride, j:j + stride * wout:stride, :]
            )
    patches = jnp.stack(cols, axis=3).reshape(n, hout, wout, kh * kw * c)
    return patches.reshape(n * hout * wout, kh * kw * c), hout, wout


def conv_bn_relu_layer(x_nhwc, layer_params, stride, pad):
    w, b, gamma, beta = layer_params          # w: (Cout, Cin, kh, kw) torch layout
    cout, cin, kh, kw = w.shape
    n = x_nhwc.shape[0]

    patches, hout, wout = im2col_nhwc(x_nhwc, kh, kw, stride, pad)
    m, k = patches.shape
    k_pad = _round_up(k, LANE)
    c_pad = _round_up(cout, LANE)
    tile_m = _choose_tile_m(m)
    m_pad = _round_up(m, tile_m)

    # bf16 patches halve HBM traffic for the im2col matrix and feed the MXU densely.
    patches = jnp.pad(patches, ((0, m_pad - m), (0, k_pad - k))).astype(jnp.bfloat16)

    # (Cout, Cin, kh, kw) -> (kh*kw*Cin, Cout), zero-padded lane-dense, bf16 for MXU.
    w2 = jnp.transpose(w, (2, 3, 1, 0)).reshape(k, cout)
    w2 = jnp.pad(w2, ((0, k_pad - k), (0, c_pad - cout))).astype(jnp.bfloat16)
    b_row = jnp.pad(b, (0, c_pad - cout)).reshape(1, c_pad)
    gamma_p = jnp.pad(gamma, (0, c_pad - cout))   # pad channels: gamma = beta = 0
    beta_p = jnp.pad(beta, (0, c_pad - cout))

    y, stats = conv_matmul_stats_pallas(patches, w2, b_row, tile_m)

    # Training-mode BatchNorm (biased variance) from the per-tile partial sums.
    # Each zero-padded patch row contributes exactly `b` to y -> subtract exactly.
    n_pad_rows = m_pad - m
    sum_y = stats[:, 0, :].sum(axis=0) - n_pad_rows * b_row[0]
    sum_yy = stats[:, 1, :].sum(axis=0) - n_pad_rows * (b_row[0] * b_row[0])
    mean = sum_y / m
    var = jnp.maximum(sum_yy / m - mean * mean, 0.0)
    scale = gamma_p * jax.lax.rsqrt(var + BN_EPS)
    shift = beta_p - mean * scale

    act = affine_relu_pallas(
        y, scale.reshape(1, c_pad), shift.reshape(1, c_pad), tile_m)
    return act[:m, :cout].reshape(n, hout, wout, cout)


def init_params(image_size, num_classes, key):
    cfgs = [(3, 16, 7), (16, 32, 3), (32, 64, 3), (64, 128, 3), (128, 256, 3)]
    params = {"conv": []}
    for cin, cout, k in cfgs:
        key, kw_, kb_, kg_, kbe_ = jax.random.split(key, 5)
        fan_in = cin * k * k
        w = jax.random.normal(kw_, (cout, cin, k, k), jnp.float32) / jnp.sqrt(fan_in)
        b = 0.1 * jax.random.normal(kb_, (cout,), jnp.float32)
        gamma = 1.0 + 0.1 * jax.random.normal(kg_, (cout,), jnp.float32)
        beta = 0.1 * jax.random.normal(kbe_, (cout,), jnp.float32)
        params["conv"].append((w, b, gamma, beta))
    fc_in = (image_size // 8) ** 2 * 256
    key, kw_, kb_ = jax.random.split(key, 3)
    params["fc_w"] = (
        jax.random.normal(kw_, (num_classes, fc_in), jnp.float32) / jnp.sqrt(fc_in)
    )
    params["fc_b"] = 0.1 * jax.random.normal(kb_, (num_classes,), jnp.float32)
    return params


def celebrity_convnet_forward(x_nchw, params):
    # NCHW (PyTorch) -> NHWC (internal layout), converted once at the boundary.
    x = jnp.transpose(x_nchw, (0, 2, 3, 1)).astype(jnp.float32)
    strides = [2, 2, 2, 1, 1]
    pads = [1, 1, 1, 1, 1]
    for layer_params, s, p in zip(params["conv"], strides, pads):
        x = conv_bn_relu_layer(x, layer_params, s, p)

    n, h, w, c = x.shape
    # Flatten directly in NHWC order; permute the fc weight (stored in torch's
    # (C,H,W)-flatten order) once instead of transposing the big activation.
    x_flat = x.reshape(n, h * w * c)
    fc_w = params["fc_w"]                       # (num_classes, C*H*W)
    num_classes = fc_w.shape[0]
    w_perm = (
        fc_w.reshape(num_classes, c, h, w)
        .transpose(0, 2, 3, 1)
        .reshape(num_classes, h * w * c)
    )
    return linear_pallas(x_flat, jnp.transpose(w_perm), params["fc_b"])


# ---------------------------------------------------------------------------
if __name__ == "__main__":
    IMAGE_SIZE = 32      # conv stack yields 4x4 spatial = image_size/8, matches fc1
    NUM_CLASSES = 10
    BATCH = 2

    key = jax.random.PRNGKey(0)
    key, xk = jax.random.split(key)
    x = jax.random.normal(xk, (BATCH, 3, IMAGE_SIZE, IMAGE_SIZE), jnp.float32)
    params = init_params(IMAGE_SIZE, NUM_CLASSES, key)

    fwd = jax.jit(functools.partial(celebrity_convnet_forward, params=params))
    out = fwd(x)
    jax.block_until_ready(out)
    assert out.shape == (BATCH, NUM_CLASSES), out.shape
    print("KERNEL_OK")
</pallas_src>

<mosaic_0001>
module attributes {stable_mosaic.version = 11 : i64} {
  func.func @conv_matmul_stats_kernel(%arg0: i32, %arg1: memref<392x256xbf16, #tpu.memory_space<vmem>>, %arg2: memref<256x128xbf16, #tpu.memory_space<vmem>>, %arg3: memref<1x128xf32, #tpu.memory_space<vmem>>, %arg4: memref<392x128xf32, #tpu.memory_space<vmem>>, %arg5: memref<1x8x128xf32, #tpu.memory_space<vmem>>) attributes {dimension_semantics = [#tpu.dimension_semantics<parallel>], iteration_bounds = array<i64: 1>, scalar_prefetch = 0 : i64, scratch_operands = 0 : i64, tpu.core_type = #tpu.core_type<tc>, window_params = [{transform_indices = @transform_0, window_bounds = array<i64: 392, 256>}, {pipeline_mode = #tpu.pipeline_mode<synchronous>, transform_indices = @transform_1, window_bounds = array<i64: 256, 128>}, {pipeline_mode = #tpu.pipeline_mode<synchronous>, transform_indices = @transform_2, window_bounds = array<i64: 1, 128>}, {transform_indices = @transform_3, window_bounds = array<i64: 392, 128>}, {transform_indices = @transform_4, window_bounds = array<i64: 1, 8, 128>}]} {
    %c0 = arith.constant 0 : index
    %c0_0 = arith.constant 0 : index
    %0 = vector.load %arg1[%c0, %c0_0] : memref<392x256xbf16, #tpu.memory_space<vmem>>, vector<392x256xbf16>
    %c0_1 = arith.constant 0 : index
    %c0_2 = arith.constant 0 : index
    %1 = vector.load %arg2[%c0_1, %c0_2] : memref<256x128xbf16, #tpu.memory_space<vmem>>, vector<256x128xbf16>
    %cst = arith.constant dense<0.000000e+00> : vector<392x128xf32>
    %2 = tpu.matmul %0, %1, %cst {dimension_numbers = #tpu.dot_dimension_numbers<[1], [0], [0], [1], [0, 0, 1, 1], [], []>} : vector<392x256xbf16>, vector<256x128xbf16>, vector<392x128xf32> -> vector<392x128xf32>
    %c0_3 = arith.constant 0 : index
    %c0_4 = arith.constant 0 : index
    %3 = vector.load %arg3[%c0_3, %c0_4] : memref<1x128xf32, #tpu.memory_space<vmem>>, vector<1x128xf32>
    %4 = vector.broadcast %3 : vector<1x128xf32> to vector<392x128xf32>
    %5 = arith.addf %2, %4 : vector<392x128xf32>
    %c0_5 = arith.constant 0 : index
    %c0_6 = arith.constant 0 : index
    %6 = vector.load %arg4[%c0_5, %c0_6] : memref<392x128xf32, #tpu.memory_space<vmem>>, vector<392x128xf32>
    tpu.vector_store %arg4[%c0_5, %c0_6], %5 {strides = array<i32>} : memref<392x128xf32, #tpu.memory_space<vmem>>, vector<392x128xf32>,
    %cst_7 = arith.constant dense<0.000000e+00> : vector<128xf32>
    %7 = vector.multi_reduction <add>, %5, %cst_7 [0] : vector<392x128xf32> to vector<128xf32>
    %8 = vector.shape_cast %7 : vector<128xf32> to vector<1x128xf32>
    %9 = arith.mulf %5, %5 : vector<392x128xf32>
    %cst_8 = arith.constant dense<0.000000e+00> : vector<128xf32>
    %10 = vector.multi_reduction <add>, %9, %cst_8 [0] : vector<392x128xf32> to vector<128xf32>
    %11 = vector.shape_cast %10 : vector<128xf32> to vector<1x128xf32>
    %cst_9 = arith.constant 0.000000e+00 : f32
    %12 = vector.broadcast %cst_9 : f32 to vector<6x128xf32>
    %13 = tpu.concatenate %8, %11, %12 in 0 : vector<1x128xf32>, vector<1x128xf32>, vector<6x128xf32> -> vector<8x128xf32>
    %14 = vector.shape_cast %13 : vector<8x128xf32> to vector<1x8x128xf32>
    %c0_10 = arith.constant 0 : index
    %c0_11 = arith.constant 0 : index
    %c0_12 = arith.constant 0 : index
    %15 = vector.load %arg5[%c0_10, %c0_11, %c0_12] : memref<1x8x128xf32, #tpu.memory_space<vmem>>, vector<1x8x128xf32>
    tpu.vector_store %arg5[%c0_10, %c0_11, %c0_12], %14 {strides = array<i32>} : memref<1x8x128xf32, #tpu.memory_space<vmem>>, vector<1x8x128xf32>,
    return
  }
  func.func @transform_0(%arg0: i32) -> (i32, i32) {
    %c0_i32 = arith.constant 0 : i32
    %c0_i32_0 = arith.constant 0 : i32
    return %arg0, %c0_i32 : i32, i32
  }
  func.func @transform_1(%arg0: i32) -> (i32, i32) {
    %c0_i32 = arith.constant 0 : i32
    %c0_i32_0 = arith.constant 0 : i32
    %c0_i32_1 = arith.constant 0 : i32
    return %c0_i32, %c0_i32_0 : i32, i32
  }
  func.func @transform_2(%arg0: i32) -> (i32, i32) {
    %c0_i32 = arith.constant 0 : i32
    %c0_i32_0 = arith.constant 0 : i32
    %c0_i32_1 = arith.constant 0 : i32
    return %c0_i32, %c0_i32_0 : i32, i32
  }
  func.func @transform_3(%arg0: i32) -> (i32, i32) {
    %c0_i32 = arith.constant 0 : i32
    %c0_i32_0 = arith.constant 0 : i32
    return %arg0, %c0_i32 : i32, i32
  }
  func.func @transform_4(%arg0: i32) -> (i32, i32, i32) {
    %c0_i32 = arith.constant 0 : i32
    %c0_i32_0 = arith.constant 0 : i32
    %c0_i32_1 = arith.constant 0 : i32
    return %arg0, %c0_i32, %c0_i32_0 : i32, i32, i32
  }
}

module attributes {stable_mosaic.version = 11 : i64} {
  func.func @affine_relu_kernel(%arg0: i32, %arg1: memref<392x128xf32, #tpu.memory_space<vmem>>, %arg2: memref<1x128xf32, #tpu.memory_space<vmem>>, %arg3: memref<1x128xf32, #tpu.memory_space<vmem>>, %arg4: memref<392x128xf32, #tpu.memory_space<vmem>>) attributes {dimension_semantics = [#tpu.dimension_semantics<parallel>], iteration_bounds = array<i64: 1>, scalar_prefetch = 0 : i64, scratch_operands = 0 : i64, tpu.core_type = #tpu.core_type<tc>, window_params = [{transform_indices = @transform_0, window_bounds = array<i64: 392, 128>}, {pipeline_mode = #tpu.pipeline_mode<synchronous>, transform_indices = @transform_1, window_bounds = array<i64: 1, 128>}, {pipeline_mode = #tpu.pipeline_mode<synchronous>, transform_indices = @transform_2, window_bounds = array<i64: 1, 128>}, {transform_indices = @transform_3, window_bounds = array<i64: 392, 128>}]} {
    %c0 = arith.constant 0 : index
    %c0_0 = arith.constant 0 : index
    %0 = vector.load %arg1[%c0, %c0_0] : memref<392x128xf32, #tpu.memory_space<vmem>>, vector<392x128xf32>
    %c0_1 = arith.constant 0 : index
    %c0_2 = arith.constant 0 : index
    %1 = vector.load %arg2[%c0_1, %c0_2] : memref<1x128xf32, #tpu.memory_space<vmem>>, vector<1x128xf32>
    %2 = vector.broadcast %1 : vector<1x128xf32> to vector<392x128xf32>
    %3 = arith.mulf %0, %2 : vector<392x128xf32>
    %c0_3 = arith.constant 0 : index
    %c0_4 = arith.constant 0 : index
    %4 = vector.load %arg3[%c0_3, %c0_4] : memref<1x128xf32, #tpu.memory_space<vmem>>, vector<1x128xf32>
    %5 = vector.broadcast %4 : vector<1x128xf32> to vector<392x128xf32>
    %6 = arith.addf %3, %5 : vector<392x128xf32>
    %cst = arith.constant 0.000000e+00 : f32
    %7 = vector.broadcast %cst : f32 to vector<392x128xf32>
    %8 = arith.maximumf %6, %7 : vector<392x128xf32>
    %c0_5 = arith.constant 0 : index
    %c0_6 = arith.constant 0 : index
    %9 = vector.load %arg4[%c0_5, %c0_6] : memref<392x128xf32, #tpu.memory_space<vmem>>, vector<392x128xf32>
    tpu.vector_store %arg4[%c0_5, %c0_6], %8 {strides = array<i32>} : memref<392x128xf32, #tpu.memory_space<vmem>>, vector<392x128xf32>,
    return
  }
  func.func @transform_0(%arg0: i32) -> (i32, i32) {
    %c0_i32 = arith.constant 0 : i32
    %c0_i32_0 = arith.constant 0 : i32
    return %arg0, %c0_i32 : i32, i32
  }
  func.func @transform_1(%arg0: i32) -> (i32, i32) {
    %c0_i32 = arith.constant 0 : i32
    %c0_i32_0 = arith.constant 0 : i32
    %c0_i32_1 = arith.constant 0 : i32
    return %c0_i32, %c0_i32_0 : i32, i32
  }
  func.func @transform_2(%arg0: i32) -> (i32, i32) {
    %c0_i32 = arith.constant 0 : i32
    %c0_i32_0 = arith.constant 0 : i32
    %c0_i32_1 = arith.constant 0 : i32
    return %c0_i32, %c0_i32_0 : i32, i32
  }
  func.func @transform_3(%arg0: i32) -> (i32, i32) {
    %c0_i32 = arith.constant 0 : i32
    %c0_i32_0 = arith.constant 0 : i32
    return %arg0, %c0_i32 : i32, i32
  }
}

module attributes {stable_mosaic.version = 11 : i64} {
  func.func @conv_matmul_stats_kernel(%arg0: i32, %arg1: memref<104x256xbf16, #tpu.memory_space<vmem>>, %arg2: memref<256x128xbf16, #tpu.memory_space<vmem>>, %arg3: memref<1x128xf32, #tpu.memory_space<vmem>>, %arg4: memref<104x128xf32, #tpu.memory_space<vmem>>, %arg5: memref<1x8x128xf32, #tpu.memory_space<vmem>>) attributes {dimension_semantics = [#tpu.dimension_semantics<parallel>], iteration_bounds = array<i64: 1>, scalar_prefetch = 0 : i64, scratch_operands = 0 : i64, tpu.core_type = #tpu.core_type<tc>, window_params = [{transform_indices = @transform_0, window_bounds = array<i64: 104, 256>}, {pipeline_mode = #tpu.pipeline_mode<synchronous>, transform_indices = @transform_1, window_bounds = array<i64: 256, 128>}, {pipeline_mode = #tpu.pipeline_mode<synchronous>, transform_indices = @transform_2, window_bounds = array<i64: 1, 128>}, {transform_indices = @transform_3, window_bounds = array<i64: 104, 128>}, {transform_indices = @transform_4, window_bounds = array<i64: 1, 8, 128>}]} {
    %c0 = arith.constant 0 : index
    %c0_0 = arith.constant 0 : index
    %0 = vector.load %arg1[%c0, %c0_0] : memref<104x256xbf16, #tpu.memory_space<vmem>>, vector<104x256xbf16>
    %c0_1 = arith.constant 0 : index
    %c0_2 = arith.constant 0 : index
    %1 = vector.load %arg2[%c0_1, %c0_2] : memref<256x128xbf16, #tpu.memory_space<vmem>>, vector<256x128xbf16>
    %cst = arith.constant dense<0.000000e+00> : vector<104x128xf32>
    %2 = tpu.matmul %0, %1, %cst {dimension_numbers = #tpu.dot_dimension_numbers<[1], [0], [0], [1], [0, 0, 1, 1], [], []>} : vector<104x256xbf16>, vector<256x128xbf16>, vector<104x128xf32> -> vector<104x128xf32>
    %c0_3 = arith.constant 0 : index
    %c0_4 = arith.constant 0 : index
    %3 = vector.load %arg3[%c0_3, %c0_4] : memref<1x128xf32, #tpu.memory_space<vmem>>, vector<1x128xf32>
    %4 = vector.broadcast %3 : vector<1x128xf32> to vector<104x128xf32>
    %5 = arith.addf %2, %4 : vector<104x128xf32>
    %c0_5 = arith.constant 0 : index
    %c0_6 = arith.constant 0 : index
    %6 = vector.load %arg4[%c0_5, %c0_6] : memref<104x128xf32, #tpu.memory_space<vmem>>, vector<104x128xf32>
    tpu.vector_store %arg4[%c0_5, %c0_6], %5 {strides = array<i32>} : memref<104x128xf32, #tpu.memory_space<vmem>>, vector<104x128xf32>,
    %cst_7 = arith.constant dense<0.000000e+00> : vector<128xf32>
    %7 = vector.multi_reduction <add>, %5, %cst_7 [0] : vector<104x128xf32> to vector<128xf32>
    %8 = vector.shape_cast %7 : vector<128xf32> to vector<1x128xf32>
    %9 = arith.mulf %5, %5 : vector<104x128xf32>
    %cst_8 = arith.constant dense<0.000000e+00> : vector<128xf32>
    %10 = vector.multi_reduction <add>, %9, %cst_8 [0] : vector<104x128xf32> to vector<128xf32>
    %11 = vector.shape_cast %10 : vector<128xf32> to vector<1x128xf32>
    %cst_9 = arith.constant 0.000000e+00 : f32
    %12 = vector.broadcast %cst_9 : f32 to vector<6x128xf32>
    %13 = tpu.concatenate %8, %11, %12 in 0 : vector<1x128xf32>, vector<1x128xf32>, vector<6x128xf32> -> vector<8x128xf32>
    %14 = vector.shape_cast %13 : vector<8x128xf32> to vector<1x8x128xf32>
    %c0_10 = arith.constant 0 : index
    %c0_11 = arith.constant 0 : index
    %c0_12 = arith.constant 0 : index
    %15 = vector.load %arg5[%c0_10, %c0_11, %c0_12] : memref<1x8x128xf32, #tpu.memory_space<vmem>>, vector<1x8x128xf32>
    tpu.vector_store %arg5[%c0_10, %c0_11, %c0_12], %14 {strides = array<i32>} : memref<1x8x128xf32, #tpu.memory_space<vmem>>, vector<1x8x128xf32>,
    return
  }
  func.func @transform_0(%arg0: i32) -> (i32, i32) {
    %c0_i32 = arith.constant 0 : i32
    %c0_i32_0 = arith.constant 0 : i32
    return %arg0, %c0_i32 : i32, i32
  }
  func.func @transform_1(%arg0: i32) -> (i32, i32) {
    %c0_i32 = arith.constant 0 : i32
    %c0_i32_0 = arith.constant 0 : i32
    %c0_i32_1 = arith.constant 0 : i32
    return %c0_i32, %c0_i32_0 : i32, i32
  }
  func.func @transform_2(%arg0: i32) -> (i32, i32) {
    %c0_i32 = arith.constant 0 : i32
    %c0_i32_0 = arith.constant 0 : i32
    %c0_i32_1 = arith.constant 0 : i32
    return %c0_i32, %c0_i32_0 : i32, i32
  }
  func.func @transform_3(%arg0: i32) -> (i32, i32) {
    %c0_i32 = arith.constant 0 : i32
    %c0_i32_0 = arith.constant 0 : i32
    return %arg0, %c0_i32 : i32, i32
  }
  func.func @transform_4(%arg0: i32) -> (i32, i32, i32) {
    %c0_i32 = arith.constant 0 : i32
    %c0_i32_0 = arith.constant 0 : i32
    %c0_i32_1 = arith.constant 0 : i32
    return %arg0, %c0_i32, %c0_i32_0 : i32, i32, i32
  }
}

module attributes {stable_mosaic.version = 11 : i64} {
  func.func @affine_relu_kernel(%arg0: i32, %arg1: memref<104x128xf32, #tpu.memory_space<vmem>>, %arg2: memref<1x128xf32, #tpu.memory_space<vmem>>, %arg3: memref<1x128xf32, #tpu.memory_space<vmem>>, %arg4: memref<104x128xf32, #tpu.memory_space<vmem>>) attributes {dimension_semantics = [#tpu.dimension_semantics<parallel>], iteration_bounds = array<i64: 1>, scalar_prefetch = 0 : i64, scratch_operands = 0 : i64, tpu.core_type = #tpu.core_type<tc>, window_params = [{transform_indices = @transform_0, window_bounds = array<i64: 104, 128>}, {pipeline_mode = #tpu.pipeline_mode<synchronous>, transform_indices = @transform_1, window_bounds = array<i64: 1, 128>}, {pipeline_mode = #tpu.pipeline_mode<synchronous>, transform_indices = @transform_2, window_bounds = array<i64: 1, 128>}, {transform_indices = @transform_3, window_bounds = array<i64: 104, 128>}]} {
    %c0 = arith.constant 0 : index
    %c0_0 = arith.constant 0 : index
    %0 = vector.load %arg1[%c0, %c0_0] : memref<104x128xf32, #tpu.memory_space<vmem>>, vector<104x128xf32>
    %c0_1 = arith.constant 0 : index
    %c0_2 = arith.constant 0 : index
    %1 = vector.load %arg2[%c0_1, %c0_2] : memref<1x128xf32, #tpu.memory_space<vmem>>, vector<1x128xf32>
    %2 = vector.broadcast %1 : vector<1x128xf32> to vector<104x128xf32>
    %3 = arith.mulf %0, %2 : vector<104x128xf32>
    %c0_3 = arith.constant 0 : index
    %c0_4 = arith.constant 0 : index
    %4 = vector.load %arg3[%c0_3, %c0_4] : memref<1x128xf32, #tpu.memory_space<vmem>>, vector<1x128xf32>
    %5 = vector.broadcast %4 : vector<1x128xf32> to vector<104x128xf32>
    %6 = arith.addf %3, %5 : vector<104x128xf32>
    %cst = arith.constant 0.000000e+00 : f32
    %7 = vector.broadcast %cst : f32 to vector<104x128xf32>
    %8 = arith.maximumf %6, %7 : vector<104x128xf32>
    %c0_5 = arith.constant 0 : index
    %c0_6 = arith.constant 0 : index
    %9 = vector.load %arg4[%c0_5, %c0_6] : memref<104x128xf32, #tpu.memory_space<vmem>>, vector<104x128xf32>
    tpu.vector_store %arg4[%c0_5, %c0_6], %8 {strides = array<i32>} : memref<104x128xf32, #tpu.memory_space<vmem>>, vector<104x128xf32>,
    return
  }
  func.func @transform_0(%arg0: i32) -> (i32, i32) {
    %c0_i32 = arith.constant 0 : i32
    %c0_i32_0 = arith.constant 0 : i32
    return %arg0, %c0_i32 : i32, i32
  }
  func.func @transform_1(%arg0: i32) -> (i32, i32) {
    %c0_i32 = arith.constant 0 : i32
    %c0_i32_0 = arith.constant 0 : i32
    %c0_i32_1 = arith.constant 0 : i32
    return %c0_i32, %c0_i32_0 : i32, i32
  }
  func.func @transform_2(%arg0: i32) -> (i32, i32) {
    %c0_i32 = arith.constant 0 : i32
    %c0_i32_0 = arith.constant 0 : i32
    %c0_i32_1 = arith.constant 0 : i32
    return %c0_i32, %c0_i32_0 : i32, i32
  }
  func.func @transform_3(%arg0: i32) -> (i32, i32) {
    %c0_i32 = arith.constant 0 : i32
    %c0_i32_0 = arith.constant 0 : i32
    return %arg0, %c0_i32 : i32, i32
  }
}

module attributes {stable_mosaic.version = 11 : i64} {
  func.func @conv_matmul_stats_kernel(%arg0: i32, %arg1: memref<32x384xbf16, #tpu.memory_space<vmem>>, %arg2: memref<384x128xbf16, #tpu.memory_space<vmem>>, %arg3: memref<1x128xf32, #tpu.memory_space<vmem>>, %arg4: memref<32x128xf32, #tpu.memory_space<vmem>>, %arg5: memref<1x8x128xf32, #tpu.memory_space<vmem>>) attributes {dimension_semantics = [#tpu.dimension_semantics<parallel>], iteration_bounds = array<i64: 1>, scalar_prefetch = 0 : i64, scratch_operands = 0 : i64, tpu.core_type = #tpu.core_type<tc>, window_params = [{transform_indices = @transform_0, window_bounds = array<i64: 32, 384>}, {pipeline_mode = #tpu.pipeline_mode<synchronous>, transform_indices = @transform_1, window_bounds = array<i64: 384, 128>}, {pipeline_mode = #tpu.pipeline_mode<synchronous>, transform_indices = @transform_2, window_bounds = array<i64: 1, 128>}, {transform_indices = @transform_3, window_bounds = array<i64: 32, 128>}, {transform_indices = @transform_4, window_bounds = array<i64: 1, 8, 128>}]} {
    %c0 = arith.constant 0 : index
    %c0_0 = arith.constant 0 : index
    %0 = vector.load %arg1[%c0, %c0_0] : memref<32x384xbf16, #tpu.memory_space<vmem>>, vector<32x384xbf16>
    %c0_1 = arith.constant 0 : index
    %c0_2 = arith.constant 0 : index
    %1 = vector.load %arg2[%c0_1, %c0_2] : memref<384x128xbf16, #tpu.memory_space<vmem>>, vector<384x128xbf16>
    %cst = arith.constant dense<0.000000e+00> : vector<32x128xf32>
    %2 = tpu.matmul %0, %1, %cst {dimension_numbers = #tpu.dot_dimension_numbers<[1], [0], [0], [1], [0, 0, 1, 1], [], []>} : vector<32x384xbf16>, vector<384x128xbf16>, vector<32x128xf32> -> vector<32x128xf32>
    %c0_3 = arith.constant 0 : index
    %c0_4 = arith.constant 0 : index
    %3 = vector.load %arg3[%c0_3, %c0_4] : memref<1x128xf32, #tpu.memory_space<vmem>>, vector<1x128xf32>
    %4 = vector.broadcast %3 : vector<1x128xf32> to vector<32x128xf32>
    %5 = arith.addf %2, %4 : vector<32x128xf32>
    %c0_5 = arith.constant 0 : index
    %c0_6 = arith.constant 0 : index
    %6 = vector.load %arg4[%c0_5, %c0_6] : memref<32x128xf32, #tpu.memory_space<vmem>>, vector<32x128xf32>
    tpu.vector_store %arg4[%c0_5, %c0_6], %5 {strides = array<i32>} : memref<32x128xf32, #tpu.memory_space<vmem>>, vector<32x128xf32>,
    %cst_7 = arith.constant dense<0.000000e+00> : vector<128xf32>
    %7 = vector.multi_reduction <add>, %5, %cst_7 [0] : vector<32x128xf32> to vector<128xf32>
    %8 = vector.shape_cast %7 : vector<128xf32> to vector<1x128xf32>
    %9 = arith.mulf %5, %5 : vector<32x128xf32>
    %cst_8 = arith.constant dense<0.000000e+00> : vector<128xf32>
    %10 = vector.multi_reduction <add>, %9, %cst_8 [0] : vector<32x128xf32> to vector<128xf32>
    %11 = vector.shape_cast %10 : vector<128xf32> to vector<1x128xf32>
    %cst_9 = arith.constant 0.000000e+00 : f32
    %12 = vector.broadcast %cst_9 : f32 to vector<6x128xf32>
    %13 = tpu.concatenate %8, %11, %12 in 0 : vector<1x128xf32>, vector<1x128xf32>, vector<6x128xf32> -> vector<8x128xf32>
    %14 = vector.shape_cast %13 : vector<8x128xf32> to vector<1x8x128xf32>
    %c0_10 = arith.constant 0 : index
    %c0_11 = arith.constant 0 : index
    %c0_12 = arith.constant 0 : index
    %15 = vector.load %arg5[%c0_10, %c0_11, %c0_12] : memref<1x8x128xf32, #tpu.memory_space<vmem>>, vector<1x8x128xf32>
    tpu.vector_store %arg5[%c0_10, %c0_11, %c0_12], %14 {strides = array<i32>} : memref<1x8x128xf32, #tpu.memory_space<vmem>>, vector<1x8x128xf32>,
    return
  }
  func.func @transform_0(%arg0: i32) -> (i32, i32) {
    %c0_i32 = arith.constant 0 : i32
    %c0_i32_0 = arith.constant 0 : i32
    return %arg0, %c0_i32 : i32, i32
  }
  func.func @transform_1(%arg0: i32) -> (i32, i32) {
    %c0_i32 = arith.constant 0 : i32
    %c0_i32_0 = arith.constant 0 : i32
    %c0_i32_1 = arith.constant 0 : i32
    return %c0_i32, %c0_i32_0 : i32, i32
  }
  func.func @transform_2(%arg0: i32) -> (i32, i32) {
    %c0_i32 = arith.constant 0 : i32
    %c0_i32_0 = arith.constant 0 : i32
    %c0_i32_1 = arith.constant 0 : i32
    return %c0_i32, %c0_i32_0 : i32, i32
  }
  func.func @transform_3(%arg0: i32) -> (i32, i32) {
    %c0_i32 = arith.constant 0 : i32
    %c0_i32_0 = arith.constant 0 : i32
    return %arg0, %c0_i32 : i32, i32
  }
  func.func @transform_4(%arg0: i32) -> (i32, i32, i32) {
    %c0_i32 = arith.constant 0 : i32
    %c0_i32_0 = arith.constant 0 : i32
    %c0_i32_1 = arith.constant 0 : i32
    return %arg0, %c0_i32, %c0_i32_0 : i32, i32, i32
  }
}

module attributes {stable_mosaic.version = 11 : i64} {
  func.func @affine_relu_kernel(%arg0: i32, %arg1: memref<32x128xf32, #tpu.memory_space<vmem>>, %arg2: memref<1x128xf32, #tpu.memory_space<vmem>>, %arg3: memref<1x128xf32, #tpu.memory_space<vmem>>, %arg4: memref<32x128xf32, #tpu.memory_space<vmem>>) attributes {dimension_semantics = [#tpu.dimension_semantics<parallel>], iteration_bounds = array<i64: 1>, scalar_prefetch = 0 : i64, scratch_operands = 0 : i64, tpu.core_type = #tpu.core_type<tc>, window_params = [{transform_indices = @transform_0, window_bounds = array<i64: 32, 128>}, {pipeline_mode = #tpu.pipeline_mode<synchronous>, transform_indices = @transform_1, window_bounds = array<i64: 1, 128>}, {pipeline_mode = #tpu.pipeline_mode<synchronous>, transform_indices = @transform_2, window_bounds = array<i64: 1, 128>}, {transform_indices = @transform_3, window_bounds = array<i64: 32, 128>}]} {
    %c0 = arith.constant 0 : index
    %c0_0 = arith.constant 0 : index
    %0 = vector.load %arg1[%c0, %c0_0] : memref<32x128xf32, #tpu.memory_space<vmem>>, vector<32x128xf32>
    %c0_1 = arith.constant 0 : index
    %c0_2 = arith.constant 0 : index
    %1 = vector.load %arg2[%c0_1, %c0_2] : memref<1x128xf32, #tpu.memory_space<vmem>>, vector<1x128xf32>
    %2 = vector.broadcast %1 : vector<1x128xf32> to vector<32x128xf32>
    %3 = arith.mulf %0, %2 : vector<32x128xf32>
    %c0_3 = arith.constant 0 : index
    %c0_4 = arith.constant 0 : index
    %4 = vector.load %arg3[%c0_3, %c0_4] : memref<1x128xf32, #tpu.memory_space<vmem>>, vector<1x128xf32>
    %5 = vector.broadcast %4 : vector<1x128xf32> to vector<32x128xf32>
    %6 = arith.addf %3, %5 : vector<32x128xf32>
    %cst = arith.constant 0.000000e+00 : f32
    %7 = vector.broadcast %cst : f32 to vector<32x128xf32>
    %8 = arith.maximumf %6, %7 : vector<32x128xf32>
    %c0_5 = arith.constant 0 : index
    %c0_6 = arith.constant 0 : index
    %9 = vector.load %arg4[%c0_5, %c0_6] : memref<32x128xf32, #tpu.memory_space<vmem>>, vector<32x128xf32>
    tpu.vector_store %arg4[%c0_5, %c0_6], %8 {strides = array<i32>} : memref<32x128xf32, #tpu.memory_space<vmem>>, vector<32x128xf32>,
    return
  }
  func.func @transform_0(%arg0: i32) -> (i32, i32) {
    %c0_i32 = arith.constant 0 : i32
    %c0_i32_0 = arith.constant 0 : i32
    return %arg0, %c0_i32 : i32, i32
  }
  func.func @transform_1(%arg0: i32) -> (i32, i32) {
    %c0_i32 = arith.constant 0 : i32
    %c0_i32_0 = arith.constant 0 : i32
    %c0_i32_1 = arith.constant 0 : i32
    return %c0_i32, %c0_i32_0 : i32, i32
  }
  func.func @transform_2(%arg0: i32) -> (i32, i32) {
    %c0_i32 = arith.constant 0 : i32
    %c0_i32_0 = arith.constant 0 : i32
    %c0_i32_1 = arith.constant 0 : i32
    return %c0_i32, %c0_i32_0 : i32, i32
  }
  func.func @transform_3(%arg0: i32) -> (i32, i32) {
    %c0_i32 = arith.constant 0 : i32
    %c0_i32_0 = arith.constant 0 : i32
    return %arg0, %c0_i32 : i32, i32
  }
}

module attributes {stable_mosaic.version = 11 : i64} {
  func.func @conv_matmul_stats_kernel(%arg0: i32, %arg1: memref<32x640xbf16, #tpu.memory_space<vmem>>, %arg2: memref<640x128xbf16, #tpu.memory_space<vmem>>, %arg3: memref<1x128xf32, #tpu.memory_space<vmem>>, %arg4: memref<32x128xf32, #tpu.memory_space<vmem>>, %arg5: memref<1x8x128xf32, #tpu.memory_space<vmem>>) attributes {dimension_semantics = [#tpu.dimension_semantics<parallel>], iteration_bounds = array<i64: 1>, scalar_prefetch = 0 : i64, scratch_operands = 0 : i64, tpu.core_type = #tpu.core_type<tc>, window_params = [{transform_indices = @transform_0, window_bounds = array<i64: 32, 640>}, {pipeline_mode = #tpu.pipeline_mode<synchronous>, transform_indices = @transform_1, window_bounds = array<i64: 640, 128>}, {pipeline_mode = #tpu.pipeline_mode<synchronous>, transform_indices = @transform_2, window_bounds = array<i64: 1, 128>}, {transform_indices = @transform_3, window_bounds = array<i64: 32, 128>}, {transform_indices = @transform_4, window_bounds = array<i64: 1, 8, 128>}]} {
    %c0 = arith.constant 0 : index
    %c0_0 = arith.constant 0 : index
    %0 = vector.load %arg1[%c0, %c0_0] : memref<32x640xbf16, #tpu.memory_space<vmem>>, vector<32x640xbf16>
    %c0_1 = arith.constant 0 : index
    %c0_2 = arith.constant 0 : index
    %1 = vector.load %arg2[%c0_1, %c0_2] : memref<640x128xbf16, #tpu.memory_space<vmem>>, vector<640x128xbf16>
    %cst = arith.constant dense<0.000000e+00> : vector<32x128xf32>
    %2 = tpu.matmul %0, %1, %cst {dimension_numbers = #tpu.dot_dimension_numbers<[1], [0], [0], [1], [0, 0, 1, 1], [], []>} : vector<32x640xbf16>, vector<640x128xbf16>, vector<32x128xf32> -> vector<32x128xf32>
    %c0_3 = arith.constant 0 : index
    %c0_4 = arith.constant 0 : index
    %3 = vector.load %arg3[%c0_3, %c0_4] : memref<1x128xf32, #tpu.memory_space<vmem>>, vector<1x128xf32>
    %4 = vector.broadcast %3 : vector<1x128xf32> to vector<32x128xf32>
    %5 = arith.addf %2, %4 : vector<32x128xf32>
    %c0_5 = arith.constant 0 : index
    %c0_6 = arith.constant 0 : index
    %6 = vector.load %arg4[%c0_5, %c0_6] : memref<32x128xf32, #tpu.memory_space<vmem>>, vector<32x128xf32>
    tpu.vector_store %arg4[%c0_5, %c0_6], %5 {strides = array<i32>} : memref<32x128xf32, #tpu.memory_space<vmem>>, vector<32x128xf32>,
    %cst_7 = arith.constant dense<0.000000e+00> : vector<128xf32>
    %7 = vector.multi_reduction <add>, %5, %cst_7 [0] : vector<32x128xf32> to vector<128xf32>
    %8 = vector.shape_cast %7 : vector<128xf32> to vector<1x128xf32>
    %9 = arith.mulf %5, %5 : vector<32x128xf32>
    %cst_8 = arith.constant dense<0.000000e+00> : vector<128xf32>
    %10 = vector.multi_reduction <add>, %9, %cst_8 [0] : vector<32x128xf32> to vector<128xf32>
    %11 = vector.shape_cast %10 : vector<128xf32> to vector<1x128xf32>
    %cst_9 = arith.constant 0.000000e+00 : f32
    %12 = vector.broadcast %cst_9 : f32 to vector<6x128xf32>
    %13 = tpu.concatenate %8, %11, %12 in 0 : vector<1x128xf32>, vector<1x128xf32>, vector<6x128xf32> -> vector<8x128xf32>
    %14 = vector.shape_cast %13 : vector<8x128xf32> to vector<1x8x128xf32>
    %c0_10 = arith.constant 0 : index
    %c0_11 = arith.constant 0 : index
    %c0_12 = arith.constant 0 : index
    %15 = vector.load %arg5[%c0_10, %c0_11, %c0_12] : memref<1x8x128xf32, #tpu.memory_space<vmem>>, vector<1x8x128xf32>
    tpu.vector_store %arg5[%c0_10, %c0_11, %c0_12], %14 {strides = array<i32>} : memref<1x8x128xf32, #tpu.memory_space<vmem>>, vector<1x8x128xf32>,
    return
  }
  func.func @transform_0(%arg0: i32) -> (i32, i32) {
    %c0_i32 = arith.constant 0 : i32
    %c0_i32_0 = arith.constant 0 : i32
    return %arg0, %c0_i32 : i32, i32
  }
  func.func @transform_1(%arg0: i32) -> (i32, i32) {
    %c0_i32 = arith.constant 0 : i32
    %c0_i32_0 = arith.constant 0 : i32
    %c0_i32_1 = arith.constant 0 : i32
    return %c0_i32, %c0_i32_0 : i32, i32
  }
  func.func @transform_2(%arg0: i32) -> (i32, i32) {
    %c0_i32 = arith.constant 0 : i32
    %c0_i32_0 = arith.constant 0 : i32
    %c0_i32_1 = arith.constant 0 : i32
    return %c0_i32, %c0_i32_0 : i32, i32
  }
  func.func @transform_3(%arg0: i32) -> (i32, i32) {
    %c0_i32 = arith.constant 0 : i32
    %c0_i32_0 = arith.constant 0 : i32
    return %arg0, %c0_i32 : i32, i32
  }
  func.func @transform_4(%arg0: i32) -> (i32, i32, i32) {
    %c0_i32 = arith.constant 0 : i32
    %c0_i32_0 = arith.constant 0 : i32
    %c0_i32_1 = arith.constant 0 : i32
    return %arg0, %c0_i32, %c0_i32_0 : i32, i32, i32
  }
}

module attributes {stable_mosaic.version = 11 : i64} {
  func.func @conv_matmul_stats_kernel(%arg0: i32, %arg1: memref<32x1152xbf16, #tpu.memory_space<vmem>>, %arg2: memref<1152x256xbf16, #tpu.memory_space<vmem>>, %arg3: memref<1x256xf32, #tpu.memory_space<vmem>>, %arg4: memref<32x256xf32, #tpu.memory_space<vmem>>, %arg5: memref<1x8x256xf32, #tpu.memory_space<vmem>>) attributes {dimension_semantics = [#tpu.dimension_semantics<parallel>], iteration_bounds = array<i64: 1>, scalar_prefetch = 0 : i64, scratch_operands = 0 : i64, tpu.core_type = #tpu.core_type<tc>, window_params = [{transform_indices = @transform_0, window_bounds = array<i64: 32, 1152>}, {pipeline_mode = #tpu.pipeline_mode<synchronous>, transform_indices = @transform_1, window_bounds = array<i64: 1152, 256>}, {pipeline_mode = #tpu.pipeline_mode<synchronous>, transform_indices = @transform_2, window_bounds = array<i64: 1, 256>}, {transform_indices = @transform_3, window_bounds = array<i64: 32, 256>}, {transform_indices = @transform_4, window_bounds = array<i64: 1, 8, 256>}]} {
    %c0 = arith.constant 0 : index
    %c0_0 = arith.constant 0 : index
    %0 = vector.load %arg1[%c0, %c0_0] : memref<32x1152xbf16, #tpu.memory_space<vmem>>, vector<32x1152xbf16>
    %c0_1 = arith.constant 0 : index
    %c0_2 = arith.constant 0 : index
    %1 = vector.load %arg2[%c0_1, %c0_2] : memref<1152x256xbf16, #tpu.memory_space<vmem>>, vector<1152x256xbf16>
    %cst = arith.constant dense<0.000000e+00> : vector<32x256xf32>
    %2 = tpu.matmul %0, %1, %cst {dimension_numbers = #tpu.dot_dimension_numbers<[1], [0], [0], [1], [0, 0, 1, 1], [], []>} : vector<32x1152xbf16>, vector<1152x256xbf16>, vector<32x256xf32> -> vector<32x256xf32>
    %c0_3 = arith.constant 0 : index
    %c0_4 = arith.constant 0 : index
    %3 = vector.load %arg3[%c0_3, %c0_4] : memref<1x256xf32, #tpu.memory_space<vmem>>, vector<1x256xf32>
    %4 = vector.broadcast %3 : vector<1x256xf32> to vector<32x256xf32>
    %5 = arith.addf %2, %4 : vector<32x256xf32>
    %c0_5 = arith.constant 0 : index
    %c0_6 = arith.constant 0 : index
    %6 = vector.load %arg4[%c0_5, %c0_6] : memref<32x256xf32, #tpu.memory_space<vmem>>, vector<32x256xf32>
    tpu.vector_store %arg4[%c0_5, %c0_6], %5 {strides = array<i32>} : memref<32x256xf32, #tpu.memory_space<vmem>>, vector<32x256xf32>,
    %cst_7 = arith.constant dense<0.000000e+00> : vector<256xf32>
    %7 = vector.multi_reduction <add>, %5, %cst_7 [0] : vector<32x256xf32> to vector<256xf32>
    %8 = vector.shape_cast %7 : vector<256xf32> to vector<1x256xf32>
    %9 = arith.mulf %5, %5 : vector<32x256xf32>
    %cst_8 = arith.constant dense<0.000000e+00> : vector<256xf32>
    %10 = vector.multi_reduction <add>, %9, %cst_8 [0] : vector<32x256xf32> to vector<256xf32>
    %11 = vector.shape_cast %10 : vector<256xf32> to vector<1x256xf32>
    %cst_9 = arith.constant 0.000000e+00 : f32
    %12 = vector.broadcast %cst_9 : f32 to vector<6x256xf32>
    %13 = tpu.concatenate %8, %11, %12 in 0 : vector<1x256xf32>, vector<1x256xf32>, vector<6x256xf32> -> vector<8x256xf32>
    %14 = vector.shape_cast %13 : vector<8x256xf32> to vector<1x8x256xf32>
    %c0_10 = arith.constant 0 : index
    %c0_11 = arith.constant 0 : index
    %c0_12 = arith.constant 0 : index
    %15 = vector.load %arg5[%c0_10, %c0_11, %c0_12] : memref<1x8x256xf32, #tpu.memory_space<vmem>>, vector<1x8x256xf32>
    tpu.vector_store %arg5[%c0_10, %c0_11, %c0_12], %14 {strides = array<i32>} : memref<1x8x256xf32, #tpu.memory_space<vmem>>, vector<1x8x256xf32>,
    return
  }
  func.func @transform_0(%arg0: i32) -> (i32, i32) {
    %c0_i32 = arith.constant 0 : i32
    %c0_i32_0 = arith.constant 0 : i32
    return %arg0, %c0_i32 : i32, i32
  }
  func.func @transform_1(%arg0: i32) -> (i32, i32) {
    %c0_i32 = arith.constant 0 : i32
    %c0_i32_0 = arith.constant 0 : i32
    %c0_i32_1 = arith.constant 0 : i32
    return %c0_i32, %c0_i32_0 : i32, i32
  }
  func.func @transform_2(%arg0: i32) -> (i32, i32) {
    %c0_i32 = arith.constant 0 : i32
    %c0_i32_0 = arith.constant 0 : i32
    %c0_i32_1 = arith.constant 0 : i32
    return %c0_i32, %c0_i32_0 : i32, i32
  }
  func.func @transform_3(%arg0: i32) -> (i32, i32) {
    %c0_i32 = arith.constant 0 : i32
    %c0_i32_0 = arith.constant 0 : i32
    return %arg0, %c0_i32 : i32, i32
  }
  func.func @transform_4(%arg0: i32) -> (i32, i32, i32) {
    %c0_i32 = arith.constant 0 : i32
    %c0_i32_0 = arith.constant 0 : i32
    %c0_i32_1 = arith.constant 0 : i32
    return %arg0, %c0_i32, %c0_i32_0 : i32, i32, i32
  }
}

module attributes {stable_mosaic.version = 11 : i64} {
  func.func @affine_relu_kernel(%arg0: i32, %arg1: memref<32x256xf32, #tpu.memory_space<vmem>>, %arg2: memref<1x256xf32, #tpu.memory_space<vmem>>, %arg3: memref<1x256xf32, #tpu.memory_space<vmem>>, %arg4: memref<32x256xf32, #tpu.memory_space<vmem>>) attributes {dimension_semantics = [#tpu.dimension_semantics<parallel>], iteration_bounds = array<i64: 1>, scalar_prefetch = 0 : i64, scratch_operands = 0 : i64, tpu.core_type = #tpu.core_type<tc>, window_params = [{transform_indices = @transform_0, window_bounds = array<i64: 32, 256>}, {pipeline_mode = #tpu.pipeline_mode<synchronous>, transform_indices = @transform_1, window_bounds = array<i64: 1, 256>}, {pipeline_mode = #tpu.pipeline_mode<synchronous>, transform_indices = @transform_2, window_bounds = array<i64: 1, 256>}, {transform_indices = @transform_3, window_bounds = array<i64: 32, 256>}]} {
    %c0 = arith.constant 0 : index
    %c0_0 = arith.constant 0 : index
    %0 = vector.load %arg1[%c0, %c0_0] : memref<32x256xf32, #tpu.memory_space<vmem>>, vector<32x256xf32>
    %c0_1 = arith.constant 0 : index
    %c0_2 = arith.constant 0 : index
    %1 = vector.load %arg2[%c0_1, %c0_2] : memref<1x256xf32, #tpu.memory_space<vmem>>, vector<1x256xf32>
    %2 = vector.broadcast %1 : vector<1x256xf32> to vector<32x256xf32>
    %3 = arith.mulf %0, %2 : vector<32x256xf32>
    %c0_3 = arith.constant 0 : index
    %c0_4 = arith.constant 0 : index
    %4 = vector.load %arg3[%c0_3, %c0_4] : memref<1x256xf32, #tpu.memory_space<vmem>>, vector<1x256xf32>
    %5 = vector.broadcast %4 : vector<1x256xf32> to vector<32x256xf32>
    %6 = arith.addf %3, %5 : vector<32x256xf32>
    %cst = arith.constant 0.000000e+00 : f32
    %7 = vector.broadcast %cst : f32 to vector<32x256xf32>
    %8 = arith.maximumf %6, %7 : vector<32x256xf32>
    %c0_5 = arith.constant 0 : index
    %c0_6 = arith.constant 0 : index
    %9 = vector.load %arg4[%c0_5, %c0_6] : memref<32x256xf32, #tpu.memory_space<vmem>>, vector<32x256xf32>
    tpu.vector_store %arg4[%c0_5, %c0_6], %8 {strides = array<i32>} : memref<32x256xf32, #tpu.memory_space<vmem>>, vector<32x256xf32>,
    return
  }
  func.func @transform_0(%arg0: i32) -> (i32, i32) {
    %c0_i32 = arith.constant 0 : i32
    %c0_i32_0 = arith.constant 0 : i32
    return %arg0, %c0_i32 : i32, i32
  }
  func.func @transform_1(%arg0: i32) -> (i32, i32) {
    %c0_i32 = arith.constant 0 : i32
    %c0_i32_0 = arith.constant 0 : i32
    %c0_i32_1 = arith.constant 0 : i32
    return %c0_i32, %c0_i32_0 : i32, i32
  }
  func.func @transform_2(%arg0: i32) -> (i32, i32) {
    %c0_i32 = arith.constant 0 : i32
    %c0_i32_0 = arith.constant 0 : i32
    %c0_i32_1 = arith.constant 0 : i32
    return %c0_i32, %c0_i32_0 : i32, i32
  }
  func.func @transform_3(%arg0: i32) -> (i32, i32) {
    %c0_i32 = arith.constant 0 : i32
    %c0_i32_0 = arith.constant 0 : i32
    return %arg0, %c0_i32 : i32, i32
  }
}

module attributes {stable_mosaic.version = 11 : i64} {
  func.func @linear_kernel(%arg0: memref<8x4096xf32, #tpu.memory_space<vmem>>, %arg1: memref<4096x128xf32, #tpu.memory_space<vmem>>, %arg2: memref<1x128xf32, #tpu.memory_space<vmem>>, %arg3: memref<8x128xf32, #tpu.memory_space<vmem>>) attributes {dimension_semantics = [], scalar_prefetch = 0 : i64, scratch_operands = 0 : i64, tpu.core_type = #tpu.core_type<tc>} {
    %c0 = arith.constant 0 : index
    %c0_0 = arith.constant 0 : index
    %0 = vector.load %arg0[%c0, %c0_0] : memref<8x4096xf32, #tpu.memory_space<vmem>>, vector<8x4096xf32>
    %c0_1 = arith.constant 0 : index
    %c0_2 = arith.constant 0 : index
    %1 = vector.load %arg1[%c0_1, %c0_2] : memref<4096x128xf32, #tpu.memory_space<vmem>>, vector<4096x128xf32>
    %cst = arith.constant dense<0.000000e+00> : vector<8x128xf32>
    %2 = tpu.matmul %0, %1, %cst {dimension_numbers = #tpu.dot_dimension_numbers<[1], [0], [0], [1], [0, 0, 1, 1], [], []>} : vector<8x4096xf32>, vector<4096x128xf32>, vector<8x128xf32> -> vector<8x128xf32>
    %c0_3 = arith.constant 0 : index
    %c0_4 = arith.constant 0 : index
    %3 = vector.load %arg2[%c0_3, %c0_4] : memref<1x128xf32, #tpu.memory_space<vmem>>, vector<1x128xf32>
    %4 = vector.broadcast %3 : vector<1x128xf32> to vector<8x128xf32>
    %5 = arith.addf %2, %4 : vector<8x128xf32>
    %c0_5 = arith.constant 0 : index
    %c0_6 = arith.constant 0 : index
    %6 = vector.load %arg3[%c0_5, %c0_6] : memref<8x128xf32, #tpu.memory_space<vmem>>, vector<8x128xf32>
    tpu.vector_store %arg3[%c0_5, %c0_6], %5 {strides = array<i32>} : memref<8x128xf32, #tpu.memory_space<vmem>>, vector<8x128xf32>,
    return
  }
}

</mosaic_0001>

<bundles_post_ra>
// kernel: celebrity_convnet_forward.12
= control target key start
LH: loop header
LB: loop body
LE: loop exit
PB: predicated region body
PF: predicated region fallthrough
CT: control target
= control target key end

     0   :  { %s701_s0 = inlined_call_operand.vmem [shape: f32[392,128], index: 0, kind: input, shape index: {}]   ;;  %s702_s1 = inlined_call_operand.vmem [shape: f32[1,128], index: 1, kind: input, shape index: {}]   ;;  %s703_s2 = inlined_call_operand.vmem [shape: f32[1,128], index: 2, kind: input, shape index: {}]   ;;  %s704_s3 = inlined_call_operand.vmem [shape: f32[392,128], index: 3, kind: output, shape index: {}]  }
   0x1   :  { %v14_v0 = vld [vmem:[%s701_s0] sm:$0xff]  ;;  %v15_v4 = vld [vmem:[%s701_s0 + $0x8] sm:$0xff]  ;;  %v16_v5 = vld [vmem:[%s701_s0 + $0x10] sm:$0xff] }
   0x2   :  { %v305_v1 = vld [vmem:[%s702_s1] ss:$0 sm:$0xff]  ;;  %v17_v6 = vld [vmem:[%s701_s0 + $0x18] sm:$0xff]  ;;  %v19_v11 = vld [vmem:[%s701_s0 + $0x28] sm:$0xff] }
   0x3   :  { %v310_v2 = vld [vmem:[%s703_s2] ss:$0 sm:$0xff]  ;;  %v70_v3 = vmul.f32 %v305_v1, %v14_v0  ;;  %v71_v7 = vmul.f32 %v305_v1, %v15_v4  ;;  %v72_v8 = vmul.f32 %v305_v1, %v16_v5  ;;  %v73_v9 = vmul.f32 %v305_v1, %v17_v6  ;;  %v20_v12 = vld [vmem:[%s701_s0 + $0x30] sm:$0xff]  ;;  %v21_v17 = vld [vmem:[%s701_s0 + $0x38] sm:$0xff] }
   0x4   :  { %v18_v10 = vld [vmem:[%s701_s0 + $0x20] sm:$0xff]  ;;  %v75_v15 = vmul.f32 %v305_v1, %v19_v11  ;;  %v76_v16 = vmul.f32 %v305_v1, %v20_v12  ;;  %v77_v21 = vmul.f32 %v305_v1, %v21_v17  ;;  %v23_v27 = vld [vmem:[%s701_s0 + $0x48] sm:$0xff]  ;;  %v24_v28 = vld [vmem:[%s701_s0 + $0x50] sm:$0xff] }
   0x5   :  { %v126_v13 = vadd.f32 %v310_v2, %v70_v3  ;;  %v74_v14 = vmul.f32 %v305_v1, %v18_v10  ;;  %v127_v18 = vadd.f32 %v310_v2, %v71_v7  ;;  %v128_v19 = vadd.f32 %v310_v2, %v72_v8  ;;  %v22_v22 = vld [vmem:[%s701_s0 + $0x40] sm:$0xff]  ;;  %v25_v29 = vld [vmem:[%s701_s0 + $0x58] sm:$0xff]  ;;  %v27_v35 = vld [vmem:[%s701_s0 + $0x68] sm:$0xff] }
   0x6   :  { %v129_v20 = vadd.f32 %v310_v2, %v73_v9  ;;  %v131_v25 = vadd.f32 %v310_v2, %v75_v15  ;;  %v132_v26 = vadd.f32 %v310_v2, %v76_v16  ;;  %v133_v33 = vadd.f32 %v310_v2, %v77_v21  ;;  %v26_v34 = vld [vmem:[%s701_s0 + $0x60] sm:$0xff]  ;;  %v28_v36 = vld [vmem:[%s701_s0 + $0x70] sm:$0xff]  ;;  %v29_v41 = vld [vmem:[%s701_s0 + $0x78] sm:$0xff] }
   0x7   :  { %v175_v23 = vmax.f32 %v126_v13, 0.0  ;;  %v130_v24 = vadd.f32 %v310_v2, %v74_v14  ;;  %v176_v30 = vmax.f32 %v127_v18, 0.0  ;;  %v177_v31 = vmax.f32 %v128_v19, 0.0  ;;  %v30_v54 = vld [vmem:[%s701_s0 + $0x80] sm:$0xff]  ;;  %v31_v59 = vld [vmem:[%s701_s0 + $0x88] sm:$0xff]  ;;  %v32_v60 = vld [vmem:[%s701_s0 + $0x90] sm:$0xff] }
   0x8   :  { %v178_v32 = vmax.f32 %v129_v20, 0.0  ;;  %v180_v38 = vmax.f32 %v131_v25, 0.0  ;;  %v181_v39 = vmax.f32 %v132_v26, 0.0  ;;  %v78_v40 = vmul.f32 %v305_v1, %v22_v22  ;;  %v33_v61 = vld [vmem:[%s701_s0 + $0x98] sm:$0xff]  ;;  %v34_v4 = vld [vmem:[%s701_s0 + $0xa0] sm:$0xff]  ;;  %v35_v5 = vld [vmem:[%s701_s0 + $0xa8] sm:$0xff] }
   0x9   :  { %224 = vst [vmem:[%s704_s3] sm:$0xff] %v175_v23  ;;  %v179_v37 = vmax.f32 %v130_v24, 0.0  ;;  %225 = vst [vmem:[%s704_s3 + $0x8] sm:$0xff] %v176_v30  ;;  %v182_v42 = vmax.f32 %v133_v33, 0.0  ;;  %v79_v43 = vmul.f32 %v305_v1, %v23_v27  ;;  %v80_v44 = vmul.f32 %v305_v1, %v24_v28  ;;  %v36_v6 = vld [vmem:[%s701_s0 + $0xb0] sm:$0xff]  ;;  %v37_v11 = vld [vmem:[%s701_s0 + $0xb8] sm:$0xff] }
   0xa   :  { %226 = vst [vmem:[%s704_s3 + $0x10] sm:$0xff] %v177_v31  ;;  %227 = vst [vmem:[%s704_s3 + $0x18] sm:$0xff] %v178_v32  ;;  %v81_v45 = vmul.f32 %v305_v1, %v25_v29  ;;  %v134_v46 = vadd.f32 %v310_v2, %v78_v40  ;;  %v82_v47 = vmul.f32 %v305_v1, %v26_v34  ;;  %v38_v24 = vld [vmem:[%s701_s0 + $0xc0] sm:$0xff]  ;;  %v39_v29 = vld [vmem:[%s701_s0 + $0xc8] sm:$0xff] }
   0xb   :  { %228 = vst [vmem:[%s704_s3 + $0x20] sm:$0xff] %v179_v37  ;;  %229 = vst [vmem:[%s704_s3 + $0x28] sm:$0xff] %v180_v38  ;;  %v83_v48 = vmul.f32 %v305_v1, %v27_v35  ;;  %v84_v49 = vmul.f32 %v305_v1, %v28_v36  ;;  %v135_v50 = vadd.f32 %v310_v2, %v79_v43  ;;  %v40_v30 = vld [vmem:[%s701_s0 + $0xd0] sm:$0xff]  ;;  %v41_v31 = vld [vmem:[%s701_s0 + $0xd8] sm:$0xff] }
   0xc   :  { %230 = vst [vmem:[%s704_s3 + $0x30] sm:$0xff] %v181_v39  ;;  %231 = vst [vmem:[%s704_s3 + $0x38] sm:$0xff] %v182_v42  ;;  %v136_v51 = vadd.f32 %v310_v2, %v80_v44  ;;  %v137_v52 = vadd.f32 %v310_v2, %v81_v45  ;;  %v85_v53 = vmul.f32 %v305_v1, %v29_v41  ;;  %v183_v55 = vmax.f32 %v134_v46, 0.0  ;;  %v42_v36 = vld [vmem:[%s701_s0 + $0xe0] sm:$0xff]  ;;  %v43_v37 = vld [vmem:[%s701_s0 + $0xe8] sm:$0xff] }
   0xd   :  { %v138_v56 = vadd.f32 %v310_v2, %v82_v47  ;;  %v139_v57 = vadd.f32 %v310_v2, %v83_v48  ;;  %v140_v58 = vadd.f32 %v310_v2, %v84_v49  ;;  %v184_v62 = vmax.f32 %v135_v50, 0.0  ;;  %v44_v38 = vld [vmem:[%s701_s0 + $0xf0] sm:$0xff]  ;;  %v45_v43 = vld [vmem:[%s701_s0 + $0xf8] sm:$0xff] }
   0xe   :  { %v185_v63 = vmax.f32 %v136_v51, 0.0  ;;  %v186_v0 = vmax.f32 %v137_v52, 0.0  ;;  %v141_v3 = vadd.f32 %v310_v2, %v85_v53  ;;  %232 = vst [vmem:[%s704_s3 + $0x40] sm:$0xff] %v183_v55  ;;  %v86_v10 = vmul.f32 %v305_v1, %v30_v54 }
   0xf   :  { %v187_v7 = vmax.f32 %v138_v56, 0.0  ;;  %v188_v8 = vmax.f32 %v139_v57, 0.0  ;;  %v189_v9 = vmax.f32 %v140_v58, 0.0  ;;  %233 = vst [vmem:[%s704_s3 + $0x48] sm:$0xff] %v184_v62  ;;  %v87_v13 = vmul.f32 %v305_v1, %v31_v59  ;;  %v46_v56 = vld [vmem:[%s701_s0 + $0x100] sm:$0xff]  ;;  %v48_v62 = vld [vmem:[%s701_s0 + $0x110] sm:$0xff] }
  0x10   :  { %234 = vst [vmem:[%s704_s3 + $0x50] sm:$0xff] %v185_v63  ;;  %235 = vst [vmem:[%s704_s3 + $0x58] sm:$0xff] %v186_v0  ;;  %v190_v12 = vmax.f32 %v141_v3, 0.0  ;;  %v88_v14 = vmul.f32 %v305_v1, %v32_v60  ;;  %v89_v15 = vmul.f32 %v305_v1, %v33_v61  ;;  %v142_v16 = vadd.f32 %v310_v2, %v86_v10  ;;  %v47_v61 = vld [vmem:[%s701_s0 + $0x108] sm:$0xff]  ;;  %v49_v63 = vld [vmem:[%s701_s0 + $0x118] sm:$0xff] }
  0x11   :  { %236 = vst [vmem:[%s704_s3 + $0x60] sm:$0xff] %v187_v7  ;;  %237 = vst [vmem:[%s704_s3 + $0x68] sm:$0xff] %v188_v8  ;;  %v90_v17 = vmul.f32 %v305_v1, %v34_v4  ;;  %v91_v18 = vmul.f32 %v305_v1, %v35_v5  ;;  %v92_v19 = vmul.f32 %v305_v1, %v36_v6  ;;  %v50_v6 = vld [vmem:[%s701_s0 + $0x120] sm:$0xff]  ;;  %v51_v7 = vld [vmem:[%s701_s0 + $0x128] sm:$0xff] }
  0x12   :  { %238 = vst [vmem:[%s704_s3 + $0x70] sm:$0xff] %v189_v9  ;;  %239 = vst [vmem:[%s704_s3 + $0x78] sm:$0xff] %v190_v12  ;;  %v143_v20 = vadd.f32 %v310_v2, %v87_v13  ;;  %v144_v21 = vadd.f32 %v310_v2, %v88_v14  ;;  %v145_v22 = vadd.f32 %v310_v2, %v89_v15  ;;  %v191_v25 = vmax.f32 %v142_v16, 0.0  ;;  %v52_v8 = vld [vmem:[%s701_s0 + $0x130] sm:$0xff]  ;;  %v53_v13 = vld [vmem:[%s701_s0 + $0x138] sm:$0xff] }
  0x13   :  { %v93_v23 = vmul.f32 %v305_v1, %v37_v11  ;;  %v146_v26 = vadd.f32 %v310_v2, %v90_v17  ;;  %v147_v27 = vadd.f32 %v310_v2, %v91_v18  ;;  %v148_v28 = vadd.f32 %v310_v2, %v92_v19 }
  0x14   :  { %v192_v32 = vmax.f32 %v143_v20, 0.0  ;;  %v193_v33 = vmax.f32 %v144_v21, 0.0  ;;  %v194_v34 = vmax.f32 %v145_v22, 0.0  ;;  %240 = vst [vmem:[%s704_s3 + $0x80] sm:$0xff] %v191_v25  ;;  %v94_v42 = vmul.f32 %v305_v1, %v38_v24 }
  0x15   :  { %v149_v35 = vadd.f32 %v310_v2, %v93_v23  ;;  %v195_v39 = vmax.f32 %v146_v26, 0.0  ;;  %v196_v40 = vmax.f32 %v147_v27, 0.0  ;;  %v197_v41 = vmax.f32 %v148_v28, 0.0  ;;  %v54_v26 = vld [vmem:[%s701_s0 + $0x140] sm:$0xff] }
  0x16   :  { %241 = vst [vmem:[%s704_s3 + $0x88] sm:$0xff] %v192_v32  ;;  %242 = vst [vmem:[%s704_s3 + $0x90] sm:$0xff] %v193_v33  ;;  %v95_v45 = vmul.f32 %v305_v1, %v39_v29  ;;  %v96_v46 = vmul.f32 %v305_v1, %v40_v30  ;;  %v97_v47 = vmul.f32 %v305_v1, %v41_v31  ;;  %v55_v31 = vld [vmem:[%s701_s0 + $0x148] sm:$0xff]  ;;  %v56_v32 = vld [vmem:[%s701_s0 + $0x150] sm:$0xff] }
  0x17   :  { %243 = vst [vmem:[%s704_s3 + $0x98] sm:$0xff] %v194_v34  ;;  %v198_v44 = vmax.f32 %v149_v35, 0.0  ;;  %244 = vst [vmem:[%s704_s3 + $0xa0] sm:$0xff] %v195_v39  ;;  %v150_v48 = vadd.f32 %v310_v2, %v94_v42  ;;  %v98_v49 = vmul.f32 %v305_v1, %v42_v36  ;;  %v99_v50 = vmul.f32 %v305_v1, %v43_v37  ;;  %v57_v33 = vld [vmem:[%s701_s0 + $0x158] sm:$0xff]  ;;  %v59_v39 = vld [vmem:[%s701_s0 + $0x168] sm:$0xff] }
  0x18   :  { %245 = vst [vmem:[%s704_s3 + $0xa8] sm:$0xff] %v196_v40  ;;  %246 = vst [vmem:[%s704_s3 + $0xb0] sm:$0xff] %v197_v41  ;;  %v100_v51 = vmul.f32 %v305_v1, %v44_v38  ;;  %v151_v52 = vadd.f32 %v310_v2, %v95_v45  ;;  %v152_v53 = vadd.f32 %v310_v2, %v96_v46  ;;  %v58_v38 = vld [vmem:[%s701_s0 + $0x160] sm:$0xff]  ;;  %v60_v40 = vld [vmem:[%s701_s0 + $0x170] sm:$0xff] }
  0x19   :  { %247 = vst [vmem:[%s704_s3 + $0xb8] sm:$0xff] %v198_v44  ;;  %v153_v54 = vadd.f32 %v310_v2, %v97_v47  ;;  %v101_v55 = vmul.f32 %v305_v1, %v45_v43  ;;  %v199_v57 = vmax.f32 %v150_v48, 0.0  ;;  %v154_v58 = vadd.f32 %v310_v2, %v98_v49  ;;  %v61_v45 = vld [vmem:[%s701_s0 + $0x178] sm:$0xff] }
  0x1a   :  { %v155_v59 = vadd.f32 %v310_v2, %v99_v50  ;;  %v156_v60 = vadd.f32 %v310_v2, %v100_v51  ;;  %v200_v0 = vmax.f32 %v151_v52, 0.0  ;;  %v201_v3 = vmax.f32 %v152_v53, 0.0 }
  0x1b   :  { %v202_v4 = vmax.f32 %v153_v54, 0.0  ;;  %v157_v5 = vadd.f32 %v310_v2, %v101_v55  ;;  %248 = vst [vmem:[%s704_s3 + $0xc0] sm:$0xff] %v199_v57  ;;  %v203_v9 = vmax.f32 %v154_v58, 0.0  ;;  %v102_v12 = vmul.f32 %v305_v1, %v46_v56  ;;  %v62_v58 = vld [vmem:[%s701_s0 + $0x180] sm:$0xff] }
  0x1c   :  { %v204_v10 = vmax.f32 %v155_v59, 0.0  ;;  %v205_v11 = vmax.f32 %v156_v60, 0.0  ;;  %249 = vst [vmem:[%s704_s3 + $0xc8] sm:$0xff] %v200_v0  ;;  %250 = vst [vmem:[%s704_s3 + $0xd0] sm:$0xff] %v201_v3  ;;  %v103_v15 = vmul.f32 %v305_v1, %v47_v61  ;;  %v104_v16 = vmul.f32 %v305_v1, %v48_v62 }
  0x1d   :  { %251 = vst [vmem:[%s704_s3 + $0xd8] sm:$0xff] %v202_v4  ;;  %v206_v14 = vmax.f32 %v157_v5, 0.0  ;;  %v105_v17 = vmul.f32 %v305_v1, %v49_v63  ;;  %252 = vst [vmem:[%s704_s3 + $0xe0] sm:$0xff] %v203_v9  ;;  %v158_v18 = vadd.f32 %v310_v2, %v102_v12  ;;  %v106_v19 = vmul.f32 %v305_v1, %v50_v6 }
  0x1e   :  { %253 = vst [vmem:[%s704_s3 + $0xe8] sm:$0xff] %v204_v10  ;;  %254 = vst [vmem:[%s704_s3 + $0xf0] sm:$0xff] %v205_v11  ;;  %v107_v20 = vmul.f32 %v305_v1, %v51_v7  ;;  %v108_v21 = vmul.f32 %v305_v1, %v52_v8  ;;  %v159_v22 = vadd.f32 %v310_v2, %v103_v15 }
  0x1f   :  { %255 = vst [vmem:[%s704_s3 + $0xf8] sm:$0xff] %v206_v14  ;;  %v160_v23 = vadd.f32 %v310_v2, %v104_v16  ;;  %v161_v24 = vadd.f32 %v310_v2, %v105_v17  ;;  %v109_v25 = vmul.f32 %v305_v1, %v53_v13  ;;  %v207_v27 = vmax.f32 %v158_v18, 0.0 }
  0x20   :  { %v162_v28 = vadd.f32 %v310_v2, %v106_v19  ;;  %v163_v29 = vadd.f32 %v310_v2, %v107_v20  ;;  %v164_v30 = vadd.f32 %v310_v2, %v108_v21  ;;  %v208_v34 = vmax.f32 %v159_v22, 0.0 }
  0x21   :  { %v209_v35 = vmax.f32 %v160_v23, 0.0  ;;  %v210_v36 = vmax.f32 %v161_v24, 0.0  ;;  %v165_v37 = vadd.f32 %v310_v2, %v109_v25  ;;  %256 = vst [vmem:[%s704_s3 + $0x100] sm:$0xff] %v207_v27  ;;  %v110_v44 = vmul.f32 %v305_v1, %v54_v26 }
  0x22   :  { %v211_v41 = vmax.f32 %v162_v28, 0.0  ;;  %v212_v42 = vmax.f32 %v163_v29, 0.0  ;;  %v213_v43 = vmax.f32 %v164_v30, 0.0  ;;  %257 = vst [vmem:[%s704_s3 + $0x108] sm:$0xff] %v208_v34  ;;  %v111_v47 = vmul.f32 %v305_v1, %v55_v31 }
  0x23   :  { %258 = vst [vmem:[%s704_s3 + $0x110] sm:$0xff] %v209_v35  ;;  %259 = vst [vmem:[%s704_s3 + $0x118] sm:$0xff] %v210_v36  ;;  %v214_v46 = vmax.f32 %v165_v37, 0.0  ;;  %v112_v48 = vmul.f32 %v305_v1, %v56_v32  ;;  %v113_v49 = vmul.f32 %v305_v1, %v57_v33  ;;  %v166_v50 = vadd.f32 %v310_v2, %v110_v44 }
  0x24   :  { %260 = vst [vmem:[%s704_s3 + $0x120] sm:$0xff] %v211_v41  ;;  %261 = vst [vmem:[%s704_s3 + $0x128] sm:$0xff] %v212_v42  ;;  %v114_v51 = vmul.f32 %v305_v1, %v58_v38  ;;  %v115_v52 = vmul.f32 %v305_v1, %v59_v39  ;;  %v116_v53 = vmul.f32 %v305_v1, %v60_v40 }
  0x25   :  { %262 = vst [vmem:[%s704_s3 + $0x130] sm:$0xff] %v213_v43  ;;  %263 = vst [vmem:[%s704_s3 + $0x138] sm:$0xff] %v214_v46  ;;  %v167_v54 = vadd.f32 %v310_v2, %v111_v47  ;;  %v168_v55 = vadd.f32 %v310_v2, %v112_v48  ;;  %v169_v56 = vadd.f32 %v310_v2, %v113_v49  ;;  %v215_v59 = vmax.f32 %v166_v50, 0.0 }
  0x26   :  { %v117_v57 = vmul.f32 %v305_v1, %v61_v45  ;;  %v170_v60 = vadd.f32 %v310_v2, %v114_v51  ;;  %v171_v61 = vadd.f32 %v310_v2, %v115_v52  ;;  %v172_v62 = vadd.f32 %v310_v2, %v116_v53 }
  0x27   :  { %v216_v63 = vmax.f32 %v167_v54, 0.0  ;;  %v217_v0 = vmax.f32 %v168_v55, 0.0  ;;  %v218_v3 = vmax.f32 %v169_v56, 0.0  ;;  %264 = vst [vmem:[%s704_s3 + $0x140] sm:$0xff] %v215_v59  ;;  %v118_v8 = vmul.f32 %v305_v1, %v62_v58 }
  0x28   :  { %v173_v4 = vadd.f32 %v310_v2, %v117_v57  ;;  %v219_v5 = vmax.f32 %v170_v60, 0.0  ;;  %v220_v6 = vmax.f32 %v171_v61, 0.0  ;;  %v221_v7 = vmax.f32 %v172_v62, 0.0 }
  0x29   :  { %265 = vst [vmem:[%s704_s3 + $0x148] sm:$0xff] %v216_v63  ;;  %266 = vst [vmem:[%s704_s3 + $0x150] sm:$0xff] %v217_v0  ;;  %v174_v1 = vadd.f32 %v310_v2, %v118_v8 }
  0x2a   :  { %267 = vst [vmem:[%s704_s3 + $0x158] sm:$0xff] %v218_v3  ;;  %v222_v9 = vmax.f32 %v173_v4, 0.0  ;;  %268 = vst [vmem:[%s704_s3 + $0x160] sm:$0xff] %v219_v5 }
  0x2b   :  { %269 = vst [vmem:[%s704_s3 + $0x168] sm:$0xff] %v220_v6  ;;  %270 = vst [vmem:[%s704_s3 + $0x170] sm:$0xff] %v221_v7  ;;  %v223_v10 = vmax.f32 %v174_v1, 0.0 }
  0x2c   :  { %271 = vst [vmem:[%s704_s3 + $0x178] sm:$0xff] %v222_v9 }
  0x2d   :  { %272 = vst [vmem:[%s704_s3 + $0x180] sm:$0xff] %v223_v10 }

// kernel: celebrity_convnet_forward.11
= control target key start
LH: loop header
LB: loop body
LE: loop exit
PB: predicated region body
PF: predicated region fallthrough
CT: control target
= control target key end

     0   :  { %v1089_v0 = vmov 0   ;;  %vm886_vm0 = vcmask 1040384   ;;  %vm888_vm1 = vcmask 1041408   ;;  %s1684_s1 = inlined_call_operand.vmem [shape: bf16[256,128], index: 1, kind: input, shape index: {}]   ;;  %s1685_s0 = inlined_call_operand.vmem [shape: bf16[392,256], index: 0, kind: input, shape index: {}]   ;;  %s1686_s2 = inlined_call_operand.vmem [shape: f32[1,128], index: 2, kind: input, shape index: {}]   ;;  %s1687_s3 = inlined_call_operand.vmem [shape: f32[392,128], index: 3, kind: output, shape index: {0}]   ;;  %s1688_s4 = inlined_call_operand.vmem [shape: f32[1,8,128], index: 4, kind: output, shape index: {1}]  }
   0x1   :  { %448 = vmatprep.subr.bf16.mxu0 %v1089_v0  ;;  %v999_v1 = vld [vmem:[%s1684_s1] sm:$0xff]   ;;  %966 = vmatprep.subr.bf16.mxu1 %v1089_v0  ;;  %v1000_v2 = vld [vmem:[%s1684_s1 + $0x8] sm:$0xff]   ;;  %v1001_v3 = vld [vmem:[%s1684_s1 + $0x10] sm:$0xff]  }
   0x2   :  { %449 = vmatpush1.bf16.msra.mxu0 %v999_v1  ;;  %982 = vmatpush1.bf16.msra.mxu1 %v999_v1  ;;  %v1002_v4 = vld [vmem:[%s1684_s1 + $0x18] sm:$0xff]   ;;  %v1003_v5 = vld [vmem:[%s1684_s1 + $0x20] sm:$0xff]   ;;  %v1004_v7 = vld [vmem:[%s1684_s1 + $0x28] sm:$0xff]  }
   0x3   :  { %450 = vmatprep.subr.bf16.mxu0 %v1089_v0  ;;  %967 = vmatprep.subr.bf16.mxu1 %v1089_v0  ;;  %v1017_v6 = vld [vmem:[%s1685_s0 + $0x4] ss:$8 sps:$4 sm:$0xff]   ;;  %v1005_v8 = vld [vmem:[%s1684_s1 + $0x30] sm:$0xff]   ;;  %v1006_v9 = vld [vmem:[%s1684_s1 + $0x38] sm:$0xff]  }
   0x4   :  { %480 = vmatprep.mubr.bf16.mxu0 %v1017_v6  ;;  %v1038_v10 = vld [vmem:[%s1685_s0 + $0xd4] ss:$8 sps:$4 sm:$0xff]   ;;  %v1007_v11 = vld [vmem:[%s1684_s1 + $0x40] sm:$0xff]   ;;  %v1008_v12 = vld [vmem:[%s1684_s1 + $0x48] sm:$0xff]  }
   0x5   :  { %584 = vmatprep.mubr.bf16.mxu1 %v1038_v10  ;;  %v1009_v13 = vld [vmem:[%s1684_s1 + $0x50] sm:$0xff]   ;;  %v1010_v14 = vld [vmem:[%s1684_s1 + $0x58] sm:$0xff]   ;;  %v1011_v15 = vld [vmem:[%s1684_s1 + $0x60] sm:$0xff]  }
   0x6   :  { %451 = vmatpush1.bf16.msra.mxu0 %v1000_v2  ;;  %983 = vmatpush1.bf16.msra.mxu1 %v1000_v2  ;;  %v1012_v16 = vld [vmem:[%s1684_s1 + $0x68] sm:$0xff]   ;;  %v1013_v17 = vld [vmem:[%s1684_s1 + $0x70] sm:$0xff]   ;;  %v1014_v18 = vld [vmem:[%s1684_s1 + $0x78] sm:$0xff]  }
   0x7   :  { %452 = vmatprep.subr.bf16.mxu0 %v1089_v0  ;;  %968 = vmatprep.subr.bf16.mxu1 %v1089_v0  ;;  %v1015_v19 = vld [vmem:[%s1685_s0] ss:$8 sps:$4 sm:$0xff]   ;;  %v1036_v20 = vld [vmem:[%s1685_s0 + $0xd0] ss:$8 sps:$4 sm:$0xff]   ;;  %v1018_v21 = vld [vmem:[%s1685_s0 + $0x14] ss:$8 sps:$4 sm:$0xff]  }
   0x8   :  { %v1042_v22 = vld [vmem:[%s1685_s0 + $0xe4] ss:$8 sps:$4 sm:$0xff]   ;;  %v1020_v23 = vld [vmem:[%s1685_s0 + $0x10] ss:$8 sps:$4 sm:$0xff]   ;;  %v1044_v24 = vld [vmem:[%s1685_s0 + $0xe0] ss:$8 sps:$4 sm:$0xff]  }
   0x9   :  { %v1021_v25 = vld [vmem:[%s1685_s0 + $0x24] ss:$8 sps:$4 sm:$0xff]   ;;  %v1048_v26 = vld [vmem:[%s1685_s0 + $0xf4] ss:$8 sps:$4 sm:$0xff]   ;;  %v1023_v27 = vld [vmem:[%s1685_s0 + $0x20] ss:$8 sps:$4 sm:$0xff]  }
   0xa   :  { %453 = vmatpush1.bf16.msra.mxu0 %v1001_v3  ;;  %984 = vmatpush1.bf16.msra.mxu1 %v1001_v3  ;;  %v1050_v28 = vld [vmem:[%s1685_s0 + $0xf0] ss:$8 sps:$4 sm:$0xff]   ;;  %v1024_v29 = vld [vmem:[%s1685_s0 + $0x34] ss:$8 sps:$4 sm:$0xff]   ;;  %v1054_v30 = vld [vmem:[%s1685_s0 + $0x104] ss:$8 sps:$4 sm:$0xff]  }
   0xb   :  { %454 = vmatprep.subr.bf16.mxu0 %v1089_v0  ;;  %969 = vmatprep.subr.bf16.mxu1 %v1089_v0  ;;  %v1026_v31 = vld [vmem:[%s1685_s0 + $0x30] ss:$8 sps:$4 sm:$0xff]   ;;  %v1056_v32 = vld [vmem:[%s1685_s0 + $0x100] ss:$8 sps:$4 sm:$0xff]   ;;  %v1027_v33 = vld [vmem:[%s1685_s0 + $0x44] ss:$8 sps:$4 sm:$0xff]  }
   0xc   :  { %v1060_v34 = vld [vmem:[%s1685_s0 + $0x114] ss:$8 sps:$4 sm:$0xff]   ;;  %v1029_v35 = vld [vmem:[%s1685_s0 + $0x40] ss:$8 sps:$4 sm:$0xff]   ;;  %v1062_v36 = vld [vmem:[%s1685_s0 + $0x110] ss:$8 sps:$4 sm:$0xff]  }
   0xd   :  { %v1030_v37 = vld [vmem:[%s1685_s0 + $0x54] ss:$8 sps:$4 sm:$0xff]   ;;  %v1066_v38 = vld [vmem:[%s1685_s0 + $0x124] ss:$8 sps:$4 sm:$0xff]   ;;  %v1032_v39 = vld [vmem:[%s1685_s0 + $0x50] ss:$8 sps:$4 sm:$0xff]  }
   0xe   :  { %455 = vmatpush1.bf16.msra.mxu0 %v1002_v4  ;;  %985 = vmatpush1.bf16.msra.mxu1 %v1002_v4  ;;  %v1068_v40 = vld [vmem:[%s1685_s0 + $0x120] ss:$8 sps:$4 sm:$0xff]   ;;  %v1033_v41 = vld [vmem:[%s1685_s0 + $0x64] ss:$8 sps:$4 sm:$0xff]   ;;  %v1072_v42 = vld [vmem:[%s1685_s0 + $0x134] ss:$8 sps:$4 sm:$0xff]  }
   0xf   :  { %456 = vmatprep.subr.bf16.mxu0 %v1089_v0  ;;  %970 = vmatprep.subr.bf16.mxu1 %v1089_v0  ;;  %v1035_v43 = vld [vmem:[%s1685_s0 + $0x60] ss:$8 sps:$4 sm:$0xff]   ;;  %v1074_v44 = vld [vmem:[%s1685_s0 + $0x130] ss:$8 sps:$4 sm:$0xff]   ;;  %v1039_v45 = vld [vmem:[%s1685_s0 + $0x74] ss:$8 sps:$4 sm:$0xff]  }
  0x10   :  { %v1075_v46 = vld [vmem:[%s1685_s0 + $0x144] ss:$8 sps:$4 sm:$0xff]   ;;  %v1041_v47 = vld [vmem:[%s1685_s0 + $0x70] ss:$8 sps:$4 sm:$0xff]   ;;  %v1077_v48 = vld [vmem:[%s1685_s0 + $0x140] ss:$8 sps:$4 sm:$0xff]  }
  0x11   :  { %v1045_v49 = vld [vmem:[%s1685_s0 + $0x84] ss:$8 sps:$4 sm:$0xff]   ;;  %v1078_v50 = vld [vmem:[%s1685_s0 + $0x154] ss:$8 sps:$4 sm:$0xff]   ;;  %v1047_v51 = vld [vmem:[%s1685_s0 + $0x80] ss:$8 sps:$4 sm:$0xff]  }
  0x12   :  { %457 = vmatpush1.bf16.msra.mxu0 %v1003_v5  ;;  %986 = vmatpush1.bf16.msra.mxu1 %v1003_v5  ;;  %v1080_v52 = vld [vmem:[%s1685_s0 + $0x150] ss:$8 sps:$4 sm:$0xff]   ;;  %v1051_v53 = vld [vmem:[%s1685_s0 + $0x94] ss:$8 sps:$4 sm:$0xff]   ;;  %v1081_v54 = vld [vmem:[%s1685_s0 + $0x164] ss:$8 sps:$4 sm:$0xff]  }
  0x13   :  { %458 = vmatprep.subr.bf16.mxu0 %v1089_v0  ;;  %971 = vmatprep.subr.bf16.mxu1 %v1089_v0  ;;  %v1053_v55 = vld [vmem:[%s1685_s0 + $0x90] ss:$8 sps:$4 sm:$0xff]   ;;  %v1083_v56 = vld [vmem:[%s1685_s0 + $0x160] ss:$8 sps:$4 sm:$0xff]   ;;  %v1057_v57 = vld [vmem:[%s1685_s0 + $0xa4] ss:$8 sps:$4 sm:$0xff]  }
  0x14   :  { %v1084_v58 = vld [vmem:[%s1685_s0 + $0x174] ss:$8 sps:$4 sm:$0xff]   ;;  %v65_v59 = vld [vmem:[%s1685_s0 + $0x180] sm:$0xff]  ;;  %v1086_v61 = vld [vmem:[%s1685_s0 + $0x170] ss:$8 sps:$4 sm:$0xff]  }
  0x15   :  { %v1059_v60 = vld [vmem:[%s1685_s0 + $0xa0] ss:$8 sps:$4 sm:$0xff]   ;;  %v1063_v62 = vld [vmem:[%s1685_s0 + $0xb4] ss:$8 sps:$4 sm:$0xff]   ;;  %v949_v63 = vcombine.high %v65_v59, %v65_v59  ;;  %v948_v1 = vcombine.low %v65_v59, %v65_v59  ;;  %v1069_v2 = vld [vmem:[%s1685_s0 + $0xc4] ss:$8 sps:$4 sm:$0xff]  }
  0x16   :  { %459 = vmatpush1.bf16.msra.mxu0 %v1004_v7  ;;  %987 = vmatpush1.bf16.msra.mxu1 %v1004_v7  ;;  %v1071_v3 = vld [vmem:[%s1685_s0 + $0xc0] ss:$8 sps:$4 sm:$0xff]  }
  0x17   :  { %460 = vmatprep.subr.bf16.mxu0 %v1089_v0  ;;  %972 = vmatprep.subr.bf16.mxu1 %v1089_v0  ;;  %v1345_v4 = vld [vmem:[%s1686_s2] ss:$0 sm:$0xff] }
  0x1a   :  { %461 = vmatpush1.bf16.msra.mxu0 %v1005_v8  ;;  %988 = vmatpush1.bf16.msra.mxu1 %v1005_v8 }
  0x1b   :  { %462 = vmatprep.subr.bf16.mxu0 %v1089_v0  ;;  %973 = vmatprep.subr.bf16.mxu1 %v1089_v0 }
  0x1e   :  { %463 = vmatpush1.bf16.msra.mxu0 %v1006_v9  ;;  %989 = vmatpush1.bf16.msra.mxu1 %v1006_v9 }
  0x1f   :  { %464 = vmatprep.subr.bf16.mxu0 %v1089_v0  ;;  %974 = vmatprep.subr.bf16.mxu1 %v1089_v0 }
  0x22   :  { %465 = vmatpush1.bf16.msra.mxu0 %v1007_v11  ;;  %990 = vmatpush1.bf16.msra.mxu1 %v1007_v11 }
  0x23   :  { %466 = vmatprep.subr.bf16.mxu0 %v1089_v0  ;;  %975 = vmatprep.subr.bf16.mxu1 %v1089_v0 }
  0x26   :  { %467 = vmatpush1.bf16.msra.mxu0 %v1008_v12  ;;  %991 = vmatpush1.bf16.msra.mxu1 %v1008_v12 }
  0x27   :  { %468 = vmatprep.subr.bf16.mxu0 %v1089_v0  ;;  %976 = vmatprep.subr.bf16.mxu1 %v1089_v0 }
  0x2a   :  { %469 = vmatpush1.bf16.msra.mxu0 %v1009_v13  ;;  %992 = vmatpush1.bf16.msra.mxu1 %v1009_v13 }
  0x2b   :  { %470 = vmatprep.subr.bf16.mxu0 %v1089_v0  ;;  %977 = vmatprep.subr.bf16.mxu1 %v1089_v0 }
  0x2e   :  { %471 = vmatpush1.bf16.msra.mxu0 %v1010_v14  ;;  %993 = vmatpush1.bf16.msra.mxu1 %v1010_v14 }
  0x2f   :  { %472 = vmatprep.subr.bf16.mxu0 %v1089_v0  ;;  %978 = vmatprep.subr.bf16.mxu1 %v1089_v0 }
  0x32   :  { %473 = vmatpush1.bf16.msra.mxu0 %v1011_v15  ;;  %994 = vmatpush1.bf16.msra.mxu1 %v1011_v15 }
  0x33   :  { %474 = vmatprep.subr.bf16.mxu0 %v1089_v0  ;;  %979 = vmatprep.subr.bf16.mxu1 %v1089_v0 }
  0x36   :  { %475 = vmatpush1.bf16.msra.mxu0 %v1012_v16  ;;  %995 = vmatpush1.bf16.msra.mxu1 %v1012_v16 }
  0x37   :  { %476 = vmatprep.subr.bf16.mxu0 %v1089_v0  ;;  %980 = vmatprep.subr.bf16.mxu1 %v1089_v0 }
  0x3a   :  { %477 = vmatpush1.bf16.msra.mxu0 %v1013_v17  ;;  %996 = vmatpush1.bf16.msra.mxu1 %v1013_v17 }
  0x3b   :  { %478 = vmatprep.subr.bf16.mxu0 %v1089_v0  ;;  %981 = vmatprep.subr.bf16.mxu1 %v1089_v0  ;;  %v1065_v0 = vld [vmem:[%s1685_s0 + $0xb0] ss:$8 sps:$4 sm:$0xff]  }
  0x3e   :  { %479 = vmatpush1.bf16.msra.mxu0 %v1014_v18  ;;  %997 = vmatpush1.bf16.msra.mxu1 %v1014_v18 }
  0x41   :  { %481 = vmatmul.mubr.bf16.vlgmr.msra.gmra.mrb[0].mxu0 %v1015_v19  ;;  %585 = vmatmul.mubr.bf16.vlgmr.msra.gmra.mrb[0].mxu1 %v1036_v20 }
  0x42   :  { %488 = vmatprep.mubr.bf16.mxu0 %v1018_v21  ;;  %592 = vmatprep.mubr.bf16.mxu1 %v1042_v22 }
  0x49   :  { %489 = vmatmul.mubr.bf16.gmra.mrb[4].mxu0 %v1020_v23  ;;  %593 = vmatmul.mubr.bf16.gmra.mrb[4].mxu1 %v1044_v24 }
  0x4a   :  { %496 = vmatprep.mubr.bf16.mxu0 %v1021_v25  ;;  %600 = vmatprep.mubr.bf16.mxu1 %v1048_v26 }
  0x51   :  { %497 = vmatmul.mubr.bf16.gmra.mrb[8].mxu0 %v1023_v27  ;;  %601 = vmatmul.mubr.bf16.gmra.mrb[8].mxu1 %v1050_v28 }
  0x52   :  { %504 = vmatprep.mubr.bf16.mxu0 %v1024_v29  ;;  %608 = vmatprep.mubr.bf16.mxu1 %v1054_v30 }
  0x59   :  { %505 = vmatmul.mubr.bf16.gmra.mrb[12].mxu0 %v1026_v31  ;;  %609 = vmatmul.mubr.bf16.gmra.mrb[12].mxu1 %v1056_v32 }
  0x5a   :  { %512 = vmatprep.mubr.bf16.mxu0 %v1027_v33  ;;  %616 = vmatprep.mubr.bf16.mxu1 %v1060_v34 }
  0x61   :  { %513 = vmatmul.mubr.bf16.gmra.mrb[16].mxu0 %v1029_v35  ;;  %617 = vmatmul.mubr.bf16.gmra.mrb[16].mxu1 %v1062_v36 }
  0x62   :  { %520 = vmatprep.mubr.bf16.mxu0 %v1030_v37  ;;  %624 = vmatprep.mubr.bf16.mxu1 %v1066_v38 }
  0x69   :  { %521 = vmatmul.mubr.bf16.gmra.mrb[20].mxu0 %v1032_v39  ;;  %625 = vmatmul.mubr.bf16.gmra.mrb[20].mxu1 %v1068_v40 }
  0x6a   :  { %528 = vmatprep.mubr.bf16.mxu0 %v1033_v41  ;;  %632 = vmatprep.mubr.bf16.mxu1 %v1072_v42 }
  0x71   :  { %529 = vmatmul.mubr.bf16.gmra.mrb[24].mxu0 %v1035_v43  ;;  %633 = vmatmul.mubr.bf16.gmra.mrb[24].mxu1 %v1074_v44 }
  0x72   :  { %536 = vmatprep.mubr.bf16.mxu0 %v1039_v45  ;;  %640 = vmatprep.mubr.bf16.mxu1 %v1075_v46 }
  0x79   :  { %537 = vmatmul.mubr.bf16.gmra.mrb[28].mxu0 %v1041_v47  ;;  %641 = vmatmul.mubr.bf16.gmra.mrb[28].mxu1 %v1077_v48 }
  0x7a   :  { %544 = vmatprep.mubr.bf16.mxu0 %v1045_v49  ;;  %648 = vmatprep.mubr.bf16.mxu1 %v1078_v50 }
  0x81   :  { %545 = vmatmul.mubr.bf16.gmra.mrb[32].mxu0 %v1047_v51  ;;  %649 = vmatmul.mubr.bf16.gmra.mrb[32].mxu1 %v1080_v52 }
  0x82   :  { %552 = vmatprep.mubr.bf16.mxu0 %v1051_v53  ;;  %656 = vmatprep.mubr.bf16.mxu1 %v1081_v54 }
  0x89   :  { %553 = vmatmul.mubr.bf16.gmra.mrb[36].mxu0 %v1053_v55  ;;  %657 = vmatmul.mubr.bf16.gmra.mrb[36].mxu1 %v1083_v56 }
  0x8a   :  { %560 = vmatprep.mubr.bf16.mxu0 %v1057_v57  ;;  %664 = vmatprep.mubr.bf16.mxu1 %v1084_v58 }
  0x91   :  { %561 = vmatmul.mubr.bf16.gmra.mrb[40].mxu0 %v1059_v60  ;;  %665 = vmatmul.mubr.bf16.gmra.mrb[40].mxu1 %v1086_v61 }
  0x92   :  { %568 = vmatprep.mubr.bf16.mxu0 %v1063_v62  ;;  %672 = vmatprep.mubr.bf16.mxu1 %v949_v63 }
  0x99   :  { %569 = vmatmul.mubr.bf16.gmra.mrb[44].mxu0 %v1065_v0  ;;  %673 = vmatmul.mubr.bf16.gmra.mrb[44].mxu1 %v948_v1 }
  0x9a   :  { %576 = vmatprep.mubr.bf16.mxu0 %v1069_v2 }
  0xa1   :  { %577 = vmatmul.mubr.bf16.gmra.mrb[48].mxu0 %v1071_v3 }
 0x114   :  { %v482_v5 = vpop.f32.mrb[0].mxu0  ;;  %v586_v6 = vpop.f32.mrb[0].mxu1 }
 0x115   :  { %v483_v7 = vadd.f32 %v1345_v4, %v482_v5  ;;  %v484_v8 = vpop.f32.mrb[1].mxu0  ;;  %v1349_v9 = vadd.f32 %v1345_v4, %v586_v6  ;;  %v588_v10 = vpop.f32.mrb[1].mxu1 }
 0x116   :  { %v485_v11 = vpop.f32.mrb[2].mxu0  ;;  %v589_v12 = vpop.f32.mrb[2].mxu1 }
 0x117   :  { %680 = vst [vmem:[%s1687_s3] sm:$0xff] %v483_v7  ;;  %v486_v13 = vadd.f32 %v1345_v4, %v485_v11  ;;  %v487_v14 = vpop.f32.mrb[3].mxu0  ;;  %706 = vst [vmem:[%s1687_s3 + $0xd0] sm:$0xff] %v1349_v9  ;;  %v1360_v15 = vadd.f32 %v1345_v4, %v589_v12  ;;  %v591_v16 = vpop.f32.mrb[3].mxu1  ;;  %v783_v17 = vmul.f32 %v483_v7, %v483_v7 }
 0x119   :  { %681 = vst [vmem:[%s1687_s3 + $0x8] sm:$0xff] %v486_v13  ;;  %v729_v18 = vadd.f32 %v486_v13, %v483_v7  ;;  %v784_v19 = vmul.f32 %v486_v13, %v486_v13  ;;  %707 = vst [vmem:[%s1687_s3 + $0xd8] sm:$0xff] %v1360_v15 }
 0x11b   :  { %v832_v20 = vadd.f32 %v784_v19, %v783_v17 }
 0x11c   :  { %v490_v21 = vpop.f32.mrb[4].mxu0  ;;  %v594_v22 = vpop.f32.mrb[4].mxu1 }
 0x11d   :  { %v491_v23 = vadd.f32 %v1345_v4, %v490_v21  ;;  %v492_v24 = vpop.f32.mrb[5].mxu0  ;;  %v1371_v25 = vadd.f32 %v1345_v4, %v594_v22  ;;  %v596_v26 = vpop.f32.mrb[5].mxu1 }
 0x11e   :  { %v493_v27 = vpop.f32.mrb[6].mxu0  ;;  %v597_v28 = vpop.f32.mrb[6].mxu1 }
 0x11f   :  { %682 = vst [vmem:[%s1687_s3 + $0x10] sm:$0xff] %v491_v23  ;;  %v730_v29 = vadd.f32 %v729_v18, %v491_v23  ;;  %v785_v30 = vmul.f32 %v491_v23, %v491_v23  ;;  %v494_v31 = vadd.f32 %v1345_v4, %v493_v27  ;;  %v495_v32 = vpop.f32.mrb[7].mxu0  ;;  %708 = vst [vmem:[%s1687_s3 + $0xe0] sm:$0xff] %v1371_v25  ;;  %v599_v33 = vpop.f32.mrb[7].mxu1 }
 0x120   :  { %v1382_v34 = vadd.f32 %v1345_v4, %v597_v28 }
 0x121   :  { %v833_v35 = vadd.f32 %v832_v20, %v785_v30  ;;  %683 = vst [vmem:[%s1687_s3 + $0x18] sm:$0xff] %v494_v31  ;;  %v731_v36 = vadd.f32 %v730_v29, %v494_v31  ;;  %v786_v37 = vmul.f32 %v494_v31, %v494_v31 }
 0x122   :  { %709 = vst [vmem:[%s1687_s3 + $0xe8] sm:$0xff] %v1382_v34 }
 0x123   :  { %v834_v38 = vadd.f32 %v833_v35, %v786_v37 }
 0x124   :  { %v498_v39 = vpop.f32.mrb[8].mxu0  ;;  %v602_v40 = vpop.f32.mrb[8].mxu1 }
 0x125   :  { %v499_v41 = vadd.f32 %v1345_v4, %v498_v39  ;;  %v500_v42 = vpop.f32.mrb[9].mxu0  ;;  %v1393_v43 = vadd.f32 %v1345_v4, %v602_v40  ;;  %v604_v44 = vpop.f32.mrb[9].mxu1 }
 0x126   :  { %v501_v45 = vpop.f32.mrb[10].mxu0  ;;  %v605_v46 = vpop.f32.mrb[10].mxu1 }
 0x127   :  { %684 = vst [vmem:[%s1687_s3 + $0x20] sm:$0xff] %v499_v41  ;;  %v732_v47 = vadd.f32 %v731_v36, %v499_v41  ;;  %v787_v48 = vmul.f32 %v499_v41, %v499_v41  ;;  %v502_v49 = vadd.f32 %v1345_v4, %v501_v45  ;;  %v503_v50 = vpop.f32.mrb[11].mxu0  ;;  %710 = vst [vmem:[%s1687_s3 + $0xf0] sm:$0xff] %v1393_v43  ;;  %v607_v51 = vpop.f32.mrb[11].mxu1 }
 0x128   :  { %v1404_v52 = vadd.f32 %v1345_v4, %v605_v46 }
 0x129   :  { %v835_v53 = vadd.f32 %v834_v38, %v787_v48  ;;  %685 = vst [vmem:[%s1687_s3 + $0x28] sm:$0xff] %v502_v49  ;;  %v733_v54 = vadd.f32 %v732_v47, %v502_v49  ;;  %v788_v55 = vmul.f32 %v502_v49, %v502_v49 }
 0x12a   :  { %711 = vst [vmem:[%s1687_s3 + $0xf8] sm:$0xff] %v1404_v52 }
 0x12b   :  { %v836_v56 = vadd.f32 %v835_v53, %v788_v55 }
 0x12c   :  { %v506_v57 = vpop.f32.mrb[12].mxu0  ;;  %v610_v58 = vpop.f32.mrb[12].mxu1 }
 0x12d   :  { %v507_v59 = vadd.f32 %v1345_v4, %v506_v57  ;;  %v508_v60 = vpop.f32.mrb[13].mxu0  ;;  %v1415_v61 = vadd.f32 %v1345_v4, %v610_v58  ;;  %v612_v62 = vpop.f32.mrb[13].mxu1 }
 0x12e   :  { %v509_v63 = vpop.f32.mrb[14].mxu0  ;;  %v613_v0 = vpop.f32.mrb[14].mxu1 }
 0x12f   :  { %686 = vst [vmem:[%s1687_s3 + $0x30] sm:$0xff] %v507_v59  ;;  %v734_v1 = vadd.f32 %v733_v54, %v507_v59  ;;  %v789_v2 = vmul.f32 %v507_v59, %v507_v59  ;;  %v510_v3 = vadd.f32 %v1345_v4, %v509_v63  ;;  %v511_v5 = vpop.f32.mrb[15].mxu0  ;;  %712 = vst [vmem:[%s1687_s3 + $0x100] sm:$0xff] %v1415_v61  ;;  %v615_v6 = vpop.f32.mrb[15].mxu1 }
 0x130   :  { %v1426_v7 = vadd.f32 %v1345_v4, %v613_v0 }
 0x131   :  { %v837_v8 = vadd.f32 %v836_v56, %v789_v2  ;;  %687 = vst [vmem:[%s1687_s3 + $0x38] sm:$0xff] %v510_v3  ;;  %v735_v10 = vadd.f32 %v734_v1, %v510_v3  ;;  %v790_v11 = vmul.f32 %v510_v3, %v510_v3 }
 0x132   :  { %713 = vst [vmem:[%s1687_s3 + $0x108] sm:$0xff] %v1426_v7 }
 0x133   :  { %v838_v12 = vadd.f32 %v837_v8, %v790_v11 }
 0x134   :  { %v514_v13 = vpop.f32.mrb[16].mxu0  ;;  %v618_v14 = vpop.f32.mrb[16].mxu1 }
 0x135   :  { %v515_v16 = vadd.f32 %v1345_v4, %v514_v13  ;;  %v516_v17 = vpop.f32.mrb[17].mxu0  ;;  %v1437_v18 = vadd.f32 %v1345_v4, %v618_v14  ;;  %v620_v19 = vpop.f32.mrb[17].mxu1 }
 0x136   :  { %v517_v20 = vpop.f32.mrb[18].mxu0  ;;  %v621_v21 = vpop.f32.mrb[18].mxu1 }
 0x137   :  { %688 = vst [vmem:[%s1687_s3 + $0x40] sm:$0xff] %v515_v16  ;;  %v736_v22 = vadd.f32 %v735_v10, %v515_v16  ;;  %v791_v23 = vmul.f32 %v515_v16, %v515_v16  ;;  %v518_v24 = vadd.f32 %v1345_v4, %v517_v20  ;;  %v519_v26 = vpop.f32.mrb[19].mxu0  ;;  %714 = vst [vmem:[%s1687_s3 + $0x110] sm:$0xff] %v1437_v18  ;;  %v623_v27 = vpop.f32.mrb[19].mxu1 }
 0x138   :  { %v1448_v28 = vadd.f32 %v1345_v4, %v621_v21 }
 0x139   :  { %v839_v29 = vadd.f32 %v838_v12, %v791_v23  ;;  %689 = vst [vmem:[%s1687_s3 + $0x48] sm:$0xff] %v518_v24  ;;  %v737_v30 = vadd.f32 %v736_v22, %v518_v24  ;;  %v792_v31 = vmul.f32 %v518_v24, %v518_v24 }
 0x13a   :  { %715 = vst [vmem:[%s1687_s3 + $0x118] sm:$0xff] %v1448_v28 }
 0x13b   :  { %v840_v32 = vadd.f32 %v839_v29, %v792_v31 }
 0x13c   :  { %v522_v33 = vpop.f32.mrb[20].mxu0  ;;  %v626_v35 = vpop.f32.mrb[20].mxu1 }
 0x13d   :  { %v523_v36 = vadd.f32 %v1345_v4, %v522_v33  ;;  %v524_v37 = vpop.f32.mrb[21].mxu0  ;;  %v1459_v38 = vadd.f32 %v1345_v4, %v626_v35  ;;  %v628_v39 = vpop.f32.mrb[21].mxu1 }
 0x13e   :  { %v525_v40 = vpop.f32.mrb[22].mxu0  ;;  %v629_v41 = vpop.f32.mrb[22].mxu1 }
 0x13f   :  { %690 = vst [vmem:[%s1687_s3 + $0x50] sm:$0xff] %v523_v36  ;;  %v738_v42 = vadd.f32 %v737_v30, %v523_v36  ;;  %v793_v44 = vmul.f32 %v523_v36, %v523_v36  ;;  %v526_v45 = vadd.f32 %v1345_v4, %v525_v40  ;;  %v527_v46 = vpop.f32.mrb[23].mxu0  ;;  %716 = vst [vmem:[%s1687_s3 + $0x120] sm:$0xff] %v1459_v38  ;;  %v631_v47 = vpop.f32.mrb[23].mxu1 }
 0x140   :  { %v1470_v48 = vadd.f32 %v1345_v4, %v629_v41 }
 0x141   :  { %v841_v49 = vadd.f32 %v840_v32, %v793_v44  ;;  %691 = vst [vmem:[%s1687_s3 + $0x58] sm:$0xff] %v526_v45  ;;  %v739_v50 = vadd.f32 %v738_v42, %v526_v45  ;;  %v794_v51 = vmul.f32 %v526_v45, %v526_v45 }
 0x142   :  { %717 = vst [vmem:[%s1687_s3 + $0x128] sm:$0xff] %v1470_v48 }
 0x143   :  { %v842_v53 = vadd.f32 %v841_v49, %v794_v51 }
 0x144   :  { %v530_v54 = vpop.f32.mrb[24].mxu0  ;;  %v634_v55 = vpop.f32.mrb[24].mxu1 }
 0x145   :  { %v531_v56 = vadd.f32 %v1345_v4, %v530_v54  ;;  %v532_v57 = vpop.f32.mrb[25].mxu0  ;;  %v1481_v58 = vadd.f32 %v1345_v4, %v634_v55  ;;  %v636_v59 = vpop.f32.mrb[25].mxu1 }
 0x146   :  { %v533_v60 = vpop.f32.mrb[26].mxu0  ;;  %v637_v62 = vpop.f32.mrb[26].mxu1 }
 0x147   :  { %692 = vst [vmem:[%s1687_s3 + $0x60] sm:$0xff] %v531_v56  ;;  %v740_v63 = vadd.f32 %v739_v50, %v531_v56  ;;  %v795_v0 = vmul.f32 %v531_v56, %v531_v56  ;;  %v534_v1 = vadd.f32 %v1345_v4, %v533_v60  ;;  %v535_v2 = vpop.f32.mrb[27].mxu0  ;;  %718 = vst [vmem:[%s1687_s3 + $0x130] sm:$0xff] %v1481_v58  ;;  %v639_v3 = vpop.f32.mrb[27].mxu1 }
 0x148   :  { %v1492_v5 = vadd.f32 %v1345_v4, %v637_v62 }
 0x149   :  { %v843_v6 = vadd.f32 %v842_v53, %v795_v0  ;;  %693 = vst [vmem:[%s1687_s3 + $0x68] sm:$0xff] %v534_v1  ;;  %v741_v8 = vadd.f32 %v740_v63, %v534_v1  ;;  %v796_v10 = vmul.f32 %v534_v1, %v534_v1 }
 0x14a   :  { %719 = vst [vmem:[%s1687_s3 + $0x138] sm:$0xff] %v1492_v5 }
 0x14b   :  { %v844_v11 = vadd.f32 %v843_v6, %v796_v10 }
 0x14c   :  { %v538_v12 = vpop.f32.mrb[28].mxu0  ;;  %v642_v13 = vpop.f32.mrb[28].mxu1 }
 0x14d   :  { %v539_v14 = vadd.f32 %v1345_v4, %v538_v12  ;;  %v540_v16 = vpop.f32.mrb[29].mxu0  ;;  %v1503_v17 = vadd.f32 %v1345_v4, %v642_v13  ;;  %v644_v19 = vpop.f32.mrb[29].mxu1 }
 0x14e   :  { %v541_v20 = vpop.f32.mrb[30].mxu0  ;;  %v645_v21 = vpop.f32.mrb[30].mxu1 }
 0x14f   :  { %694 = vst [vmem:[%s1687_s3 + $0x70] sm:$0xff] %v539_v14  ;;  %v742_v22 = vadd.f32 %v741_v8, %v539_v14  ;;  %v797_v23 = vmul.f32 %v539_v14, %v539_v14  ;;  %v542_v24 = vadd.f32 %v1345_v4, %v541_v20  ;;  %v543_v26 = vpop.f32.mrb[31].mxu0  ;;  %720 = vst [vmem:[%s1687_s3 + $0x140] sm:$0xff] %v1503_v17  ;;  %v647_v27 = vpop.f32.mrb[31].mxu1 }
 0x150   :  { %v1514_v29 = vadd.f32 %v1345_v4, %v645_v21 }
 0x151   :  { %v845_v30 = vadd.f32 %v844_v11, %v797_v23  ;;  %695 = vst [vmem:[%s1687_s3 + $0x78] sm:$0xff] %v542_v24  ;;  %v743_v31 = vadd.f32 %v742_v22, %v542_v24  ;;  %v798_v32 = vmul.f32 %v542_v24, %v542_v24 }
 0x152   :  { %721 = vst [vmem:[%s1687_s3 + $0x148] sm:$0xff] %v1514_v29 }
 0x153   :  { %v846_v33 = vadd.f32 %v845_v30, %v798_v32 }
 0x154   :  { %v546_v35 = vpop.f32.mrb[32].mxu0  ;;  %v650_v36 = vpop.f32.mrb[32].mxu1 }
 0x155   :  { %v547_v37 = vadd.f32 %v1345_v4, %v546_v35  ;;  %v548_v39 = vpop.f32.mrb[33].mxu0  ;;  %v1525_v40 = vadd.f32 %v1345_v4, %v650_v36  ;;  %v652_v41 = vpop.f32.mrb[33].mxu1 }
 0x156   :  { %v549_v42 = vpop.f32.mrb[34].mxu0  ;;  %v653_v44 = vpop.f32.mrb[34].mxu1 }
 0x157   :  { %696 = vst [vmem:[%s1687_s3 + $0x80] sm:$0xff] %v547_v37  ;;  %v744_v45 = vadd.f32 %v743_v31, %v547_v37  ;;  %v799_v46 = vmul.f32 %v547_v37, %v547_v37  ;;  %v550_v47 = vadd.f32 %v1345_v4, %v549_v42  ;;  %v551_v49 = vpop.f32.mrb[35].mxu0  ;;  %722 = vst [vmem:[%s1687_s3 + $0x150] sm:$0xff] %v1525_v40  ;;  %v655_v50 = vpop.f32.mrb[35].mxu1 }
 0x158   :  { %v1536_v51 = vadd.f32 %v1345_v4, %v653_v44 }
 0x159   :  { %v847_v53 = vadd.f32 %v846_v33, %v799_v46  ;;  %697 = vst [vmem:[%s1687_s3 + $0x88] sm:$0xff] %v550_v47  ;;  %v745_v54 = vadd.f32 %v744_v45, %v550_v47  ;;  %v800_v55 = vmul.f32 %v550_v47, %v550_v47 }
 0x15a   :  { %723 = vst [vmem:[%s1687_s3 + $0x158] sm:$0xff] %v1536_v51 }
 0x15b   :  { %v848_v56 = vadd.f32 %v847_v53, %v800_v55 }
 0x15c   :  { %v554_v57 = vpop.f32.mrb[36].mxu0  ;;  %v658_v59 = vpop.f32.mrb[36].mxu1 }
 0x15d   :  { %v555_v60 = vadd.f32 %v1345_v4, %v554_v57  ;;  %v556_v62 = vpop.f32.mrb[37].mxu0  ;;  %v1547_v63 = vadd.f32 %v1345_v4, %v658_v59  ;;  %v660_v0 = vpop.f32.mrb[37].mxu1 }
 0x15e   :  { %v557_v1 = vpop.f32.mrb[38].mxu0  ;;  %v661_v2 = vpop.f32.mrb[38].mxu1 }
 0x15f   :  { %698 = vst [vmem:[%s1687_s3 + $0x90] sm:$0xff] %v555_v60  ;;  %v746_v3 = vadd.f32 %v745_v54, %v555_v60  ;;  %v801_v6 = vmul.f32 %v555_v60, %v555_v60  ;;  %v558_v8 = vadd.f32 %v1345_v4, %v557_v1  ;;  %v559_v10 = vpop.f32.mrb[39].mxu0  ;;  %724 = vst [vmem:[%s1687_s3 + $0x160] sm:$0xff] %v1547_v63  ;;  %v663_v11 = vpop.f32.mrb[39].mxu1 }
 0x160   :  { %v1558_v12 = vadd.f32 %v1345_v4, %v661_v2 }
 0x161   :  { %v849_v13 = vadd.f32 %v848_v56, %v801_v6  ;;  %699 = vst [vmem:[%s1687_s3 + $0x98] sm:$0xff] %v558_v8  ;;  %v747_v14 = vadd.f32 %v746_v3, %v558_v8  ;;  %v802_v16 = vmul.f32 %v558_v8, %v558_v8 }
 0x162   :  { %725 = vst [vmem:[%s1687_s3 + $0x168] sm:$0xff] %v1558_v12 }
 0x163   :  { %v850_v19 = vadd.f32 %v849_v13, %v802_v16 }
 0x164   :  { %v562_v20 = vpop.f32.mrb[40].mxu0  ;;  %v666_v21 = vpop.f32.mrb[40].mxu1 }
 0x165   :  { %v563_v22 = vadd.f32 %v1345_v4, %v562_v20  ;;  %v564_v23 = vpop.f32.mrb[41].mxu0  ;;  %v1569_v24 = vadd.f32 %v1345_v4, %v666_v21  ;;  %v668_v26 = vpop.f32.mrb[41].mxu1 }
 0x166   :  { %v565_v27 = vpop.f32.mrb[42].mxu0  ;;  %v669_v30 = vpop.f32.mrb[42].mxu1  ;;  %v809_v23 = vmul.f32 %v1349_v9, %v1349_v9 }
 0x167   :  { %700 = vst [vmem:[%s1687_s3 + $0xa0] sm:$0xff] %v563_v22  ;;  %v748_v31 = vadd.f32 %v747_v14, %v563_v22  ;;  %v803_v32 = vmul.f32 %v563_v22, %v563_v22  ;;  %v566_v33 = vadd.f32 %v1345_v4, %v565_v27  ;;  %v567_v35 = vpop.f32.mrb[43].mxu0  ;;  %726 = vst [vmem:[%s1687_s3 + $0x170] sm:$0xff] %v1569_v24  ;;  %v671_v36 = vpop.f32.mrb[43].mxu1 }
 0x168   :  { %v1580_v37 = vadd.f32 %v1345_v4, %v669_v30  ;;  %v810_v30 = vmul.f32 %v1360_v15, %v1360_v15  ;;  %v812_v36 = vmul.f32 %v1382_v34, %v1382_v34 }
 0x169   :  { %v851_v39 = vadd.f32 %v850_v19, %v803_v32  ;;  %701 = vst [vmem:[%s1687_s3 + $0xa8] sm:$0xff] %v566_v33  ;;  %v749_v41 = vadd.f32 %v748_v31, %v566_v33  ;;  %v804_v42 = vmul.f32 %v566_v33, %v566_v33  ;;  %v811_v32 = vmul.f32 %v1371_v25, %v1371_v25 }
 0x16a   :  { %727 = vst [vmem:[%s1687_s3 + $0x178] sm:$0xff] %v1580_v37 }
 0x16b   :  { %v852_v44 = vadd.f32 %v851_v39, %v804_v42 }
 0x16c   :  { %v570_v45 = vpop.f32.mrb[44].mxu0  ;;  %v674_v46 = vpop.f32.mrb[44].mxu1 }
 0x16d   :  { %v571_v47 = vadd.f32 %v1345_v4, %v570_v45  ;;  %v572_v49 = vpop.f32.mrb[45].mxu0  ;;  %v1591_v50 = vadd.f32 %v1345_v4, %v674_v46  ;;  %v676_v53 = vpop.f32.mrb[45].mxu1 }
 0x16e   :  { %v573_v54 = vpop.f32.mrb[46].mxu0  ;;  %v677_v55 = vpop.f32.mrb[46].mxu1 }
 0x16f   :  { %702 = vst [vmem:[%s1687_s3 + $0xb0] sm:$0xff] %v571_v47  ;;  %v750_v56 = vadd.f32 %v749_v41, %v571_v47  ;;  %v805_v57 = vmul.f32 %v571_v47, %v571_v47  ;;  %v574_v59 = vadd.f32 %v1345_v4, %v573_v54  ;;  %v575_v60 = vpop.f32.mrb[47].mxu0  ;;  %728 = vst [vmem:[%s1687_s3 + $0x180] sm:$0xff] %v1591_v50  ;;  %v678_v62 = vpop.f32.mrb[47].mxu1 }
 0x171   :  { %v853_v0 = vadd.f32 %v852_v44, %v805_v57  ;;  %703 = vst [vmem:[%s1687_s3 + $0xb8] sm:$0xff] %v574_v59  ;;  %v751_v1 = vadd.f32 %v750_v56, %v574_v59  ;;  %v806_v2 = vmul.f32 %v574_v59, %v574_v59 }
 0x173   :  { %v854_v3 = vadd.f32 %v853_v0, %v806_v2  ;;  %v821_v2 = vmul.f32 %v1481_v58, %v1481_v58 }
 0x174   :  { %v578_v6 = vpop.f32.mrb[48].mxu0 }
 0x175   :  { %v579_v8 = vadd.f32 %v1345_v4, %v578_v6  ;;  %v580_v10 = vpop.f32.mrb[49].mxu0 }
 0x176   :  { %v581_v11 = vpop.f32.mrb[50].mxu0 }
 0x177   :  { %704 = vst [vmem:[%s1687_s3 + $0xc0] sm:$0xff] %v579_v8  ;;  %v752_v13 = vadd.f32 %v751_v1, %v579_v8  ;;  %v807_v14 = vmul.f32 %v579_v8, %v579_v8  ;;  %v582_v16 = vadd.f32 %v1345_v4, %v581_v11  ;;  %v583_v19 = vpop.f32.mrb[51].mxu0  ;;  %v822_v8 = vmul.f32 %v1492_v5, %v1492_v5 }
 0x178   :  { %v823_v11 = vmul.f32 %v1503_v17, %v1503_v17  ;;  %v825_v19 = vmul.f32 %v1525_v40, %v1525_v40 }
 0x179   :  { %v855_v20 = vadd.f32 %v854_v3, %v807_v14  ;;  %705 = vst [vmem:[%s1687_s3 + $0xc8] sm:$0xff] %v582_v16  ;;  %v753_v21 = vadd.f32 %v752_v13, %v582_v16  ;;  %v808_v22 = vmul.f32 %v582_v16, %v582_v16  ;;  %v824_v14 = vmul.f32 %v1514_v29, %v1514_v29 }
 0x17b   :  { %v754_v26 = vadd.f32 %v753_v21, %v1349_v9  ;;  %v856_v27 = vadd.f32 %v855_v20, %v808_v22  ;;  %v813_v9 = vmul.f32 %v1393_v43, %v1393_v43  ;;  %v826_v21 = vmul.f32 %v1536_v51, %v1536_v51 }
 0x17d   :  { %v755_v31 = vadd.f32 %v754_v26, %v1360_v15  ;;  %v857_v4 = vadd.f32 %v856_v27, %v809_v23  ;;  %v814_v15 = vmul.f32 %v1404_v52, %v1404_v52  ;;  %v827_v23 = vmul.f32 %v1547_v63, %v1547_v63 }
 0x17e   :  { %v828_v27 = vmul.f32 %v1558_v12, %v1558_v12 }
 0x17f   :  { %v756_v33 = vadd.f32 %v755_v31, %v1371_v25  ;;  %v858_v35 = vadd.f32 %v857_v4, %v810_v30  ;;  %v815_v25 = vmul.f32 %v1415_v61, %v1415_v61  ;;  %v829_v31 = vmul.f32 %v1569_v24, %v1569_v24 }
 0x181   :  { %v757_v39 = vadd.f32 %v756_v33, %v1382_v34  ;;  %v859_v41 = vadd.f32 %v858_v35, %v811_v32  ;;  %v816_v34 = vmul.f32 %v1426_v7, %v1426_v7  ;;  %v830_v32 = vmul.f32 %v1580_v37, %v1580_v37 }
 0x183   :  { %v758_v42 = vadd.f32 %v757_v39, %v1393_v43  ;;  %v860_v44 = vadd.f32 %v859_v41, %v812_v36  ;;  %v817_v43 = vmul.f32 %v1437_v18, %v1437_v18 }
 0x185   :  { %v759_v45 = vadd.f32 %v758_v42, %v1404_v52  ;;  %v861_v46 = vadd.f32 %v860_v44, %v813_v9  ;;  %v818_v52 = vmul.f32 %v1448_v28, %v1448_v28 }
 0x187   :  { %v862_v47 = vadd.f32 %v861_v46, %v814_v15  ;;  %v760_v49 = vadd.f32 %v759_v45, %v1415_v61  ;;  %v819_v61 = vmul.f32 %v1459_v38, %v1459_v38 }
 0x189   :  { %v761_v53 = vadd.f32 %v760_v49, %v1426_v7  ;;  %v863_v54 = vadd.f32 %v862_v47, %v815_v25  ;;  %v820_v7 = vmul.f32 %v1470_v48, %v1470_v48 }
 0x18b   :  { %v762_v55 = vadd.f32 %v761_v53, %v1437_v18  ;;  %v864_v56 = vadd.f32 %v863_v54, %v816_v34 }
 0x18d   :  { %v763_v57 = vadd.f32 %v762_v55, %v1448_v28  ;;  %v865_v59 = vadd.f32 %v864_v56, %v817_v43 }
 0x18f   :  { %v764_v60 = vadd.f32 %v763_v57, %v1459_v38  ;;  %v866_v62 = vadd.f32 %v865_v59, %v818_v52 }
 0x191   :  { %v765_v0 = vadd.f32 %v764_v60, %v1470_v48  ;;  %v867_v1 = vadd.f32 %v866_v62, %v819_v61 }
 0x193   :  { %v766_v18 = vadd.f32 %v765_v0, %v1481_v58  ;;  %v868_v3 = vadd.f32 %v867_v1, %v820_v7 }
 0x195   :  { %v869_v28 = vadd.f32 %v868_v3, %v821_v2  ;;  %v767_v6 = vadd.f32 %v766_v18, %v1492_v5 }
 0x197   :  { %v870_v38 = vadd.f32 %v869_v28, %v822_v8  ;;  %v768_v10 = vadd.f32 %v767_v6, %v1503_v17 }
 0x199   :  { %v871_v48 = vadd.f32 %v870_v38, %v823_v11  ;;  %v769_v13 = vadd.f32 %v768_v10, %v1514_v29 }
 0x19b   :  { %v872_v58 = vadd.f32 %v871_v48, %v824_v14  ;;  %v770_v16 = vadd.f32 %v769_v13, %v1525_v40 }
 0x19d   :  { %v873_v20 = vadd.f32 %v872_v58, %v825_v19  ;;  %v771_v5 = vadd.f32 %v770_v16, %v1536_v51 }
 0x19f   :  { %v874_v22 = vadd.f32 %v873_v20, %v826_v21  ;;  %v772_v17 = vadd.f32 %v771_v5, %v1547_v63  ;;  %v831_v63 = vmul.f32 %v1591_v50, %v1591_v50 }
 0x1a1   :  { %v875_v26 = vadd.f32 %v874_v22, %v827_v23  ;;  %v773_v29 = vadd.f32 %v772_v17, %v1558_v12 }
 0x1a3   :  { %v876_v30 = vadd.f32 %v875_v26, %v828_v27  ;;  %v774_v40 = vadd.f32 %v773_v29, %v1569_v24 }
 0x1a5   :  { %v877_v4 = vadd.f32 %v876_v30, %v829_v31  ;;  %v775_v51 = vadd.f32 %v774_v40, %v1580_v37 }
 0x1a7   :  { %v878_v33 = vadd.f32 %v877_v4, %v830_v32  ;;  %v776_v35 = vadd.f32 %v775_v51, %v1591_v50 }
 0x1a9   :  { %v777_v36 = vrot.slane %v776_v35, 4  ;;  %v879_v12 = vadd.f32 %v878_v33, %v831_v63 }
 0x1ab   :  { %v778_v39 = vadd.f32 %v777_v36, %v776_v35  ;;  %v880_v41 = vrot.slane %v879_v12, 4 }
 0x1ad   :  { %v779_v9 = vrot.slane %v778_v39, 2  ;;  %v881_v42 = vadd.f32 %v880_v41, %v879_v12 }
 0x1af   :  { %v780_v44 = vadd.f32 %v779_v9, %v778_v39  ;;  %v882_v24 = vrot.slane %v881_v42, 2 }
 0x1b1   :  { %v781_v15 = vrot.slane %v780_v44, 1  ;;  %v883_v45 = vadd.f32 %v882_v24, %v881_v42 }
 0x1b3   :  { %v884_v46 = vrot.slane %v883_v45, 1  ;;  %v782_v25 = vadd.f32 %v781_v15, %v780_v44 }
 0x1b5   :  { %v885_v37 = vadd.f32 %v884_v46, %v883_v45 }
 0x1b7   :  { %v887_v47 = vsel %vm886_vm0, %v782_v25, %v885_v37 }
 0x1b8   :  { %v889_v49 = vsel %vm888_vm1, %v887_v47, 0.0 }
 0x1b9   :  { %890 = vst [vmem:[%s1688_s4] sm:$0xff] %v889_v49 }

// kernel: celebrity_convnet_forward.14
= control target key start
LH: loop header
LB: loop body
LE: loop exit
PB: predicated region body
PF: predicated region fallthrough
CT: control target
= control target key end

     0   :  { %s203_s0 = inlined_call_operand.vmem [shape: f32[104,128], index: 0, kind: input, shape index: {}]   ;;  %s204_s1 = inlined_call_operand.vmem [shape: f32[1,128], index: 1, kind: input, shape index: {}]   ;;  %s205_s2 = inlined_call_operand.vmem [shape: f32[1,128], index: 2, kind: input, shape index: {}]   ;;  %s206_s3 = inlined_call_operand.vmem [shape: f32[104,128], index: 3, kind: output, shape index: {}]  }
   0x1   :  { %v14_v0 = vld [vmem:[%s203_s0] sm:$0xff]  ;;  %v15_v4 = vld [vmem:[%s203_s0 + $0x8] sm:$0xff]  ;;  %v16_v5 = vld [vmem:[%s203_s0 + $0x10] sm:$0xff] }
   0x2   :  { %v97_v1 = vld [vmem:[%s204_s1] ss:$0 sm:$0xff]  ;;  %v17_v6 = vld [vmem:[%s203_s0 + $0x18] sm:$0xff]  ;;  %v19_v11 = vld [vmem:[%s203_s0 + $0x28] sm:$0xff] }
   0x3   :  { %v98_v2 = vld [vmem:[%s205_s2] ss:$0 sm:$0xff]  ;;  %v34_v3 = vmul.f32 %v97_v1, %v14_v0  ;;  %v35_v7 = vmul.f32 %v97_v1, %v15_v4  ;;  %v36_v8 = vmul.f32 %v97_v1, %v16_v5  ;;  %v37_v9 = vmul.f32 %v97_v1, %v17_v6  ;;  %v20_v12 = vld [vmem:[%s203_s0 + $0x30] sm:$0xff]  ;;  %v21_v17 = vld [vmem:[%s203_s0 + $0x38] sm:$0xff] }
   0x4   :  { %v18_v10 = vld [vmem:[%s203_s0 + $0x20] sm:$0xff]  ;;  %v39_v15 = vmul.f32 %v97_v1, %v19_v11  ;;  %v40_v16 = vmul.f32 %v97_v1, %v20_v12  ;;  %v41_v21 = vmul.f32 %v97_v1, %v21_v17  ;;  %v23_v27 = vld [vmem:[%s203_s0 + $0x48] sm:$0xff]  ;;  %v24_v28 = vld [vmem:[%s203_s0 + $0x50] sm:$0xff] }
   0x5   :  { %v54_v13 = vadd.f32 %v98_v2, %v34_v3  ;;  %v38_v14 = vmul.f32 %v97_v1, %v18_v10  ;;  %v55_v18 = vadd.f32 %v98_v2, %v35_v7  ;;  %v56_v19 = vadd.f32 %v98_v2, %v36_v8  ;;  %v22_v22 = vld [vmem:[%s203_s0 + $0x40] sm:$0xff]  ;;  %v25_v29 = vld [vmem:[%s203_s0 + $0x58] sm:$0xff] }
   0x6   :  { %v57_v20 = vadd.f32 %v98_v2, %v37_v9  ;;  %v59_v25 = vadd.f32 %v98_v2, %v39_v15  ;;  %v60_v26 = vadd.f32 %v98_v2, %v40_v16  ;;  %v61_v33 = vadd.f32 %v98_v2, %v41_v21  ;;  %v26_v34 = vld [vmem:[%s203_s0 + $0x60] sm:$0xff] }
   0x7   :  { %v67_v23 = vmax.f32 %v54_v13, 0.0  ;;  %v58_v24 = vadd.f32 %v98_v2, %v38_v14  ;;  %v68_v30 = vmax.f32 %v55_v18, 0.0  ;;  %v69_v31 = vmax.f32 %v56_v19, 0.0 }
   0x8   :  { %v70_v32 = vmax.f32 %v57_v20, 0.0  ;;  %v72_v36 = vmax.f32 %v59_v25, 0.0  ;;  %v73_v37 = vmax.f32 %v60_v26, 0.0  ;;  %v42_v38 = vmul.f32 %v97_v1, %v22_v22 }
   0x9   :  { %80 = vst [vmem:[%s206_s3] sm:$0xff] %v67_v23  ;;  %v71_v35 = vmax.f32 %v58_v24, 0.0  ;;  %81 = vst [vmem:[%s206_s3 + $0x8] sm:$0xff] %v68_v30  ;;  %v74_v39 = vmax.f32 %v61_v33, 0.0  ;;  %v43_v40 = vmul.f32 %v97_v1, %v23_v27  ;;  %v44_v41 = vmul.f32 %v97_v1, %v24_v28 }
   0xa   :  { %82 = vst [vmem:[%s206_s3 + $0x10] sm:$0xff] %v69_v31  ;;  %83 = vst [vmem:[%s206_s3 + $0x18] sm:$0xff] %v70_v32  ;;  %v45_v42 = vmul.f32 %v97_v1, %v25_v29  ;;  %v62_v43 = vadd.f32 %v98_v2, %v42_v38  ;;  %v46_v44 = vmul.f32 %v97_v1, %v26_v34 }
   0xb   :  { %84 = vst [vmem:[%s206_s3 + $0x20] sm:$0xff] %v71_v35  ;;  %85 = vst [vmem:[%s206_s3 + $0x28] sm:$0xff] %v72_v36  ;;  %v63_v45 = vadd.f32 %v98_v2, %v43_v40  ;;  %v64_v46 = vadd.f32 %v98_v2, %v44_v41 }
   0xc   :  { %86 = vst [vmem:[%s206_s3 + $0x30] sm:$0xff] %v73_v37  ;;  %87 = vst [vmem:[%s206_s3 + $0x38] sm:$0xff] %v74_v39  ;;  %v65_v47 = vadd.f32 %v98_v2, %v45_v42  ;;  %v75_v48 = vmax.f32 %v62_v43, 0.0  ;;  %v66_v49 = vadd.f32 %v98_v2, %v46_v44 }
   0xd   :  { %v76_v50 = vmax.f32 %v63_v45, 0.0  ;;  %v77_v51 = vmax.f32 %v64_v46, 0.0 }
   0xe   :  { %v78_v52 = vmax.f32 %v65_v47, 0.0  ;;  %88 = vst [vmem:[%s206_s3 + $0x40] sm:$0xff] %v75_v48  ;;  %v79_v53 = vmax.f32 %v66_v49, 0.0 }
   0xf   :  { %89 = vst [vmem:[%s206_s3 + $0x48] sm:$0xff] %v76_v50  ;;  %90 = vst [vmem:[%s206_s3 + $0x50] sm:$0xff] %v77_v51 }
  0x10   :  { %91 = vst [vmem:[%s206_s3 + $0x58] sm:$0xff] %v78_v52  ;;  %92 = vst [vmem:[%s206_s3 + $0x60] sm:$0xff] %v79_v53 }

// kernel: celebrity_convnet_forward.13
= control target key start
LH: loop header
LB: loop body
LE: loop exit
PB: predicated region body
PF: predicated region fallthrough
CT: control target
= control target key end

     0   :  { %vm382_vm0 = vcmask 1040384   ;;  %vm384_vm1 = vcmask 1041408   ;;  %s720_s1 = inlined_call_operand.vmem [shape: bf16[256,128], index: 1, kind: input, shape index: {}]   ;;  %s721_s0 = inlined_call_operand.vmem [shape: bf16[104,256], index: 0, kind: input, shape index: {}]   ;;  %s722_s2 = inlined_call_operand.vmem [shape: f32[1,128], index: 2, kind: input, shape index: {}]   ;;  %s723_s3 = inlined_call_operand.vmem [shape: f32[104,128], index: 3, kind: output, shape index: {0}]   ;;  %s724_s4 = inlined_call_operand.vmem [shape: f32[1,8,128], index: 4, kind: output, shape index: {1}]  }
   0x1   :  { %v500_v0 = vld [vmem:[%s720_s1 + $0x40] sm:$0xff]   ;;  %v502_v2 = vld [vmem:[%s720_s1 + $0x48] sm:$0xff]   ;;  %v504_v4 = vld [vmem:[%s720_s1 + $0x50] sm:$0xff]  }
   0x2   :  { %v501_v1 = vld [vmem:[%s720_s1] sm:$0xff]   ;;  %426 = vmatprep.subr.bf16.mxu0 %v500_v0  ;;  %484 = vmatprep.subr.bf16.mxu1 %v500_v0  ;;  %v503_v3 = vld [vmem:[%s720_s1 + $0x8] sm:$0xff]   ;;  %v505_v5 = vld [vmem:[%s720_s1 + $0x10] sm:$0xff]  }
   0x3   :  { %427 = vmatpush3.bf16.msra.mxu0 %v501_v1  ;;  %492 = vmatpush3.bf16.msra.mxu1 %v501_v1  ;;  %v506_v6 = vld [vmem:[%s720_s1 + $0x58] sm:$0xff]   ;;  %v508_v8 = vld [vmem:[%s720_s1 + $0x60] sm:$0xff]   ;;  %v510_v10 = vld [vmem:[%s720_s1 + $0x68] sm:$0xff]  }
   0x4   :  { %428 = vmatprep.subr.bf16.mxu0 %v502_v2  ;;  %485 = vmatprep.subr.bf16.mxu1 %v502_v2  ;;  %v507_v7 = vld [vmem:[%s720_s1 + $0x18] sm:$0xff]   ;;  %v509_v9 = vld [vmem:[%s720_s1 + $0x20] sm:$0xff]   ;;  %v511_v12 = vld [vmem:[%s720_s1 + $0x28] sm:$0xff]  }
   0x5   :  { %v518_v11 = vld [vmem:[%s721_s0 + $0x4] ss:$8 sps:$4 sm:$0xff]   ;;  %v512_v13 = vld [vmem:[%s720_s1 + $0x70] sm:$0xff]   ;;  %v514_v16 = vld [vmem:[%s720_s1 + $0x78] sm:$0xff]  }
   0x6   :  { %264 = vmatprep.mubr.bf16.mxu0 %v518_v11  ;;  %v527_v14 = vld [vmem:[%s721_s0 + $0x44] ss:$8 sps:$4 sm:$0xff]   ;;  %v513_v15 = vld [vmem:[%s720_s1 + $0x30] sm:$0xff]   ;;  %v515_v17 = vld [vmem:[%s720_s1 + $0x38] sm:$0xff]  }
   0x7   :  { %429 = vmatpush3.bf16.msra.mxu0 %v503_v3  ;;  %493 = vmatpush3.bf16.msra.mxu1 %v503_v3  ;;  %v516_v18 = vld [vmem:[%s721_s0] ss:$8 sps:$4 sm:$0xff]   ;;  %v519_v19 = vld [vmem:[%s721_s0 + $0x14] ss:$8 sps:$4 sm:$0xff]   ;;  %v521_v23 = vld [vmem:[%s721_s0 + $0x10] ss:$8 sps:$4 sm:$0xff]  }
   0x8   :  { %430 = vmatprep.subr.bf16.mxu0 %v504_v4  ;;  %486 = vmatprep.subr.bf16.mxu1 %v504_v4  ;;  %v525_v20 = vld [vmem:[%s721_s0 + $0x40] ss:$8 sps:$4 sm:$0xff]   ;;  %v531_v21 = vld [vmem:[%s721_s0 + $0x54] ss:$8 sps:$4 sm:$0xff]   ;;  %v522_v24 = vld [vmem:[%s721_s0 + $0x24] ss:$8 sps:$4 sm:$0xff]  }
   0x9   :  { %296 = vmatprep.mubr.bf16.mxu1 %v527_v14  ;;  %v29_v22 = vld [vmem:[%s721_s0 + $0x60] sm:$0xff]  ;;  %v533_v25 = vld [vmem:[%s721_s0 + $0x50] ss:$8 sps:$4 sm:$0xff]   ;;  %v528_v28 = vld [vmem:[%s721_s0 + $0x34] ss:$8 sps:$4 sm:$0xff]  }
   0xa   :  { %v409_v26 = vcombine.high %v29_v22, %v29_v22  ;;  %v524_v27 = vld [vmem:[%s721_s0 + $0x20] ss:$8 sps:$4 sm:$0xff]   ;;  %v408_v29 = vcombine.low %v29_v22, %v29_v22  ;;  %v530_v30 = vld [vmem:[%s721_s0 + $0x30] ss:$8 sps:$4 sm:$0xff]  }
   0xb   :  { %431 = vmatpush3.bf16.msra.mxu0 %v505_v5  ;;  %494 = vmatpush3.bf16.msra.mxu1 %v505_v5  ;;  %v651_v32 = vld [vmem:[%s722_s2] ss:$0 sm:$0xff] }
   0xc   :  { %432 = vmatprep.subr.bf16.mxu0 %v506_v6  ;;  %487 = vmatprep.subr.bf16.mxu1 %v506_v6 }
   0xf   :  { %433 = vmatpush3.bf16.msra.mxu0 %v507_v7  ;;  %495 = vmatpush3.bf16.msra.mxu1 %v507_v7 }
  0x10   :  { %434 = vmatprep.subr.bf16.mxu0 %v508_v8  ;;  %488 = vmatprep.subr.bf16.mxu1 %v508_v8 }
  0x13   :  { %435 = vmatpush3.bf16.msra.mxu0 %v509_v9  ;;  %496 = vmatpush3.bf16.msra.mxu1 %v509_v9 }
  0x14   :  { %436 = vmatprep.subr.bf16.mxu0 %v510_v10  ;;  %489 = vmatprep.subr.bf16.mxu1 %v510_v10 }
  0x17   :  { %437 = vmatpush3.bf16.msra.mxu0 %v511_v12  ;;  %497 = vmatpush3.bf16.msra.mxu1 %v511_v12 }
  0x18   :  { %438 = vmatprep.subr.bf16.mxu0 %v512_v13  ;;  %490 = vmatprep.subr.bf16.mxu1 %v512_v13 }
  0x1b   :  { %439 = vmatpush3.bf16.msra.mxu0 %v513_v15  ;;  %498 = vmatpush3.bf16.msra.mxu1 %v513_v15 }
  0x1c   :  { %440 = vmatprep.subr.bf16.mxu0 %v514_v16  ;;  %491 = vmatprep.subr.bf16.mxu1 %v514_v16 }
  0x1f   :  { %441 = vmatpush3.bf16.msra.mxu0 %v515_v17  ;;  %499 = vmatpush3.bf16.msra.mxu1 %v515_v17 }
  0x22   :  { %265 = vmatmul.mubr.bf16.vlgmr.msra.gmra.mrb[0].mxu0 %v516_v18  ;;  %297 = vmatmul.mubr.bf16.vlgmr.msra.gmra.mrb[0].mxu1 %v525_v20 }
  0x23   :  { %272 = vmatprep.mubr.bf16.mxu0 %v519_v19  ;;  %304 = vmatprep.mubr.bf16.mxu1 %v531_v21 }
  0x2a   :  { %273 = vmatmul.mubr.bf16.gmra.mrb[4].mxu0 %v521_v23  ;;  %305 = vmatmul.mubr.bf16.gmra.mrb[4].mxu1 %v533_v25 }
  0x2b   :  { %280 = vmatprep.mubr.bf16.mxu0 %v522_v24  ;;  %312 = vmatprep.mubr.bf16.mxu1 %v409_v26 }
  0x32   :  { %281 = vmatmul.mubr.bf16.gmra.mrb[8].mxu0 %v524_v27  ;;  %313 = vmatmul.mubr.bf16.gmra.mrb[8].mxu1 %v408_v29 }
  0x33   :  { %288 = vmatprep.mubr.bf16.mxu0 %v528_v28 }
  0x3a   :  { %289 = vmatmul.mubr.bf16.gmra.mrb[12].mxu0 %v530_v30 }
  0xf5   :  { %v442_v31 = vpop.f32.mrb[0].mxu0  ;;  %v466_v34 = vpop.f32.mrb[0].mxu1 }
  0xf6   :  { %v443_v33 = vpop.f32.mrb[1].mxu0  ;;  %v467_v37 = vpop.f32.mrb[1].mxu1 }
  0xf7   :  { %v444_v35 = vadd.f32 %v443_v33, %v442_v31  ;;  %v445_v36 = vpop.f32.mrb[2].mxu0  ;;  %v468_v39 = vadd.f32 %v467_v37, %v466_v34  ;;  %v469_v40 = vpop.f32.mrb[2].mxu1 }
  0xf8   :  { %v446_v38 = vpop.f32.mrb[3].mxu0  ;;  %v470_v43 = vpop.f32.mrb[3].mxu1 }
  0xf9   :  { %v267_v41 = vadd.f32 %v444_v35, %v651_v32  ;;  %v447_v42 = vadd.f32 %v446_v38, %v445_v36  ;;  %v655_v44 = vadd.f32 %v468_v39, %v651_v32  ;;  %v471_v45 = vadd.f32 %v470_v43, %v469_v40 }
  0xfb   :  { %320 = vst [vmem:[%s723_s3] sm:$0xff] %v267_v41  ;;  %v270_v46 = vadd.f32 %v447_v42, %v651_v32  ;;  %328 = vst [vmem:[%s723_s3 + $0x40] sm:$0xff] %v655_v44  ;;  %v666_v47 = vadd.f32 %v471_v45, %v651_v32  ;;  %v351_v48 = vmul.f32 %v267_v41, %v267_v41 }
  0xfc   :  { %v359_v45 = vmul.f32 %v655_v44, %v655_v44 }
  0xfd   :  { %321 = vst [vmem:[%s723_s3 + $0x8] sm:$0xff] %v270_v46  ;;  %v333_v49 = vadd.f32 %v270_v46, %v267_v41  ;;  %v352_v50 = vmul.f32 %v270_v46, %v270_v46  ;;  %v448_v51 = vpop.f32.mrb[4].mxu0  ;;  %329 = vst [vmem:[%s723_s3 + $0x48] sm:$0xff] %v666_v47  ;;  %v472_v53 = vpop.f32.mrb[4].mxu1 }
  0xfe   :  { %v449_v52 = vpop.f32.mrb[5].mxu0  ;;  %v473_v57 = vpop.f32.mrb[5].mxu1 }
  0xff   :  { %v364_v54 = vadd.f32 %v352_v50, %v351_v48  ;;  %v450_v55 = vadd.f32 %v449_v52, %v448_v51  ;;  %v451_v56 = vpop.f32.mrb[6].mxu0  ;;  %v474_v59 = vadd.f32 %v473_v57, %v472_v53  ;;  %v475_v60 = vpop.f32.mrb[6].mxu1 }
 0x100   :  { %v452_v58 = vpop.f32.mrb[7].mxu0  ;;  %v476_v63 = vpop.f32.mrb[7].mxu1 }
 0x101   :  { %v275_v61 = vadd.f32 %v450_v55, %v651_v32  ;;  %v453_v62 = vadd.f32 %v452_v58, %v451_v56  ;;  %v307_v0 = vadd.f32 %v474_v59, %v651_v32  ;;  %v477_v1 = vadd.f32 %v476_v63, %v475_v60 }
 0x103   :  { %322 = vst [vmem:[%s723_s3 + $0x10] sm:$0xff] %v275_v61  ;;  %v334_v2 = vadd.f32 %v333_v49, %v275_v61  ;;  %v353_v3 = vmul.f32 %v275_v61, %v275_v61  ;;  %v278_v4 = vadd.f32 %v453_v62, %v651_v32  ;;  %330 = vst [vmem:[%s723_s3 + $0x50] sm:$0xff] %v307_v0 }
 0x104   :  { %v310_v5 = vadd.f32 %v477_v1, %v651_v32  ;;  %v360_v49 = vmul.f32 %v666_v47, %v666_v47 }
 0x105   :  { %v365_v6 = vadd.f32 %v364_v54, %v353_v3  ;;  %323 = vst [vmem:[%s723_s3 + $0x18] sm:$0xff] %v278_v4  ;;  %v335_v7 = vadd.f32 %v334_v2, %v278_v4  ;;  %v354_v8 = vmul.f32 %v278_v4, %v278_v4  ;;  %v454_v9 = vpop.f32.mrb[8].mxu0  ;;  %v478_v11 = vpop.f32.mrb[8].mxu1 }
 0x106   :  { %v455_v10 = vpop.f32.mrb[9].mxu0  ;;  %331 = vst [vmem:[%s723_s3 + $0x58] sm:$0xff] %v310_v5  ;;  %v479_v15 = vpop.f32.mrb[9].mxu1  ;;  %v362_v55 = vmul.f32 %v310_v5, %v310_v5 }
 0x107   :  { %v366_v12 = vadd.f32 %v365_v6, %v354_v8  ;;  %v456_v13 = vadd.f32 %v455_v10, %v454_v9  ;;  %v457_v14 = vpop.f32.mrb[10].mxu0  ;;  %v480_v17 = vadd.f32 %v479_v15, %v478_v11  ;;  %v481_v18 = vpop.f32.mrb[10].mxu1 }
 0x108   :  { %v458_v16 = vpop.f32.mrb[11].mxu0  ;;  %v482_v21 = vpop.f32.mrb[11].mxu1 }
 0x109   :  { %v283_v19 = vadd.f32 %v456_v13, %v651_v32  ;;  %v459_v20 = vadd.f32 %v458_v16, %v457_v14  ;;  %v315_v22 = vadd.f32 %v480_v17, %v651_v32 }
 0x10b   :  { %324 = vst [vmem:[%s723_s3 + $0x20] sm:$0xff] %v283_v19  ;;  %v336_v23 = vadd.f32 %v335_v7, %v283_v19  ;;  %v355_v24 = vmul.f32 %v283_v19, %v283_v19  ;;  %v286_v25 = vadd.f32 %v459_v20, %v651_v32  ;;  %332 = vst [vmem:[%s723_s3 + $0x60] sm:$0xff] %v315_v22 }
 0x10c   :  { %v363_v57 = vmul.f32 %v315_v22, %v315_v22 }
 0x10d   :  { %v367_v26 = vadd.f32 %v366_v12, %v355_v24  ;;  %325 = vst [vmem:[%s723_s3 + $0x28] sm:$0xff] %v286_v25  ;;  %v337_v27 = vadd.f32 %v336_v23, %v286_v25  ;;  %v356_v28 = vmul.f32 %v286_v25, %v286_v25  ;;  %v460_v29 = vpop.f32.mrb[12].mxu0 }
 0x10e   :  { %v461_v30 = vpop.f32.mrb[13].mxu0 }
 0x10f   :  { %v368_v31 = vadd.f32 %v367_v26, %v356_v28  ;;  %v462_v33 = vadd.f32 %v461_v30, %v460_v29  ;;  %v463_v34 = vpop.f32.mrb[14].mxu0 }
 0x110   :  { %v464_v35 = vpop.f32.mrb[15].mxu0 }
 0x111   :  { %v291_v36 = vadd.f32 %v462_v33, %v651_v32  ;;  %v465_v37 = vadd.f32 %v464_v35, %v463_v34 }
 0x113   :  { %326 = vst [vmem:[%s723_s3 + $0x30] sm:$0xff] %v291_v36  ;;  %v338_v38 = vadd.f32 %v337_v27, %v291_v36  ;;  %v357_v39 = vmul.f32 %v291_v36, %v291_v36  ;;  %v294_v40 = vadd.f32 %v465_v37, %v651_v32  ;;  %v361_v32 = vmul.f32 %v307_v0, %v307_v0 }
 0x115   :  { %v369_v41 = vadd.f32 %v368_v31, %v357_v39  ;;  %327 = vst [vmem:[%s723_s3 + $0x38] sm:$0xff] %v294_v40  ;;  %v339_v42 = vadd.f32 %v338_v38, %v294_v40  ;;  %v358_v43 = vmul.f32 %v294_v40, %v294_v40 }
 0x117   :  { %v340_v46 = vadd.f32 %v339_v42, %v655_v44  ;;  %v370_v48 = vadd.f32 %v369_v41, %v358_v43 }
 0x119   :  { %v371_v50 = vadd.f32 %v370_v48, %v359_v45  ;;  %v341_v51 = vadd.f32 %v340_v46, %v666_v47 }
 0x11b   :  { %v342_v52 = vadd.f32 %v341_v51, %v307_v0  ;;  %v372_v53 = vadd.f32 %v371_v50, %v360_v49 }
 0x11d   :  { %v343_v54 = vadd.f32 %v342_v52, %v310_v5  ;;  %v373_v56 = vadd.f32 %v372_v53, %v361_v32 }
 0x11f   :  { %v374_v58 = vadd.f32 %v373_v56, %v362_v55  ;;  %v344_v59 = vadd.f32 %v343_v54, %v315_v22 }
 0x121   :  { %v345_v60 = vrot.slane %v344_v59, 4  ;;  %v375_v61 = vadd.f32 %v374_v58, %v363_v57 }
 0x123   :  { %v346_v62 = vadd.f32 %v345_v60, %v344_v59  ;;  %v376_v44 = vrot.slane %v375_v61, 4 }
 0x125   :  { %v347_v63 = vrot.slane %v346_v62, 2  ;;  %v377_v1 = vadd.f32 %v376_v44, %v375_v61 }
 0x127   :  { %v348_v2 = vadd.f32 %v347_v63, %v346_v62  ;;  %v378_v3 = vrot.slane %v377_v1, 2 }
 0x129   :  { %v349_v4 = vrot.slane %v348_v2, 1  ;;  %v379_v6 = vadd.f32 %v378_v3, %v377_v1 }
 0x12b   :  { %v380_v47 = vrot.slane %v379_v6, 1  ;;  %v350_v0 = vadd.f32 %v349_v4, %v348_v2 }
 0x12d   :  { %v381_v7 = vadd.f32 %v380_v47, %v379_v6 }
 0x12f   :  { %v383_v5 = vsel %vm382_vm0, %v350_v0, %v381_v7 }
 0x130   :  { %v385_v8 = vsel %vm384_vm1, %v383_v5, 0.0 }
 0x131   :  { %386 = vst [vmem:[%s724_s4] sm:$0xff] %v385_v8 }

// kernel: celebrity_convnet_forward.15
= control target key start
LH: loop header
LB: loop body
LE: loop exit
PB: predicated region body
PF: predicated region fallthrough
CT: control target
= control target key end

     0   :  { %vm380_vm0 = vcmask 1040384   ;;  %vm382_vm1 = vcmask 1041408   ;;  %s647_s1 = inlined_call_operand.vmem [shape: bf16[384,128], index: 1, kind: input, shape index: {}]   ;;  %s648_s0 = inlined_call_operand.vmem [shape: bf16[32,384], index: 0, kind: input, shape index: {}]   ;;  %s649_s2 = inlined_call_operand.vmem [shape: f32[1,128], index: 2, kind: input, shape index: {}]   ;;  %s650_s3 = inlined_call_operand.vmem [shape: f32[32,128], index: 3, kind: output, shape index: {0}]   ;;  %s651_s4 = inlined_call_operand.vmem [shape: f32[1,8,128], index: 4, kind: output, shape index: {1}]  }
   0x1   :  { %v482_v0 = vld [vmem:[%s647_s1 + $0x40] sm:$0xff]   ;;  %v484_v2 = vld [vmem:[%s647_s1 + $0x48] sm:$0xff]   ;;  %v487_v5 = vld [vmem:[%s647_s1 + $0x50] sm:$0xff]  }
   0x2   :  { %v483_v1 = vld [vmem:[%s647_s1] sm:$0xff]   ;;  %424 = vmatprep.subr.bf16.mxu0 %v482_v0  ;;  %v486_v4 = vld [vmem:[%s647_s1 + $0x8] sm:$0xff]   ;;  %v489_v7 = vld [vmem:[%s647_s1 + $0x10] sm:$0xff]  }
   0x3   :  { %425 = vmatpush3.bf16.msra.mxu0 %v483_v1  ;;  %v485_v3 = vld [vmem:[%s647_s1 + $0x80] sm:$0xff]   ;;  %v488_v6 = vld [vmem:[%s647_s1 + $0x88] sm:$0xff]   ;;  %v490_v8 = vld [vmem:[%s647_s1 + $0x58] sm:$0xff]  }
   0x4   :  { %426 = vmatprep.subr.bf16.mxu0 %v484_v2  ;;  %462 = vmatprep.subr.bf16.mxu1 %v485_v3  ;;  %v491_v9 = vld [vmem:[%s647_s1 + $0x90] sm:$0xff]   ;;  %v492_v10 = vld [vmem:[%s647_s1 + $0x18] sm:$0xff]   ;;  %v493_v11 = vld [vmem:[%s647_s1 + $0x60] sm:$0xff]  }
   0x5   :  { %463 = vmatpush3.bf16.msra.mxu1 %v485_v3  ;;  %v494_v12 = vld [vmem:[%s647_s1 + $0x98] sm:$0xff]   ;;  %v495_v13 = vld [vmem:[%s647_s1 + $0x20] sm:$0xff]   ;;  %v496_v15 = vld [vmem:[%s647_s1 + $0x68] sm:$0xff]  }
   0x6   :  { %464 = vmatprep.subr.bf16.mxu1 %v488_v6  ;;  %v497_v14 = vld [vmem:[%s647_s1 + $0xa0] sm:$0xff]   ;;  %v498_v16 = vld [vmem:[%s647_s1 + $0x28] sm:$0xff]   ;;  %v499_v18 = vld [vmem:[%s647_s1 + $0x70] sm:$0xff]  }
   0x7   :  { %427 = vmatpush3.bf16.msra.mxu0 %v486_v4  ;;  %v500_v17 = vld [vmem:[%s647_s1 + $0xa8] sm:$0xff]   ;;  %v501_v19 = vld [vmem:[%s647_s1 + $0x30] sm:$0xff]   ;;  %v502_v20 = vld [vmem:[%s647_s1 + $0x78] sm:$0xff]  }
   0x8   :  { %428 = vmatprep.subr.bf16.mxu0 %v487_v5  ;;  %v503_v21 = vld [vmem:[%s647_s1 + $0xb0] sm:$0xff]   ;;  %v504_v23 = vld [vmem:[%s647_s1 + $0x38] sm:$0xff]   ;;  %v505_v26 = vld [vmem:[%s648_s0] ss:$12 sps:$4 sm:$0xff]  }
   0x9   :  { %465 = vmatpush3.bf16.msra.mxu1 %v488_v6  ;;  %v507_v22 = vld [vmem:[%s648_s0 + $0x4] ss:$12 sps:$4 sm:$0xff]   ;;  %v509_v24 = vld [vmem:[%s648_s0 + $0x8] ss:$12 sps:$4 sm:$0xff]   ;;  %v508_v25 = vld [vmem:[%s647_s1 + $0xb8] sm:$0xff]  }
   0xa   :  { %466 = vmatprep.subr.bf16.mxu1 %v491_v9  ;;  %288 = vmatprep.mubr.bf16.mxu0 %v507_v22  ;;  %v511_v27 = vld [vmem:[%s648_s0 + $0x1c] ss:$12 sps:$4 sm:$0xff]   ;;  %v510_v28 = vld [vmem:[%s648_s0 + $0x20] ss:$12 sps:$4 sm:$0xff]   ;;  %v513_v29 = vld [vmem:[%s648_s0 + $0x18] ss:$12 sps:$4 sm:$0xff]  }
   0xb   :  { %429 = vmatpush3.bf16.msra.mxu0 %v489_v7  ;;  %478 = vmatprep.mubr.bf16.mxu1 %v509_v24  ;;  %v393_v32 = vld [vmem:[%s649_s2] ss:$0 sm:$0xff] }
   0xc   :  { %430 = vmatprep.subr.bf16.mxu0 %v490_v8 }
   0xd   :  { %467 = vmatpush3.bf16.msra.mxu1 %v491_v9 }
   0xe   :  { %468 = vmatprep.subr.bf16.mxu1 %v494_v12 }
   0xf   :  { %431 = vmatpush3.bf16.msra.mxu0 %v492_v10 }
  0x10   :  { %432 = vmatprep.subr.bf16.mxu0 %v493_v11 }
  0x11   :  { %469 = vmatpush3.bf16.msra.mxu1 %v494_v12 }
  0x12   :  { %470 = vmatprep.subr.bf16.mxu1 %v497_v14 }
  0x13   :  { %433 = vmatpush3.bf16.msra.mxu0 %v495_v13 }
  0x14   :  { %434 = vmatprep.subr.bf16.mxu0 %v496_v15 }
  0x15   :  { %471 = vmatpush3.bf16.msra.mxu1 %v497_v14 }
  0x16   :  { %472 = vmatprep.subr.bf16.mxu1 %v500_v17 }
  0x17   :  { %435 = vmatpush3.bf16.msra.mxu0 %v498_v16 }
  0x18   :  { %436 = vmatprep.subr.bf16.mxu0 %v499_v18 }
  0x19   :  { %473 = vmatpush3.bf16.msra.mxu1 %v500_v17 }
  0x1a   :  { %474 = vmatprep.subr.bf16.mxu1 %v503_v21 }
  0x1b   :  { %437 = vmatpush3.bf16.msra.mxu0 %v501_v19 }
  0x1c   :  { %438 = vmatprep.subr.bf16.mxu0 %v502_v20 }
  0x1d   :  { %475 = vmatpush3.bf16.msra.mxu1 %v503_v21 }
  0x1e   :  { %476 = vmatprep.subr.bf16.mxu1 %v508_v25 }
  0x1f   :  { %439 = vmatpush3.bf16.msra.mxu0 %v504_v23 }
  0x21   :  { %477 = vmatpush3.bf16.msra.mxu1 %v508_v25 }
  0x22   :  { %289 = vmatmul.mubr.bf16.vlgmr.msra.gmra.mrb[0].mxu0 %v505_v26 }
  0x23   :  { %296 = vmatprep.mubr.bf16.mxu0 %v511_v27 }
  0x24   :  { %479 = vmatmul.mubr.bf16.vlgmr.msra.gmra.mrb[0].mxu1 %v510_v28 }
  0x2a   :  { %297 = vmatmul.mubr.bf16.gmra.mrb[4].mxu0 %v513_v29 }
  0xf5   :  { %v440_v30 = vpop.f32.mrb[0].mxu0 }
  0xf6   :  { %v441_v31 = vpop.f32.mrb[1].mxu0 }
  0xf7   :  { %v442_v33 = vadd.f32 %v441_v31, %v440_v30  ;;  %v443_v34 = vpop.f32.mrb[2].mxu0  ;;  %v480_v36 = vpop.f32.mrb[0].mxu1 }
  0xf8   :  { %v444_v35 = vpop.f32.mrb[3].mxu0  ;;  %v339_v39 = vpop.f32.mrb[1].mxu1 }
  0xf9   :  { %v445_v37 = vadd.f32 %v444_v35, %v443_v34  ;;  %v291_v38 = vadd.f32 %v442_v33, %v393_v32  ;;  %v481_v40 = vpop.f32.mrb[2].mxu1 }
  0xfa   :  { %v342_v43 = vpop.f32.mrb[3].mxu1 }
  0xfb   :  { %v340_v41 = vadd.f32 %v339_v39, %v291_v38  ;;  %v294_v42 = vadd.f32 %v445_v37, %v393_v32 }
  0xfd   :  { %354 = vst [vmem:[%s650_s3] sm:$0xff] %v340_v41  ;;  %v343_v44 = vadd.f32 %v342_v43, %v294_v42  ;;  %v446_v45 = vpop.f32.mrb[4].mxu0  ;;  %v367_v47 = vmul.f32 %v340_v41, %v340_v41 }
  0xfe   :  { %v447_v46 = vpop.f32.mrb[5].mxu0 }
  0xff   :  { %355 = vst [vmem:[%s650_s3 + $0x8] sm:$0xff] %v343_v44  ;;  %v358_v48 = vadd.f32 %v343_v44, %v340_v41  ;;  %v368_v49 = vmul.f32 %v343_v44, %v343_v44  ;;  %v448_v50 = vadd.f32 %v447_v46, %v446_v45  ;;  %v449_v51 = vpop.f32.mrb[6].mxu0 }
 0x100   :  { %v450_v52 = vpop.f32.mrb[7].mxu0 }
 0x101   :  { %v371_v53 = vadd.f32 %v368_v49, %v367_v47  ;;  %v299_v54 = vadd.f32 %v448_v50, %v393_v32  ;;  %v451_v55 = vadd.f32 %v450_v52, %v449_v51 }
 0x103   :  { %v348_v56 = vadd.f32 %v480_v36, %v299_v54  ;;  %v302_v57 = vadd.f32 %v451_v55, %v393_v32 }
 0x105   :  { %356 = vst [vmem:[%s650_s3 + $0x10] sm:$0xff] %v348_v56  ;;  %v359_v58 = vadd.f32 %v358_v48, %v348_v56  ;;  %v369_v59 = vmul.f32 %v348_v56, %v348_v56  ;;  %v351_v60 = vadd.f32 %v481_v40, %v302_v57 }
 0x107   :  { %v372_v61 = vadd.f32 %v371_v53, %v369_v59  ;;  %357 = vst [vmem:[%s650_s3 + $0x18] sm:$0xff] %v351_v60  ;;  %v360_v62 = vadd.f32 %v359_v58, %v351_v60  ;;  %v370_v63 = vmul.f32 %v351_v60, %v351_v60 }
 0x109   :  { %v361_v0 = vrot.slane %v360_v62, 4  ;;  %v373_v1 = vadd.f32 %v372_v61, %v370_v63 }
 0x10b   :  { %v362_v2 = vadd.f32 %v361_v0, %v360_v62  ;;  %v374_v3 = vrot.slane %v373_v1, 4 }
 0x10d   :  { %v363_v4 = vrot.slane %v362_v2, 2  ;;  %v375_v5 = vadd.f32 %v374_v3, %v373_v1 }
 0x10f   :  { %v364_v6 = vadd.f32 %v363_v4, %v362_v2  ;;  %v376_v7 = vrot.slane %v375_v5, 2 }
 0x111   :  { %v365_v8 = vrot.slane %v364_v6, 1  ;;  %v377_v9 = vadd.f32 %v376_v7, %v375_v5 }
 0x113   :  { %v378_v10 = vrot.slane %v377_v9, 1  ;;  %v366_v11 = vadd.f32 %v365_v8, %v364_v6 }
 0x115   :  { %v379_v12 = vadd.f32 %v378_v10, %v377_v9 }
 0x117   :  { %v381_v13 = vsel %vm380_vm0, %v366_v11, %v379_v12 }
 0x118   :  { %v383_v14 = vsel %vm382_vm1, %v381_v13, 0.0 }
 0x119   :  { %384 = vst [vmem:[%s651_s4] sm:$0xff] %v383_v14 }

// kernel: celebrity_convnet_forward.16
= control target key start
LH: loop header
LB: loop body
LE: loop exit
PB: predicated region body
PF: predicated region fallthrough
CT: control target
= control target key end

     0   :  { %s104_s0 = inlined_call_operand.vmem [shape: f32[32,128], index: 0, kind: input, shape index: {}]   ;;  %s105_s1 = inlined_call_operand.vmem [shape: f32[1,128], index: 1, kind: input, shape index: {}]   ;;  %s106_s2 = inlined_call_operand.vmem [shape: f32[1,128], index: 2, kind: input, shape index: {}]   ;;  %s107_s3 = inlined_call_operand.vmem [shape: f32[32,128], index: 3, kind: output, shape index: {}]  }
   0x1   :  { %v14_v0 = vld [vmem:[%s104_s0] sm:$0xff]  ;;  %v15_v4 = vld [vmem:[%s104_s0 + $0x8] sm:$0xff]  ;;  %v16_v5 = vld [vmem:[%s104_s0 + $0x10] sm:$0xff] }
   0x2   :  { %v52_v1 = vld [vmem:[%s105_s1] ss:$0 sm:$0xff]  ;;  %v17_v6 = vld [vmem:[%s104_s0 + $0x18] sm:$0xff] }
   0x3   :  { %v53_v2 = vld [vmem:[%s106_s2] ss:$0 sm:$0xff]  ;;  %v25_v3 = vmul.f32 %v52_v1, %v14_v0  ;;  %v26_v7 = vmul.f32 %v52_v1, %v15_v4  ;;  %v27_v8 = vmul.f32 %v52_v1, %v16_v5  ;;  %v28_v9 = vmul.f32 %v52_v1, %v17_v6 }
   0x5   :  { %v36_v10 = vadd.f32 %v53_v2, %v25_v3  ;;  %v37_v11 = vadd.f32 %v53_v2, %v26_v7  ;;  %v38_v12 = vadd.f32 %v53_v2, %v27_v8  ;;  %v39_v13 = vadd.f32 %v53_v2, %v28_v9 }
   0x7   :  { %v40_v14 = vmax.f32 %v36_v10, 0.0  ;;  %v41_v15 = vmax.f32 %v37_v11, 0.0  ;;  %v42_v16 = vmax.f32 %v38_v12, 0.0  ;;  %v43_v17 = vmax.f32 %v39_v13, 0.0 }
   0x9   :  { %44 = vst [vmem:[%s107_s3] sm:$0xff] %v40_v14  ;;  %45 = vst [vmem:[%s107_s3 + $0x8] sm:$0xff] %v41_v15 }
   0xa   :  { %46 = vst [vmem:[%s107_s3 + $0x10] sm:$0xff] %v42_v16  ;;  %47 = vst [vmem:[%s107_s3 + $0x18] sm:$0xff] %v43_v17 }

// kernel: celebrity_convnet_forward.17
= control target key start
LH: loop header
LB: loop body
LE: loop exit
PB: predicated region body
PF: predicated region fallthrough
CT: control target
= control target key end

     0   :  { %vm581_vm0 = vcmask 1040384   ;;  %vm583_vm1 = vcmask 1041408   ;;  %s978_s1 = inlined_call_operand.vmem [shape: bf16[640,128], index: 1, kind: input, shape index: {}]   ;;  %s979_s0 = inlined_call_operand.vmem [shape: bf16[32,640], index: 0, kind: input, shape index: {}]   ;;  %s980_s2 = inlined_call_operand.vmem [shape: f32[1,128], index: 2, kind: input, shape index: {}]   ;;  %s981_s3 = inlined_call_operand.vmem [shape: f32[32,128], index: 3, kind: output, shape index: {0}]   ;;  %s982_s4 = inlined_call_operand.vmem [shape: f32[1,8,128], index: 4, kind: output, shape index: {1}]  }
   0x1   :  { %v731_v0 = vld [vmem:[%s978_s1 + $0x40] sm:$0xff]   ;;  %v735_v4 = vld [vmem:[%s978_s1 + $0x48] sm:$0xff]   ;;  %v739_v8 = vld [vmem:[%s978_s1 + $0x50] sm:$0xff]  }
   0x2   :  { %v732_v1 = vld [vmem:[%s978_s1] sm:$0xff]   ;;  %645 = vmatprep.subr.bf16.mxu0 %v731_v0  ;;  %v736_v5 = vld [vmem:[%s978_s1 + $0x8] sm:$0xff]   ;;  %v740_v9 = vld [vmem:[%s978_s1 + $0x10] sm:$0xff]  }
   0x3   :  { %v733_v2 = vld [vmem:[%s978_s1 + $0xc0] sm:$0xff]   ;;  %646 = vmatpush3.bf16.msra.mxu0 %v732_v1  ;;  %v737_v6 = vld [vmem:[%s978_s1 + $0xc8] sm:$0xff]   ;;  %v741_v10 = vld [vmem:[%s978_s1 + $0xd0] sm:$0xff]  }
   0x4   :  { %v734_v3 = vld [vmem:[%s978_s1 + $0x80] sm:$0xff]   ;;  %673 = vmatprep.subr.bf16.mxu1 %v733_v2  ;;  %647 = vmatprep.subr.bf16.mxu0 %v735_v4  ;;  %v738_v7 = vld [vmem:[%s978_s1 + $0x88] sm:$0xff]   ;;  %v742_v11 = vld [vmem:[%s978_s1 + $0x90] sm:$0xff]  }
   0x5   :  { %674 = vmatpush3.bf16.msra.mxu1 %v734_v3  ;;  %v743_v12 = vld [vmem:[%s978_s1 + $0x58] sm:$0xff]   ;;  %v747_v16 = vld [vmem:[%s978_s1 + $0x60] sm:$0xff]   ;;  %v751_v20 = vld [vmem:[%s978_s1 + $0x68] sm:$0xff]  }
   0x6   :  { %675 = vmatprep.subr.bf16.mxu1 %v737_v6  ;;  %v744_v13 = vld [vmem:[%s978_s1 + $0x18] sm:$0xff]   ;;  %v748_v17 = vld [vmem:[%s978_s1 + $0x20] sm:$0xff]   ;;  %v752_v21 = vld [vmem:[%s978_s1 + $0x28] sm:$0xff]  }
   0x7   :  { %648 = vmatpush3.bf16.msra.mxu0 %v736_v5  ;;  %v745_v14 = vld [vmem:[%s978_s1 + $0xd8] sm:$0xff]   ;;  %v749_v18 = vld [vmem:[%s978_s1 + $0xe0] sm:$0xff]   ;;  %v753_v22 = vld [vmem:[%s978_s1 + $0xe8] sm:$0xff]  }
   0x8   :  { %649 = vmatprep.subr.bf16.mxu0 %v739_v8  ;;  %v746_v15 = vld [vmem:[%s978_s1 + $0x98] sm:$0xff]   ;;  %v750_v19 = vld [vmem:[%s978_s1 + $0xa0] sm:$0xff]   ;;  %v754_v23 = vld [vmem:[%s978_s1 + $0xa8] sm:$0xff]  }
   0x9   :  { %676 = vmatpush3.bf16.msra.mxu1 %v738_v7  ;;  %v755_v24 = vld [vmem:[%s978_s1 + $0x70] sm:$0xff]   ;;  %v759_v28 = vld [vmem:[%s978_s1 + $0x78] sm:$0xff]   ;;  %v766_v34 = vld [vmem:[%s978_s1 + $0x100] sm:$0xff]  }
   0xa   :  { %677 = vmatprep.subr.bf16.mxu1 %v741_v10  ;;  %v756_v25 = vld [vmem:[%s978_s1 + $0x30] sm:$0xff]   ;;  %v760_v29 = vld [vmem:[%s978_s1 + $0x38] sm:$0xff]   ;;  %v769_v36 = vld [vmem:[%s979_s0 + $0xc] ss:$20 sps:$4 sm:$0xff]  }
   0xb   :  { %650 = vmatpush3.bf16.msra.mxu0 %v740_v9  ;;  %v757_v26 = vld [vmem:[%s978_s1 + $0xf0] sm:$0xff]   ;;  %v761_v30 = vld [vmem:[%s978_s1 + $0xf8] sm:$0xff]   ;;  %v770_v37 = vld [vmem:[%s978_s1 + $0x108] sm:$0xff]   ;;  %489 = vmatprep.mubr.bf16.mxu1 %v769_v36 }
   0xc   :  { %651 = vmatprep.subr.bf16.mxu0 %v743_v12  ;;  %v758_v27 = vld [vmem:[%s978_s1 + $0xb0] sm:$0xff]   ;;  %v764_v32 = vld [vmem:[%s979_s0 + $0x4] ss:$20 sps:$4 sm:$0xff]   ;;  %v767_v35 = vld [vmem:[%s979_s0 + $0x8] ss:$20 sps:$4 sm:$0xff]  }
   0xd   :  { %678 = vmatpush3.bf16.msra.mxu1 %v742_v11  ;;  %v762_v31 = vld [vmem:[%s979_s0] ss:$20 sps:$4 sm:$0xff]   ;;  %v765_v33 = vld [vmem:[%s978_s1 + $0xb8] sm:$0xff]   ;;  %440 = vmatprep.mubr.bf16.mxu0 %v764_v32  ;;  %v780_v43 = vld [vmem:[%s979_s0 + $0x30] ss:$20 sps:$4 sm:$0xff]  }
   0xe   :  { %679 = vmatprep.subr.bf16.mxu1 %v745_v14  ;;  %v771_v38 = vld [vmem:[%s978_s1 + $0x110] sm:$0xff]   ;;  %v774_v39 = vld [vmem:[%s979_s0 + $0x2c] ss:$20 sps:$4 sm:$0xff]   ;;  %v772_v40 = vld [vmem:[%s978_s1 + $0x118] sm:$0xff]  }
   0xf   :  { %652 = vmatpush3.bf16.msra.mxu0 %v744_v13  ;;  %v777_v41 = vld [vmem:[%s979_s0 + $0x28] ss:$20 sps:$4 sm:$0xff]   ;;  %v773_v44 = vld [vmem:[%s978_s1 + $0x120] sm:$0xff]   ;;  %v781_v47 = vld [vmem:[%s978_s1 + $0x130] sm:$0xff]  }
  0x10   :  { %653 = vmatprep.subr.bf16.mxu0 %v747_v16  ;;  %v778_v42 = vld [vmem:[%s979_s0 + $0x34] ss:$20 sps:$4 sm:$0xff]   ;;  %v783_v45 = vld [vmem:[%s979_s0 + $0x10] ss:$20 sps:$4 sm:$0xff]   ;;  %v782_v48 = vld [vmem:[%s978_s1 + $0x138] sm:$0xff]  }
  0x11   :  { %680 = vmatpush3.bf16.msra.mxu1 %v746_v15  ;;  %v776_v46 = vld [vmem:[%s978_s1 + $0x128] sm:$0xff]   ;;  %v594_v51 = vld [vmem:[%s980_s2] ss:$0 sm:$0xff] }
  0x12   :  { %681 = vmatprep.subr.bf16.mxu1 %v749_v18  ;;  %v784_v49 = vld [vmem:[%s979_s0 + $0x38] ss:$20 sps:$4 sm:$0xff]  }
  0x13   :  { %654 = vmatpush3.bf16.msra.mxu0 %v748_v17 }
  0x14   :  { %655 = vmatprep.subr.bf16.mxu0 %v751_v20 }
  0x15   :  { %682 = vmatpush3.bf16.msra.mxu1 %v750_v19 }
  0x16   :  { %683 = vmatprep.subr.bf16.mxu1 %v753_v22 }
  0x17   :  { %656 = vmatpush3.bf16.msra.mxu0 %v752_v21 }
  0x18   :  { %657 = vmatprep.subr.bf16.mxu0 %v755_v24 }
  0x19   :  { %684 = vmatpush3.bf16.msra.mxu1 %v754_v23 }
  0x1a   :  { %685 = vmatprep.subr.bf16.mxu1 %v757_v26 }
  0x1b   :  { %658 = vmatpush3.bf16.msra.mxu0 %v756_v25 }
  0x1c   :  { %659 = vmatprep.subr.bf16.mxu0 %v759_v28 }
  0x1d   :  { %686 = vmatpush3.bf16.msra.mxu1 %v758_v27 }
  0x1e   :  { %687 = vmatprep.subr.bf16.mxu1 %v761_v30 }
  0x1f   :  { %660 = vmatpush3.bf16.msra.mxu0 %v760_v29 }
  0x20   :  { %711 = vmatprep.subr.bf16.mxu0 %v766_v34 }
  0x21   :  { %688 = vmatpush3.bf16.msra.mxu1 %v765_v33 }
  0x22   :  { %441 = vmatmul.mubr.bf16.vlgmr.msra.gmra.mrb[0].mxu0 %v762_v31 }
  0x23   :  { %712 = vmatpush3.bf16.msra.mxu0 %v766_v34  ;;  %448 = vmatprep.mubr.bf16.mxu0 %v774_v39 }
  0x24   :  { %490 = vmatmul.mubr.bf16.vlgmr.msra.gmra.mrb[0].mxu1 %v767_v35  ;;  %713 = vmatprep.subr.bf16.mxu0 %v770_v37 }
  0x25   :  { %497 = vmatprep.mubr.bf16.mxu1 %v778_v42 }
  0x27   :  { %714 = vmatpush3.bf16.msra.mxu0 %v770_v37 }
  0x28   :  { %715 = vmatprep.subr.bf16.mxu0 %v771_v38 }
  0x2a   :  { %449 = vmatmul.mubr.bf16.gmra.mrb[4].mxu0 %v777_v41 }
  0x2b   :  { %716 = vmatpush3.bf16.msra.mxu0 %v771_v38  ;;  %727 = vmatprep.mubr.bf16.mxu0 %v783_v45 }
  0x2c   :  { %717 = vmatprep.subr.bf16.mxu0 %v772_v40  ;;  %498 = vmatmul.mubr.bf16.gmra.mrb[4].mxu1 %v780_v43 }
  0x2f   :  { %718 = vmatpush3.bf16.msra.mxu0 %v772_v40 }
  0x30   :  { %719 = vmatprep.subr.bf16.mxu0 %v773_v44 }
  0x33   :  { %720 = vmatpush3.bf16.msra.mxu0 %v773_v44 }
  0x34   :  { %721 = vmatprep.subr.bf16.mxu0 %v776_v46 }
  0x37   :  { %722 = vmatpush3.bf16.msra.mxu0 %v776_v46 }
  0x38   :  { %723 = vmatprep.subr.bf16.mxu0 %v781_v47 }
  0x3b   :  { %724 = vmatpush3.bf16.msra.mxu0 %v781_v47 }
  0x3c   :  { %725 = vmatprep.subr.bf16.mxu0 %v782_v48 }
  0x3f   :  { %726 = vmatpush3.bf16.msra.mxu0 %v782_v48 }
  0x42   :  { %728 = vmatmul.mubr.bf16.vlgmr.msra.gmra.mrb[8].mxu0 %v784_v49 }
  0xf5   :  { %v661_v50 = vpop.f32.mrb[0].mxu0 }
  0xf6   :  { %v662_v52 = vpop.f32.mrb[1].mxu0 }
  0xf7   :  { %v663_v53 = vadd.f32 %v662_v52, %v661_v50  ;;  %v664_v54 = vpop.f32.mrb[2].mxu0  ;;  %v689_v55 = vpop.f32.mrb[0].mxu1 }
  0xf8   :  { %v665_v56 = vpop.f32.mrb[3].mxu0  ;;  %v690_v59 = vpop.f32.mrb[1].mxu1 }
  0xf9   :  { %v443_v57 = vadd.f32 %v663_v53, %v594_v51  ;;  %v666_v58 = vadd.f32 %v665_v56, %v664_v54  ;;  %v691_v60 = vadd.f32 %v690_v59, %v689_v55  ;;  %v692_v61 = vpop.f32.mrb[2].mxu1 }
  0xfa   :  { %v693_v63 = vpop.f32.mrb[3].mxu1 }
  0xfb   :  { %v446_v62 = vadd.f32 %v666_v58, %v594_v51  ;;  %v694_v0 = vadd.f32 %v693_v63, %v692_v61  ;;  %v492_v1 = vadd.f32 %v691_v60, %v443_v57 }
  0xfd   :  { %v667_v2 = vpop.f32.mrb[4].mxu0  ;;  %v495_v4 = vadd.f32 %v694_v0, %v446_v62 }
  0xfe   :  { %v668_v3 = vpop.f32.mrb[5].mxu0 }
  0xff   :  { %v669_v5 = vadd.f32 %v668_v3, %v667_v2  ;;  %v670_v6 = vpop.f32.mrb[6].mxu0  ;;  %v695_v7 = vpop.f32.mrb[4].mxu1 }
 0x100   :  { %v671_v8 = vpop.f32.mrb[7].mxu0  ;;  %v696_v11 = vpop.f32.mrb[5].mxu1 }
 0x101   :  { %v451_v9 = vadd.f32 %v669_v5, %v594_v51  ;;  %v672_v10 = vadd.f32 %v671_v8, %v670_v6  ;;  %v697_v12 = vadd.f32 %v696_v11, %v695_v7  ;;  %v698_v13 = vpop.f32.mrb[6].mxu1 }
 0x102   :  { %v699_v15 = vpop.f32.mrb[7].mxu1 }
 0x103   :  { %v454_v14 = vadd.f32 %v672_v10, %v594_v51  ;;  %v700_v16 = vadd.f32 %v699_v15, %v698_v13  ;;  %v500_v17 = vadd.f32 %v697_v12, %v451_v9 }
 0x105   :  { %v503_v18 = vadd.f32 %v700_v16, %v454_v14 }
 0x115   :  { %v729_v19 = vpop.f32.mrb[8].mxu0 }
 0x116   :  { %v549_v20 = vadd.f32 %v729_v19, %v500_v17  ;;  %v540_v21 = vpop.f32.mrb[9].mxu0 }
 0x117   :  { %v541_v22 = vadd.f32 %v540_v21, %v492_v1  ;;  %v730_v23 = vpop.f32.mrb[10].mxu0 }
 0x118   :  { %557 = vst [vmem:[%s981_s3 + $0x10] sm:$0xff] %v549_v20  ;;  %v552_v24 = vadd.f32 %v730_v23, %v503_v18  ;;  %v543_v25 = vpop.f32.mrb[11].mxu0  ;;  %v570_v30 = vmul.f32 %v549_v20, %v549_v20 }
 0x119   :  { %555 = vst [vmem:[%s981_s3] sm:$0xff] %v541_v22  ;;  %v544_v26 = vadd.f32 %v543_v25, %v495_v4  ;;  %v568_v27 = vmul.f32 %v541_v22, %v541_v22 }
 0x11a   :  { %558 = vst [vmem:[%s981_s3 + $0x18] sm:$0xff] %v552_v24  ;;  %v571_v33 = vmul.f32 %v552_v24, %v552_v24 }
 0x11b   :  { %556 = vst [vmem:[%s981_s3 + $0x8] sm:$0xff] %v544_v26  ;;  %v559_v28 = vadd.f32 %v544_v26, %v541_v22  ;;  %v569_v29 = vmul.f32 %v544_v26, %v544_v26 }
 0x11d   :  { %v560_v31 = vadd.f32 %v559_v28, %v549_v20  ;;  %v572_v32 = vadd.f32 %v569_v29, %v568_v27 }
 0x11f   :  { %v561_v34 = vadd.f32 %v560_v31, %v552_v24  ;;  %v573_v35 = vadd.f32 %v572_v32, %v570_v30 }
 0x121   :  { %v562_v36 = vrot.slane %v561_v34, 4  ;;  %v574_v37 = vadd.f32 %v573_v35, %v571_v33 }
 0x123   :  { %v563_v38 = vadd.f32 %v562_v36, %v561_v34  ;;  %v575_v39 = vrot.slane %v574_v37, 4 }
 0x125   :  { %v564_v40 = vrot.slane %v563_v38, 2  ;;  %v576_v41 = vadd.f32 %v575_v39, %v574_v37 }
 0x127   :  { %v565_v42 = vadd.f32 %v564_v40, %v563_v38  ;;  %v577_v43 = vrot.slane %v576_v41, 2 }
 0x129   :  { %v566_v44 = vrot.slane %v565_v42, 1  ;;  %v578_v45 = vadd.f32 %v577_v43, %v576_v41 }
 0x12b   :  { %v579_v46 = vrot.slane %v578_v45, 1  ;;  %v567_v47 = vadd.f32 %v566_v44, %v565_v42 }
 0x12d   :  { %v580_v48 = vadd.f32 %v579_v46, %v578_v45 }
 0x12f   :  { %v582_v49 = vsel %vm581_vm0, %v567_v47, %v580_v48 }
 0x130   :  { %v584_v50 = vsel %vm583_vm1, %v582_v49, 0.0 }
 0x131   :  { %585 = vst [vmem:[%s982_s4] sm:$0xff] %v584_v50 }

// kernel: celebrity_convnet_forward.20
= control target key start
LH: loop header
LB: loop body
LE: loop exit
PB: predicated region body
PF: predicated region fallthrough
CT: control target
= control target key end

     0   :  { %v24_v0 = vlaneseq  ;;  %s156_s1 = inlined_call_operand.vmem [shape: f32[1,256], index: 1, kind: input, shape index: {}]   ;;  %s157_s2 = inlined_call_operand.vmem [shape: f32[1,256], index: 2, kind: input, shape index: {}]   ;;  %s158_s0 = inlined_call_operand.vmem [shape: f32[32,256], index: 0, kind: input, shape index: {}]   ;;  %s159_s3 = inlined_call_operand.vmem [shape: f32[32,256], index: 3, kind: output, shape index: {}]  }
   0x1   :  { %v22_v2 = vld [vmem:[%s156_s1] sm:$0x3]  ;;  %v15_v6 = vld [vmem:[%s158_s0 + $0x8] sm:$0xff]  ;;  %v16_v8 = vld [vmem:[%s158_s0 + $0x10] sm:$0xff] }
   0x2   :  { %v25_v1 = vshrl.u32 %v24_v0, 7  ;;  %v42_v3 = vld [vmem:[%s157_s2] sm:$0x3]  ;;  %v17_v9 = vld [vmem:[%s158_s0 + $0x18] sm:$0xff]  ;;  %v19_v15 = vld [vmem:[%s158_s0 + $0x28] sm:$0xff] }
   0x3   :  { %v14_v4 = vld [vmem:[%s158_s0] sm:$0xff]  ;;  %v20_v16 = vld [vmem:[%s158_s0 + $0x30] sm:$0xff]  ;;  %v21_v17 = vld [vmem:[%s158_s0 + $0x38] sm:$0xff] }
   0x4   :  { %v26_v5 = vsub.s32 0, %v25_v1  ;;  %v30_v7 = vsub.s32 1, %v25_v1  ;;  %v18_v10 = vld [vmem:[%s158_s0 + $0x20] sm:$0xff] }
   0x6   :  { %v27_v11 = vrot.slane %v22_v2, %v26_v5  ;;  %v47_v12 = vrot.slane %v42_v3, %v26_v5  ;;  %v31_v13 = vrot.slane %v22_v2, %v30_v7  ;;  %v51_v14 = vrot.slane %v42_v3, %v30_v7 }
   0x8   :  { %v34_v18 = vmul.f32 %v27_v11, %v14_v4  ;;  %v35_v19 = vmul.f32 %v31_v13, %v15_v6  ;;  %v36_v20 = vmul.f32 %v27_v11, %v16_v8  ;;  %v37_v21 = vmul.f32 %v31_v13, %v17_v9 }
   0x9   :  { %v38_v22 = vmul.f32 %v27_v11, %v18_v10  ;;  %v39_v23 = vmul.f32 %v31_v13, %v19_v15  ;;  %v40_v24 = vmul.f32 %v27_v11, %v20_v16  ;;  %v41_v25 = vmul.f32 %v31_v13, %v21_v17 }
   0xa   :  { %v54_v26 = vadd.f32 %v47_v12, %v34_v18  ;;  %v55_v27 = vadd.f32 %v51_v14, %v35_v19  ;;  %v56_v28 = vadd.f32 %v47_v12, %v36_v20  ;;  %v57_v29 = vadd.f32 %v51_v14, %v37_v21 }
   0xb   :  { %v58_v30 = vadd.f32 %v47_v12, %v38_v22  ;;  %v59_v31 = vadd.f32 %v51_v14, %v39_v23  ;;  %v60_v32 = vadd.f32 %v47_v12, %v40_v24  ;;  %v61_v33 = vadd.f32 %v51_v14, %v41_v25 }
   0xc   :  { %v62_v34 = vmax.f32 %v54_v26, 0.0  ;;  %v63_v35 = vmax.f32 %v55_v27, 0.0  ;;  %v64_v36 = vmax.f32 %v56_v28, 0.0  ;;  %v65_v37 = vmax.f32 %v57_v29, 0.0 }
   0xd   :  { %v66_v38 = vmax.f32 %v58_v30, 0.0  ;;  %v67_v39 = vmax.f32 %v59_v31, 0.0  ;;  %v68_v40 = vmax.f32 %v60_v32, 0.0  ;;  %v69_v41 = vmax.f32 %v61_v33, 0.0 }
   0xe   :  { %70 = vst [vmem:[%s159_s3] sm:$0xff] %v62_v34  ;;  %71 = vst [vmem:[%s159_s3 + $0x8] sm:$0xff] %v63_v35 }
   0xf   :  { %72 = vst [vmem:[%s159_s3 + $0x10] sm:$0xff] %v64_v36  ;;  %73 = vst [vmem:[%s159_s3 + $0x18] sm:$0xff] %v65_v37 }
  0x10   :  { %74 = vst [vmem:[%s159_s3 + $0x20] sm:$0xff] %v66_v38  ;;  %75 = vst [vmem:[%s159_s3 + $0x28] sm:$0xff] %v67_v39 }
  0x11   :  { %76 = vst [vmem:[%s159_s3 + $0x30] sm:$0xff] %v68_v40  ;;  %77 = vst [vmem:[%s159_s3 + $0x38] sm:$0xff] %v69_v41 }

// kernel: celebrity_convnet_forward.19
= control target key start
LH: loop header
LB: loop body
LE: loop exit
PB: predicated region body
PF: predicated region fallthrough
CT: control target
= control target key end

     0   :  { %vm1322_vm0 = vcmask 1040384   ;;  %vm1325_vm1 = vcmask 1041408   ;;  %s2344_s1 = inlined_call_operand.vmem [shape: bf16[1152,256], index: 1, kind: input, shape index: {}]   ;;  %s2345_s0 = inlined_call_operand.vmem [shape: bf16[32,1152], index: 0, kind: input, shape index: {}]   ;;  %s2346_s2 = inlined_call_operand.vmem [shape: f32[1,256], index: 2, kind: input, shape index: {}]   ;;  %s2347_s3 = inlined_call_operand.vmem [shape: f32[32,256], index: 3, kind: output, shape index: {0}]   ;;  %s2348_s4 = inlined_call_operand.vmem [shape: f32[1,8,256], index: 4, kind: output, shape index: {1}]  }
   0x1   :  { %v1557_v0 = vld [vmem:[%s2344_s1 + $0x4] ss:$8 sps:$4 sm:$0xff]   ;;  %v1561_v2 = vld [vmem:[%s2344_s1] ss:$8 sps:$4 sm:$0xff]   ;;  %v1563_v4 = vld [vmem:[%s2344_s1 + $0x14] ss:$8 sps:$4 sm:$0xff]  }
   0x2   :  { %v1559_v1 = vld [vmem:[%s2344_s1 + $0x204] ss:$8 sps:$4 sm:$0xff]   ;;  %1005 = vmatprep.subr.bf16.mxu1 %v1557_v0  ;;  %v1562_v3 = vld [vmem:[%s2344_s1 + $0x200] ss:$8 sps:$4 sm:$0xff]   ;;  %v1565_v5 = vld [vmem:[%s2344_s1 + $0x214] ss:$8 sps:$4 sm:$0xff]  }
   0x3   :  { %1111 = vmatprep.subr.bf16.mxu0 %v1559_v1  ;;  %1006 = vmatpush1.bf16.msra.mxu1 %v1561_v2  ;;  %v1567_v6 = vld [vmem:[%s2344_s1 + $0x10] ss:$8 sps:$4 sm:$0xff]   ;;  %v1569_v8 = vld [vmem:[%s2344_s1 + $0x24] ss:$8 sps:$4 sm:$0xff]   ;;  %v1573_v10 = vld [vmem:[%s2344_s1 + $0x20] ss:$8 sps:$4 sm:$0xff]  }
   0x4   :  { %1112 = vmatpush1.bf16.msra.mxu0 %v1562_v3  ;;  %1007 = vmatprep.subr.bf16.mxu1 %v1563_v4  ;;  %v1568_v7 = vld [vmem:[%s2344_s1 + $0x210] ss:$8 sps:$4 sm:$0xff]   ;;  %v1571_v9 = vld [vmem:[%s2344_s1 + $0x224] ss:$8 sps:$4 sm:$0xff]   ;;  %v1574_v11 = vld [vmem:[%s2344_s1 + $0x220] ss:$8 sps:$4 sm:$0xff]  }
   0x5   :  { %1113 = vmatprep.subr.bf16.mxu0 %v1565_v5  ;;  %v1575_v12 = vld [vmem:[%s2344_s1 + $0x34] ss:$8 sps:$4 sm:$0xff]   ;;  %v1579_v14 = vld [vmem:[%s2344_s1 + $0x30] ss:$8 sps:$4 sm:$0xff]   ;;  %v1581_v16 = vld [vmem:[%s2344_s1 + $0x44] ss:$8 sps:$4 sm:$0xff]  }
   0x6   :  { %v1577_v13 = vld [vmem:[%s2344_s1 + $0x234] ss:$8 sps:$4 sm:$0xff]   ;;  %v1580_v15 = vld [vmem:[%s2344_s1 + $0x230] ss:$8 sps:$4 sm:$0xff]   ;;  %v1583_v17 = vld [vmem:[%s2344_s1 + $0x244] ss:$8 sps:$4 sm:$0xff]  }
   0x7   :  { %1008 = vmatpush1.bf16.msra.mxu1 %v1567_v6  ;;  %v1585_v18 = vld [vmem:[%s2344_s1 + $0x40] ss:$8 sps:$4 sm:$0xff]   ;;  %v1587_v20 = vld [vmem:[%s2344_s1 + $0x54] ss:$8 sps:$4 sm:$0xff]   ;;  %v1591_v22 = vld [vmem:[%s2344_s1 + $0x50] ss:$8 sps:$4 sm:$0xff]  }
   0x8   :  { %1114 = vmatpush1.bf16.msra.mxu0 %v1568_v7  ;;  %1009 = vmatprep.subr.bf16.mxu1 %v1569_v8  ;;  %v1586_v19 = vld [vmem:[%s2344_s1 + $0x240] ss:$8 sps:$4 sm:$0xff]   ;;  %v1589_v21 = vld [vmem:[%s2344_s1 + $0x254] ss:$8 sps:$4 sm:$0xff]   ;;  %v1592_v23 = vld [vmem:[%s2344_s1 + $0x250] ss:$8 sps:$4 sm:$0xff]  }
   0x9   :  { %1115 = vmatprep.subr.bf16.mxu0 %v1571_v9  ;;  %v1593_v24 = vld [vmem:[%s2344_s1 + $0x64] ss:$8 sps:$4 sm:$0xff]   ;;  %v1597_v26 = vld [vmem:[%s2344_s1 + $0x60] ss:$8 sps:$4 sm:$0xff]   ;;  %v1599_v28 = vld [vmem:[%s2344_s1 + $0x74] ss:$8 sps:$4 sm:$0xff]  }
   0xa   :  { %v1595_v25 = vld [vmem:[%s2344_s1 + $0x264] ss:$8 sps:$4 sm:$0xff]   ;;  %v1598_v27 = vld [vmem:[%s2344_s1 + $0x260] ss:$8 sps:$4 sm:$0xff]   ;;  %v1601_v29 = vld [vmem:[%s2344_s1 + $0x274] ss:$8 sps:$4 sm:$0xff]  }
   0xb   :  { %1010 = vmatpush1.bf16.msra.mxu1 %v1573_v10  ;;  %v1603_v30 = vld [vmem:[%s2344_s1 + $0x70] ss:$8 sps:$4 sm:$0xff]   ;;  %v1605_v32 = vld [vmem:[%s2344_s1 + $0x84] ss:$8 sps:$4 sm:$0xff]   ;;  %v1609_v34 = vld [vmem:[%s2344_s1 + $0x80] ss:$8 sps:$4 sm:$0xff]  }
   0xc   :  { %1116 = vmatpush1.bf16.msra.mxu0 %v1574_v11  ;;  %1011 = vmatprep.subr.bf16.mxu1 %v1575_v12  ;;  %v1604_v31 = vld [vmem:[%s2344_s1 + $0x270] ss:$8 sps:$4 sm:$0xff]   ;;  %v1607_v33 = vld [vmem:[%s2344_s1 + $0x284] ss:$8 sps:$4 sm:$0xff]   ;;  %v1610_v35 = vld [vmem:[%s2344_s1 + $0x280] ss:$8 sps:$4 sm:$0xff]  }
   0xd   :  { %1117 = vmatprep.subr.bf16.mxu0 %v1577_v13  ;;  %v1611_v36 = vld [vmem:[%s2344_s1 + $0x94] ss:$8 sps:$4 sm:$0xff]   ;;  %v1615_v38 = vld [vmem:[%s2344_s1 + $0x90] ss:$8 sps:$4 sm:$0xff]   ;;  %v1617_v40 = vld [vmem:[%s2344_s1 + $0xa4] ss:$8 sps:$4 sm:$0xff]  }
   0xe   :  { %v1613_v37 = vld [vmem:[%s2344_s1 + $0x294] ss:$8 sps:$4 sm:$0xff]   ;;  %v1616_v39 = vld [vmem:[%s2344_s1 + $0x290] ss:$8 sps:$4 sm:$0xff]   ;;  %v1619_v41 = vld [vmem:[%s2344_s1 + $0x2a4] ss:$8 sps:$4 sm:$0xff]  }
   0xf   :  { %1012 = vmatpush1.bf16.msra.mxu1 %v1579_v14  ;;  %v1621_v42 = vld [vmem:[%s2344_s1 + $0xa0] ss:$8 sps:$4 sm:$0xff]   ;;  %v1623_v44 = vld [vmem:[%s2344_s1 + $0xb4] ss:$8 sps:$4 sm:$0xff]   ;;  %v1627_v46 = vld [vmem:[%s2344_s1 + $0xb0] ss:$8 sps:$4 sm:$0xff]  }
  0x10   :  { %1118 = vmatpush1.bf16.msra.mxu0 %v1580_v15  ;;  %1013 = vmatprep.subr.bf16.mxu1 %v1581_v16  ;;  %v1622_v43 = vld [vmem:[%s2344_s1 + $0x2a0] ss:$8 sps:$4 sm:$0xff]   ;;  %v1625_v45 = vld [vmem:[%s2344_s1 + $0x2b4] ss:$8 sps:$4 sm:$0xff]   ;;  %v1628_v47 = vld [vmem:[%s2344_s1 + $0x2b0] ss:$8 sps:$4 sm:$0xff]  }
  0x11   :  { %1119 = vmatprep.subr.bf16.mxu0 %v1583_v17  ;;  %v1655_v48 = vld [vmem:[%s2345_s0 + $0x4] ss:$36 sps:$4 sm:$0xff]   ;;  %v1661_v51 = vld [vmem:[%s2345_s0 + $0x14] ss:$36 sps:$4 sm:$0xff]  }
  0x12   :  { %v1629_v49 = vld [vmem:[%s2344_s1 + $0xc4] ss:$8 sps:$4 sm:$0xff]   ;;  %1037 = vmatprep.mubr.bf16.mxu1 %v1655_v48  ;;  %v1633_v52 = vld [vmem:[%s2344_s1 + $0xc0] ss:$8 sps:$4 sm:$0xff]   ;;  %v1635_v54 = vld [vmem:[%s2344_s1 + $0xd4] ss:$8 sps:$4 sm:$0xff]   ;;  %1143 = vmatprep.mubr.bf16.mxu0 %v1661_v51 }
  0x13   :  { %1014 = vmatpush1.bf16.msra.mxu1 %v1585_v18  ;;  %v1631_v50 = vld [vmem:[%s2344_s1 + $0x2c4] ss:$8 sps:$4 sm:$0xff]   ;;  %v1634_v53 = vld [vmem:[%s2344_s1 + $0x2c0] ss:$8 sps:$4 sm:$0xff]   ;;  %v1637_v55 = vld [vmem:[%s2344_s1 + $0x2d4] ss:$8 sps:$4 sm:$0xff]  }
  0x14   :  { %1120 = vmatpush1.bf16.msra.mxu0 %v1586_v19  ;;  %1015 = vmatprep.subr.bf16.mxu1 %v1587_v20  ;;  %v1639_v56 = vld [vmem:[%s2344_s1 + $0xd0] ss:$8 sps:$4 sm:$0xff]   ;;  %v1641_v58 = vld [vmem:[%s2344_s1 + $0xe4] ss:$8 sps:$4 sm:$0xff]   ;;  %v1645_v60 = vld [vmem:[%s2344_s1 + $0xe0] ss:$8 sps:$4 sm:$0xff]  }
  0x15   :  { %1121 = vmatprep.subr.bf16.mxu0 %v1589_v21  ;;  %v1640_v57 = vld [vmem:[%s2344_s1 + $0x2d0] ss:$8 sps:$4 sm:$0xff]   ;;  %v1643_v59 = vld [vmem:[%s2344_s1 + $0x2e4] ss:$8 sps:$4 sm:$0xff]   ;;  %v1646_v61 = vld [vmem:[%s2344_s1 + $0x2e0] ss:$8 sps:$4 sm:$0xff]  }
  0x16   :  { %v1647_v62 = vld [vmem:[%s2344_s1 + $0xf4] ss:$8 sps:$4 sm:$0xff]   ;;  %v1651_v0 = vld [vmem:[%s2344_s1 + $0xf0] ss:$8 sps:$4 sm:$0xff]   ;;  %v1658_v2 = vld [vmem:[%s2344_s1 + $0x104] ss:$8 sps:$4 sm:$0xff]  }
  0x17   :  { %1016 = vmatpush1.bf16.msra.mxu1 %v1591_v22  ;;  %v1649_v63 = vld [vmem:[%s2344_s1 + $0x2f4] ss:$8 sps:$4 sm:$0xff]   ;;  %v1652_v1 = vld [vmem:[%s2344_s1 + $0x2f0] ss:$8 sps:$4 sm:$0xff]   ;;  %v1664_v3 = vld [vmem:[%s2344_s1 + $0x304] ss:$8 sps:$4 sm:$0xff]  }
  0x18   :  { %1122 = vmatpush1.bf16.msra.mxu0 %v1592_v23  ;;  %1017 = vmatprep.subr.bf16.mxu1 %v1593_v24  ;;  %v1653_v4 = vld [vmem:[%s2345_s0] ss:$36 sps:$4 sm:$0xff]   ;;  %v1659_v6 = vld [vmem:[%s2345_s0 + $0x10] ss:$36 sps:$4 sm:$0xff]  }
  0x19   :  { %1123 = vmatprep.subr.bf16.mxu0 %v1595_v25  ;;  %v1656_v5 = vld [vmem:[%s2344_s1 + $0x100] ss:$8 sps:$4 sm:$0xff]   ;;  %v1667_v8 = vld [vmem:[%s2344_s1 + $0x114] ss:$8 sps:$4 sm:$0xff]   ;;  %v1665_v10 = vld [vmem:[%s2344_s1 + $0x110] ss:$8 sps:$4 sm:$0xff]  }
  0x1a   :  { %v1662_v7 = vld [vmem:[%s2344_s1 + $0x300] ss:$8 sps:$4 sm:$0xff]   ;;  %v1670_v9 = vld [vmem:[%s2344_s1 + $0x314] ss:$8 sps:$4 sm:$0xff]   ;;  %v1668_v11 = vld [vmem:[%s2344_s1 + $0x310] ss:$8 sps:$4 sm:$0xff]  }
  0x1b   :  { %1018 = vmatpush1.bf16.msra.mxu1 %v1597_v26  ;;  %v1673_v12 = vld [vmem:[%s2344_s1 + $0x124] ss:$8 sps:$4 sm:$0xff]   ;;  %v1671_v14 = vld [vmem:[%s2344_s1 + $0x120] ss:$8 sps:$4 sm:$0xff]   ;;  %v1679_v16 = vld [vmem:[%s2344_s1 + $0x134] ss:$8 sps:$4 sm:$0xff]  }
  0x1c   :  { %1124 = vmatpush1.bf16.msra.mxu0 %v1598_v27  ;;  %1019 = vmatprep.subr.bf16.mxu1 %v1599_v28  ;;  %v1676_v13 = vld [vmem:[%s2344_s1 + $0x324] ss:$8 sps:$4 sm:$0xff]   ;;  %v1674_v15 = vld [vmem:[%s2344_s1 + $0x320] ss:$8 sps:$4 sm:$0xff]   ;;  %v1682_v17 = vld [vmem:[%s2344_s1 + $0x334] ss:$8 sps:$4 sm:$0xff]  }
  0x1d   :  { %1125 = vmatprep.subr.bf16.mxu0 %v1601_v29  ;;  %v1677_v18 = vld [vmem:[%s2344_s1 + $0x130] ss:$8 sps:$4 sm:$0xff]   ;;  %v1685_v20 = vld [vmem:[%s2344_s1 + $0x144] ss:$8 sps:$4 sm:$0xff]   ;;  %v1683_v22 = vld [vmem:[%s2344_s1 + $0x140] ss:$8 sps:$4 sm:$0xff]  }
  0x1e   :  { %v1680_v19 = vld [vmem:[%s2344_s1 + $0x330] ss:$8 sps:$4 sm:$0xff]   ;;  %v1688_v21 = vld [vmem:[%s2344_s1 + $0x344] ss:$8 sps:$4 sm:$0xff]   ;;  %v1686_v23 = vld [vmem:[%s2344_s1 + $0x340] ss:$8 sps:$4 sm:$0xff]  }
  0x1f   :  { %1020 = vmatpush1.bf16.msra.mxu1 %v1603_v30  ;;  %v1691_v24 = vld [vmem:[%s2344_s1 + $0x154] ss:$8 sps:$4 sm:$0xff]   ;;  %v1689_v26 = vld [vmem:[%s2344_s1 + $0x150] ss:$8 sps:$4 sm:$0xff]   ;;  %v1697_v28 = vld [vmem:[%s2344_s1 + $0x164] ss:$8 sps:$4 sm:$0xff]  }
  0x20   :  { %1126 = vmatpush1.bf16.msra.mxu0 %v1604_v31  ;;  %1021 = vmatprep.subr.bf16.mxu1 %v1605_v32  ;;  %v1694_v25 = vld [vmem:[%s2344_s1 + $0x354] ss:$8 sps:$4 sm:$0xff]   ;;  %v1692_v27 = vld [vmem:[%s2344_s1 + $0x350] ss:$8 sps:$4 sm:$0xff]   ;;  %v1747_v31 = vld [vmem:[%s2345_s0 + $0x48] ss:$36 sps:$4 sm:$0xff]  }
  0x21   :  { %1127 = vmatprep.subr.bf16.mxu0 %v1607_v33  ;;  %v1743_v29 = vld [vmem:[%s2345_s0 + $0x4c] ss:$36 sps:$4 sm:$0xff]   ;;  %v1745_v30 = vld [vmem:[%s2345_s0 + $0x5c] ss:$36 sps:$4 sm:$0xff]  }
  0x22   :  { %v1700_v32 = vld [vmem:[%s2344_s1 + $0x364] ss:$8 sps:$4 sm:$0xff]   ;;  %v1751_v33 = vld [vmem:[%s2345_s0 + $0x58] ss:$36 sps:$4 sm:$0xff]  }
  0x23   :  { %1022 = vmatpush1.bf16.msra.mxu1 %v1609_v34  ;;  %v1695_v34 = vld [vmem:[%s2344_s1 + $0x160] ss:$8 sps:$4 sm:$0xff]   ;;  %v1713_v48 = vld [vmem:[%s2344_s1 + $0x190] ss:$8 sps:$4 sm:$0xff]   ;;  %v1724_v51 = vld [vmem:[%s2344_s1 + $0x3a4] ss:$8 sps:$4 sm:$0xff]  }
  0x24   :  { %1128 = vmatpush1.bf16.msra.mxu0 %v1610_v35  ;;  %1023 = vmatprep.subr.bf16.mxu1 %v1611_v36  ;;  %v1698_v35 = vld [vmem:[%s2344_s1 + $0x360] ss:$8 sps:$4 sm:$0xff]   ;;  %v1703_v36 = vld [vmem:[%s2344_s1 + $0x174] ss:$8 sps:$4 sm:$0xff]  }
  0x25   :  { %1129 = vmatprep.subr.bf16.mxu0 %v1613_v37  ;;  %v1706_v37 = vld [vmem:[%s2344_s1 + $0x374] ss:$8 sps:$4 sm:$0xff]  }
  0x27   :  { %1024 = vmatpush1.bf16.msra.mxu1 %v1615_v38  ;;  %v1701_v38 = vld [vmem:[%s2344_s1 + $0x170] ss:$8 sps:$4 sm:$0xff]  }
  0x28   :  { %1130 = vmatpush1.bf16.msra.mxu0 %v1616_v39  ;;  %1025 = vmatprep.subr.bf16.mxu1 %v1617_v40  ;;  %v1704_v39 = vld [vmem:[%s2344_s1 + $0x370] ss:$8 sps:$4 sm:$0xff]   ;;  %v1709_v40 = vld [vmem:[%s2344_s1 + $0x184] ss:$8 sps:$4 sm:$0xff]  }
  0x29   :  { %1131 = vmatprep.subr.bf16.mxu0 %v1619_v41  ;;  %v1763_v41 = vld [vmem:[%s2345_s0 + $0xc] ss:$36 sps:$4 sm:$0xff]  }
  0x2b   :  { %1026 = vmatpush1.bf16.msra.mxu1 %v1621_v42  ;;  %v1712_v42 = vld [vmem:[%s2344_s1 + $0x384] ss:$8 sps:$4 sm:$0xff]  }
  0x2c   :  { %1132 = vmatpush1.bf16.msra.mxu0 %v1622_v43  ;;  %1027 = vmatprep.subr.bf16.mxu1 %v1623_v44  ;;  %v1766_v43 = vld [vmem:[%s2345_s0 + $0x1c] ss:$36 sps:$4 sm:$0xff]  }
  0x2d   :  { %1133 = vmatprep.subr.bf16.mxu0 %v1625_v45  ;;  %v1707_v44 = vld [vmem:[%s2344_s1 + $0x180] ss:$8 sps:$4 sm:$0xff]  }
  0x2e   :  { %v1710_v45 = vld [vmem:[%s2344_s1 + $0x380] ss:$8 sps:$4 sm:$0xff]  }
  0x2f   :  { %1028 = vmatpush1.bf16.msra.mxu1 %v1627_v46  ;;  %v1715_v46 = vld [vmem:[%s2344_s1 + $0x194] ss:$8 sps:$4 sm:$0xff]  }
  0x30   :  { %1134 = vmatpush1.bf16.msra.mxu0 %v1628_v47  ;;  %1029 = vmatprep.subr.bf16.mxu1 %v1629_v49  ;;  %v1718_v47 = vld [vmem:[%s2344_s1 + $0x394] ss:$8 sps:$4 sm:$0xff]   ;;  %v1716_v49 = vld [vmem:[%s2344_s1 + $0x390] ss:$8 sps:$4 sm:$0xff]  }
  0x31   :  { %1135 = vmatprep.subr.bf16.mxu0 %v1631_v50  ;;  %v1721_v50 = vld [vmem:[%s2344_s1 + $0x1a4] ss:$8 sps:$4 sm:$0xff]  }
  0x33   :  { %1030 = vmatpush1.bf16.msra.mxu1 %v1633_v52  ;;  %v1719_v52 = vld [vmem:[%s2344_s1 + $0x1a0] ss:$8 sps:$4 sm:$0xff]  }
  0x34   :  { %1136 = vmatpush1.bf16.msra.mxu0 %v1634_v53  ;;  %1031 = vmatprep.subr.bf16.mxu1 %v1635_v54  ;;  %v1722_v53 = vld [vmem:[%s2344_s1 + $0x3a0] ss:$8 sps:$4 sm:$0xff]   ;;  %v1727_v54 = vld [vmem:[%s2344_s1 + $0x1b4] ss:$8 sps:$4 sm:$0xff]  }
  0x35   :  { %1137 = vmatprep.subr.bf16.mxu0 %v1637_v55  ;;  %v1730_v55 = vld [vmem:[%s2344_s1 + $0x3b4] ss:$8 sps:$4 sm:$0xff]  }
  0x37   :  { %1032 = vmatpush1.bf16.msra.mxu1 %v1639_v56  ;;  %v1725_v56 = vld [vmem:[%s2344_s1 + $0x1b0] ss:$8 sps:$4 sm:$0xff]  }
  0x38   :  { %1138 = vmatpush1.bf16.msra.mxu0 %v1640_v57  ;;  %1033 = vmatprep.subr.bf16.mxu1 %v1641_v58  ;;  %v1728_v57 = vld [vmem:[%s2344_s1 + $0x3b0] ss:$8 sps:$4 sm:$0xff]   ;;  %v1733_v58 = vld [vmem:[%s2344_s1 + $0x1c4] ss:$8 sps:$4 sm:$0xff]  }
  0x39   :  { %1139 = vmatprep.subr.bf16.mxu0 %v1643_v59  ;;  %v1736_v59 = vld [vmem:[%s2344_s1 + $0x3c4] ss:$8 sps:$4 sm:$0xff]  }
  0x3b   :  { %1034 = vmatpush1.bf16.msra.mxu1 %v1645_v60  ;;  %v1731_v60 = vld [vmem:[%s2344_s1 + $0x1c0] ss:$8 sps:$4 sm:$0xff]  }
  0x3c   :  { %1140 = vmatpush1.bf16.msra.mxu0 %v1646_v61  ;;  %1035 = vmatprep.subr.bf16.mxu1 %v1647_v62  ;;  %v1734_v61 = vld [vmem:[%s2344_s1 + $0x3c0] ss:$8 sps:$4 sm:$0xff]   ;;  %v1739_v62 = vld [vmem:[%s2344_s1 + $0x1d4] ss:$8 sps:$4 sm:$0xff]  }
  0x3d   :  { %1141 = vmatprep.subr.bf16.mxu0 %v1649_v63  ;;  %v1742_v63 = vld [vmem:[%s2344_s1 + $0x3d4] ss:$8 sps:$4 sm:$0xff]  }
  0x3f   :  { %1036 = vmatpush1.bf16.msra.mxu1 %v1651_v0  ;;  %v1737_v0 = vld [vmem:[%s2344_s1 + $0x1d0] ss:$8 sps:$4 sm:$0xff]  }
  0x40   :  { %1142 = vmatpush1.bf16.msra.mxu0 %v1652_v1  ;;  %1058 = vmatprep.subr.bf16.mxu1 %v1658_v2  ;;  %v1740_v1 = vld [vmem:[%s2344_s1 + $0x3d0] ss:$8 sps:$4 sm:$0xff]   ;;  %v1750_v2 = vld [vmem:[%s2344_s1 + $0x1e4] ss:$8 sps:$4 sm:$0xff]  }
  0x41   :  { %1164 = vmatprep.subr.bf16.mxu0 %v1664_v3  ;;  %v1754_v3 = vld [vmem:[%s2344_s1 + $0x3e4] ss:$8 sps:$4 sm:$0xff]  }
  0x42   :  { %1038 = vmatmul.mubr.bf16.vlgmr.msra.gmra.mrb[0].mxu1 %v1653_v4  ;;  %v1748_v4 = vld [vmem:[%s2344_s1 + $0x1e0] ss:$8 sps:$4 sm:$0xff]  }
  0x43   :  { %1144 = vmatmul.mubr.bf16.vlgmr.msra.gmra.mrb[0].mxu0 %v1659_v6  ;;  %1059 = vmatpush1.bf16.msra.mxu1 %v1656_v5  ;;  %v1752_v5 = vld [vmem:[%s2344_s1 + $0x3e0] ss:$8 sps:$4 sm:$0xff]   ;;  %v1757_v6 = vld [vmem:[%s2344_s1 + $0x1f4] ss:$8 sps:$4 sm:$0xff]  }
  0x44   :  { %1165 = vmatpush1.bf16.msra.mxu0 %v1662_v7  ;;  %1060 = vmatprep.subr.bf16.mxu1 %v1667_v8  ;;  %v1760_v7 = vld [vmem:[%s2344_s1 + $0x3f4] ss:$8 sps:$4 sm:$0xff]   ;;  %v1755_v8 = vld [vmem:[%s2344_s1 + $0x1f0] ss:$8 sps:$4 sm:$0xff]  }
  0x45   :  { %1166 = vmatprep.subr.bf16.mxu0 %v1670_v9  ;;  %1047 = vmatprep.mubr.bf16.mxu1 %v1743_v29  ;;  %v1758_v9 = vld [vmem:[%s2344_s1 + $0x3f0] ss:$8 sps:$4 sm:$0xff]   ;;  %v1793_v29 = vld [vmem:[%s2344_s1 + $0x464] ss:$8 sps:$4 sm:$0xff]  }
  0x46   :  { %1153 = vmatprep.mubr.bf16.mxu0 %v1745_v30  ;;  %v1791_v30 = vld [vmem:[%s2344_s1 + $0x460] ss:$8 sps:$4 sm:$0xff]  }
  0x47   :  { %1061 = vmatpush1.bf16.msra.mxu1 %v1665_v10  ;;  %v1769_v10 = vld [vmem:[%s2344_s1 + $0x404] ss:$8 sps:$4 sm:$0xff]  }
  0x48   :  { %1167 = vmatpush1.bf16.msra.mxu0 %v1668_v11  ;;  %1062 = vmatprep.subr.bf16.mxu1 %v1673_v12  ;;  %v1761_v11 = vld [vmem:[%s2345_s0 + $0x8] ss:$36 sps:$4 sm:$0xff]   ;;  %v1764_v12 = vld [vmem:[%s2345_s0 + $0x18] ss:$36 sps:$4 sm:$0xff]  }
  0x49   :  { %1168 = vmatprep.subr.bf16.mxu0 %v1676_v13  ;;  %v1767_v13 = vld [vmem:[%s2344_s1 + $0x400] ss:$8 sps:$4 sm:$0xff]  }
  0x4a   :  { %1048 = vmatmul.mubr.bf16.gmra.mrb[4].mxu1 %v1747_v31  ;;  %v1796_v31 = vld [vmem:[%s2344_s1 + $0x474] ss:$8 sps:$4 sm:$0xff]  }
  0x4b   :  { %1063 = vmatpush1.bf16.msra.mxu1 %v1671_v14  ;;  %1154 = vmatmul.mubr.bf16.gmra.mrb[4].mxu0 %v1751_v33  ;;  %v1772_v14 = vld [vmem:[%s2344_s1 + $0x414] ss:$8 sps:$4 sm:$0xff]   ;;  %v1797_v33 = vld [vmem:[%s2345_s0 + $0x20] ss:$36 sps:$4 sm:$0xff]  }
  0x4c   :  { %1169 = vmatpush1.bf16.msra.mxu0 %v1674_v15  ;;  %1064 = vmatprep.subr.bf16.mxu1 %v1679_v16  ;;  %v1773_v15 = vld [vmem:[%s2345_s0 + $0x54] ss:$36 sps:$4 sm:$0xff]   ;;  %v1775_v16 = vld [vmem:[%s2345_s0 + $0x64] ss:$36 sps:$4 sm:$0xff]  }
  0x4d   :  { %1170 = vmatprep.subr.bf16.mxu0 %v1682_v17  ;;  %1090 = vmatprep.mubr.bf16.mxu1 %v1763_v41  ;;  %v1770_v17 = vld [vmem:[%s2344_s1 + $0x410] ss:$8 sps:$4 sm:$0xff]  }
  0x4e   :  { %1196 = vmatprep.mubr.bf16.mxu0 %v1766_v43 }
  0x4f   :  { %1065 = vmatpush1.bf16.msra.mxu1 %v1677_v18  ;;  %v1781_v18 = vld [vmem:[%s2344_s1 + $0x424] ss:$8 sps:$4 sm:$0xff]  }
  0x50   :  { %1171 = vmatpush1.bf16.msra.mxu0 %v1680_v19  ;;  %1066 = vmatprep.subr.bf16.mxu1 %v1685_v20  ;;  %v1777_v19 = vld [vmem:[%s2345_s0 + $0x50] ss:$36 sps:$4 sm:$0xff]   ;;  %v1778_v20 = vld [vmem:[%s2345_s0 + $0x60] ss:$36 sps:$4 sm:$0xff]  }
  0x51   :  { %1172 = vmatprep.subr.bf16.mxu0 %v1688_v21  ;;  %v1779_v21 = vld [vmem:[%s2344_s1 + $0x420] ss:$8 sps:$4 sm:$0xff]  }
  0x53   :  { %1067 = vmatpush1.bf16.msra.mxu1 %v1683_v22  ;;  %v1784_v22 = vld [vmem:[%s2344_s1 + $0x434] ss:$8 sps:$4 sm:$0xff]  }
  0x54   :  { %1173 = vmatpush1.bf16.msra.mxu0 %v1686_v23  ;;  %1068 = vmatprep.subr.bf16.mxu1 %v1691_v24  ;;  %v1782_v23 = vld [vmem:[%s2344_s1 + $0x430] ss:$8 sps:$4 sm:$0xff]   ;;  %v1787_v24 = vld [vmem:[%s2344_s1 + $0x444] ss:$8 sps:$4 sm:$0xff]  }
  0x55   :  { %1174 = vmatprep.subr.bf16.mxu0 %v1694_v25  ;;  %v1799_v25 = vmov 0  }
  0x57   :  { %1069 = vmatpush1.bf16.msra.mxu1 %v1689_v26  ;;  %v1785_v26 = vld [vmem:[%s2344_s1 + $0x440] ss:$8 sps:$4 sm:$0xff]  }
  0x58   :  { %1175 = vmatpush1.bf16.msra.mxu0 %v1692_v27  ;;  %1070 = vmatprep.subr.bf16.mxu1 %v1697_v28  ;;  %v1790_v27 = vld [vmem:[%s2344_s1 + $0x454] ss:$8 sps:$4 sm:$0xff]   ;;  %v1788_v28 = vld [vmem:[%s2344_s1 + $0x450] ss:$8 sps:$4 sm:$0xff]  }
  0x59   :  { %1176 = vmatprep.subr.bf16.mxu0 %v1700_v32  ;;  %v1794_v32 = vld [vmem:[%s2344_s1 + $0x470] ss:$8 sps:$4 sm:$0xff]  }
  0x5b   :  { %1071 = vmatpush1.bf16.msra.mxu1 %v1695_v34  ;;  %v1798_v34 = vld [vmem:[%s2345_s0 + $0x68] ss:$36 sps:$4 sm:$0xff]  }
  0x5c   :  { %1177 = vmatpush1.bf16.msra.mxu0 %v1698_v35  ;;  %1072 = vmatprep.subr.bf16.mxu1 %v1703_v36  ;;  %v183_v35 = vlaneseq }
  0x5d   :  { %1178 = vmatprep.subr.bf16.mxu0 %v1706_v37 }
  0x5e   :  { %v184_v36 = vshrl.u32 %v183_v35, 7 }
  0x5f   :  { %1073 = vmatpush1.bf16.msra.mxu1 %v1701_v38 }
  0x60   :  { %1179 = vmatpush1.bf16.msra.mxu0 %v1704_v39  ;;  %1074 = vmatprep.subr.bf16.mxu1 %v1709_v40  ;;  %v185_v40 = vsub.s32 0, %v184_v36  ;;  %v189_v43 = vsub.s32 1, %v184_v36 }
  0x61   :  { %1180 = vmatprep.subr.bf16.mxu0 %v1712_v42  ;;  %v181_v42 = vld [vmem:[%s2346_s2] sm:$0x3] }
  0x63   :  { %1075 = vmatpush1.bf16.msra.mxu1 %v1707_v44  ;;  %v186_v44 = vrot.slane %v181_v42, %v185_v40 }
  0x64   :  { %1181 = vmatpush1.bf16.msra.mxu0 %v1710_v45  ;;  %1076 = vmatprep.subr.bf16.mxu1 %v1715_v46  ;;  %v190_v45 = vrot.slane %v181_v42, %v189_v43 }
  0x65   :  { %1182 = vmatprep.subr.bf16.mxu0 %v1718_v47 }
  0x67   :  { %1077 = vmatpush1.bf16.msra.mxu1 %v1713_v48 }
  0x68   :  { %1183 = vmatpush1.bf16.msra.mxu0 %v1716_v49  ;;  %1078 = vmatprep.subr.bf16.mxu1 %v1721_v50 }
  0x69   :  { %1184 = vmatprep.subr.bf16.mxu0 %v1724_v51 }
  0x6b   :  { %1079 = vmatpush1.bf16.msra.mxu1 %v1719_v52 }
  0x6c   :  { %1185 = vmatpush1.bf16.msra.mxu0 %v1722_v53  ;;  %1080 = vmatprep.subr.bf16.mxu1 %v1727_v54 }
  0x6d   :  { %1186 = vmatprep.subr.bf16.mxu0 %v1730_v55 }
  0x6f   :  { %1081 = vmatpush1.bf16.msra.mxu1 %v1725_v56 }
  0x70   :  { %1187 = vmatpush1.bf16.msra.mxu0 %v1728_v57  ;;  %1082 = vmatprep.subr.bf16.mxu1 %v1733_v58 }
  0x71   :  { %1188 = vmatprep.subr.bf16.mxu0 %v1736_v59 }
  0x73   :  { %1083 = vmatpush1.bf16.msra.mxu1 %v1731_v60 }
  0x74   :  { %1189 = vmatpush1.bf16.msra.mxu0 %v1734_v61  ;;  %1084 = vmatprep.subr.bf16.mxu1 %v1739_v62 }
  0x75   :  { %1190 = vmatprep.subr.bf16.mxu0 %v1742_v63 }
  0x77   :  { %1085 = vmatpush1.bf16.msra.mxu1 %v1737_v0 }
  0x78   :  { %1191 = vmatpush1.bf16.msra.mxu0 %v1740_v1  ;;  %1086 = vmatprep.subr.bf16.mxu1 %v1750_v2 }
  0x79   :  { %1192 = vmatprep.subr.bf16.mxu0 %v1754_v3 }
  0x7b   :  { %1087 = vmatpush1.bf16.msra.mxu1 %v1748_v4 }
  0x7c   :  { %1193 = vmatpush1.bf16.msra.mxu0 %v1752_v5  ;;  %1088 = vmatprep.subr.bf16.mxu1 %v1757_v6 }
  0x7d   :  { %1194 = vmatprep.subr.bf16.mxu0 %v1760_v7 }
  0x7f   :  { %1089 = vmatpush1.bf16.msra.mxu1 %v1755_v8 }
  0x80   :  { %1195 = vmatpush1.bf16.msra.mxu0 %v1758_v9  ;;  %1500 = vmatprep.subr.bf16.mxu1 %v1769_v10 }
  0x81   :  { %1217 = vmatprep.subr.bf16.mxu0 %v1769_v10 }
  0x82   :  { %1091 = vmatmul.mubr.bf16.vlgmr.msra.gmra.mrb[0].mxu1 %v1761_v11 }
  0x83   :  { %1197 = vmatmul.mubr.bf16.vlgmr.msra.gmra.mrb[0].mxu0 %v1764_v12  ;;  %1508 = vmatpush1.bf16.msra.mxu1 %v1767_v13 }
  0x84   :  { %1218 = vmatpush1.bf16.msra.mxu0 %v1767_v13  ;;  %1501 = vmatprep.subr.bf16.mxu1 %v1772_v14 }
  0x85   :  { %1219 = vmatprep.subr.bf16.mxu0 %v1772_v14  ;;  %1100 = vmatprep.mubr.bf16.mxu1 %v1773_v15 }
  0x86   :  { %1206 = vmatprep.mubr.bf16.mxu0 %v1775_v16 }
  0x87   :  { %1509 = vmatpush1.bf16.msra.mxu1 %v1770_v17 }
  0x88   :  { %1220 = vmatpush1.bf16.msra.mxu0 %v1770_v17  ;;  %1502 = vmatprep.subr.bf16.mxu1 %v1781_v18 }
  0x89   :  { %1221 = vmatprep.subr.bf16.mxu0 %v1781_v18 }
  0x8a   :  { %1101 = vmatmul.mubr.bf16.gmra.mrb[4].mxu1 %v1777_v19 }
  0x8b   :  { %1207 = vmatmul.mubr.bf16.gmra.mrb[4].mxu0 %v1778_v20  ;;  %1510 = vmatpush1.bf16.msra.mxu1 %v1779_v21 }
  0x8c   :  { %1222 = vmatpush1.bf16.msra.mxu0 %v1779_v21  ;;  %1503 = vmatprep.subr.bf16.mxu1 %v1784_v22 }
  0x8d   :  { %1223 = vmatprep.subr.bf16.mxu0 %v1784_v22  ;;  %1249 = vmatprep.mubr.bf16.mxu0 %v1799_v25 }
  0x8e   :  { %1259 = vmatprep.mubr.bf16.mxu1 %v1799_v25 }
  0x8f   :  { %1511 = vmatpush1.bf16.msra.mxu1 %v1782_v23 }
  0x90   :  { %1224 = vmatpush1.bf16.msra.mxu0 %v1782_v23  ;;  %1504 = vmatprep.subr.bf16.mxu1 %v1787_v24 }
  0x91   :  { %1225 = vmatprep.subr.bf16.mxu0 %v1787_v24 }
  0x93   :  { %1512 = vmatpush1.bf16.msra.mxu1 %v1785_v26 }
  0x94   :  { %1226 = vmatpush1.bf16.msra.mxu0 %v1785_v26  ;;  %1505 = vmatprep.subr.bf16.mxu1 %v1790_v27 }
  0x95   :  { %1227 = vmatprep.subr.bf16.mxu0 %v1790_v27 }
  0x97   :  { %1513 = vmatpush1.bf16.msra.mxu1 %v1788_v28 }
  0x98   :  { %1228 = vmatpush1.bf16.msra.mxu0 %v1788_v28  ;;  %1506 = vmatprep.subr.bf16.mxu1 %v1793_v29 }
  0x99   :  { %1229 = vmatprep.subr.bf16.mxu0 %v1793_v29 }
  0x9b   :  { %1514 = vmatpush1.bf16.msra.mxu1 %v1791_v30 }
  0x9c   :  { %1230 = vmatpush1.bf16.msra.mxu0 %v1791_v30  ;;  %1507 = vmatprep.subr.bf16.mxu1 %v1796_v31 }
  0x9d   :  { %1231 = vmatprep.subr.bf16.mxu0 %v1796_v31 }
  0x9f   :  { %1515 = vmatpush1.bf16.msra.mxu1 %v1794_v32 }
  0xa0   :  { %1232 = vmatpush1.bf16.msra.mxu0 %v1794_v32 }
  0xa2   :  { %1260 = vmatmul.mubr.bf16.vlgmr.msra.gmra.mrb[8].mxu1 %v1798_v34 }
  0xa3   :  { %1250 = vmatmul.mubr.bf16.vlgmr.msra.gmra.mrb[0].mxu0 %v1797_v33 }
 0x155   :  { %v1092_v37 = vpop.f32.mrb[0].mxu1 }
 0x156   :  { %v1094_v38 = vpop.f32.mrb[1].mxu1  ;;  %v1516_v62 = vadd.f32 %v1092_v37, %v186_v44 }
 0x157   :  { %v1096_v39 = vpop.f32.mrb[2].mxu1  ;;  %v1518_v63 = vadd.f32 %v1094_v38, %v190_v45 }
 0x158   :  { %v1098_v41 = vpop.f32.mrb[3].mxu1  ;;  %v1520_v2 = vadd.f32 %v1096_v39, %v186_v44 }
 0x159   :  { %v1522_v7 = vadd.f32 %v1098_v41, %v190_v45 }
 0x15d   :  { %v1102_v46 = vpop.f32.mrb[4].mxu1 }
 0x15e   :  { %v1208_v47 = vpop.f32.mrb[4].mxu0  ;;  %v1524_v48 = vadd.f32 %v1102_v46, %v186_v44  ;;  %v1104_v49 = vpop.f32.mrb[5].mxu1 }
 0x15f   :  { %v1210_v50 = vpop.f32.mrb[5].mxu0  ;;  %v1527_v51 = vadd.f32 %v1104_v49, %v190_v45  ;;  %v1106_v52 = vpop.f32.mrb[6].mxu1 }
 0x160   :  { %v1212_v53 = vpop.f32.mrb[6].mxu0  ;;  %v1525_v54 = vadd.f32 %v1524_v48, %v1208_v47  ;;  %v1530_v55 = vadd.f32 %v1106_v52, %v186_v44  ;;  %v1108_v56 = vpop.f32.mrb[7].mxu1 }
 0x161   :  { %v1214_v57 = vpop.f32.mrb[7].mxu0  ;;  %v1528_v58 = vadd.f32 %v1527_v51, %v1210_v50  ;;  %v1533_v59 = vadd.f32 %v1108_v56, %v190_v45 }
 0x162   :  { %v1531_v60 = vadd.f32 %v1530_v55, %v1212_v53 }
 0x163   :  { %v1534_v61 = vadd.f32 %v1533_v59, %v1214_v57 }
 0x175   :  { %v1261_v1 = vpop.f32.mrb[8].mxu1 }
 0x176   :  { %v1251_v0 = vpop.f32.mrb[0].mxu0  ;;  %v1526_v4 = vadd.f32 %v1525_v54, %v1261_v1  ;;  %v1263_v6 = vpop.f32.mrb[9].mxu1 }
 0x177   :  { %v1517_v3 = vadd.f32 %v1516_v62, %v1251_v0  ;;  %v1253_v5 = vpop.f32.mrb[1].mxu0  ;;  %v1529_v9 = vadd.f32 %v1528_v58, %v1263_v6  ;;  %v1265_v11 = vpop.f32.mrb[10].mxu1 }
 0x178   :  { %v1519_v8 = vadd.f32 %v1518_v63, %v1253_v5  ;;  %v1255_v10 = vpop.f32.mrb[2].mxu0  ;;  %1274 = vst [vmem:[%s2347_s3 + $0x20] sm:$0xff] %v1526_v4  ;;  %v1532_v13 = vadd.f32 %v1531_v60, %v1265_v11  ;;  %v1267_v15 = vpop.f32.mrb[11].mxu1  ;;  %v1300_v24 = vmul.f32 %v1526_v4, %v1526_v4 }
 0x179   :  { %1270 = vst [vmem:[%s2347_s3] sm:$0xff] %v1517_v3  ;;  %v1521_v12 = vadd.f32 %v1520_v2, %v1255_v10  ;;  %v1257_v14 = vpop.f32.mrb[3].mxu0  ;;  %1275 = vst [vmem:[%s2347_s3 + $0x28] sm:$0xff] %v1529_v9  ;;  %v1535_v17 = vadd.f32 %v1534_v61, %v1267_v15  ;;  %v1296_v18 = vmul.f32 %v1517_v3, %v1517_v3 }
 0x17a   :  { %1271 = vst [vmem:[%s2347_s3 + $0x8] sm:$0xff] %v1519_v8  ;;  %v1523_v16 = vadd.f32 %v1522_v7, %v1257_v14  ;;  %1276 = vst [vmem:[%s2347_s3 + $0x30] sm:$0xff] %v1532_v13  ;;  %v1297_v21 = vmul.f32 %v1519_v8, %v1519_v8  ;;  %v1301_v27 = vmul.f32 %v1529_v9, %v1529_v9 }
 0x17b   :  { %1272 = vst [vmem:[%s2347_s3 + $0x10] sm:$0xff] %v1521_v12  ;;  %v1278_v19 = vadd.f32 %v1521_v12, %v1517_v3  ;;  %v1298_v20 = vmul.f32 %v1521_v12, %v1521_v12  ;;  %1277 = vst [vmem:[%s2347_s3 + $0x38] sm:$0xff] %v1535_v17  ;;  %v1302_v31 = vmul.f32 %v1532_v13, %v1532_v13 }
 0x17c   :  { %1273 = vst [vmem:[%s2347_s3 + $0x18] sm:$0xff] %v1523_v16  ;;  %v1287_v22 = vadd.f32 %v1523_v16, %v1519_v8  ;;  %v1299_v23 = vmul.f32 %v1523_v16, %v1523_v16  ;;  %v1303_v34 = vmul.f32 %v1535_v17, %v1535_v17 }
 0x17d   :  { %v1304_v25 = vadd.f32 %v1298_v20, %v1296_v18  ;;  %v1279_v26 = vadd.f32 %v1526_v4, %v1278_v19 }
 0x17e   :  { %v1313_v28 = vadd.f32 %v1299_v23, %v1297_v21  ;;  %v1288_v29 = vadd.f32 %v1529_v9, %v1287_v22 }
 0x17f   :  { %v1280_v30 = vadd.f32 %v1532_v13, %v1279_v26  ;;  %v1305_v32 = vadd.f32 %v1304_v25, %v1300_v24 }
 0x180   :  { %v1289_v33 = vadd.f32 %v1535_v17, %v1288_v29  ;;  %v1314_v35 = vadd.f32 %v1313_v28, %v1301_v27 }
 0x181   :  { %v1281_v36 = vrot.slane %v1280_v30, 4  ;;  %v1306_v37 = vadd.f32 %v1305_v32, %v1302_v31 }
 0x182   :  { %v1290_v38 = vrot.slane %v1289_v33, 4  ;;  %v1315_v39 = vadd.f32 %v1314_v35, %v1303_v34 }
 0x183   :  { %v1282_v40 = vadd.f32 %v1281_v36, %v1280_v30  ;;  %v1307_v41 = vrot.slane %v1306_v37, 4 }
 0x184   :  { %v1291_v42 = vadd.f32 %v1290_v38, %v1289_v33  ;;  %v1316_v43 = vrot.slane %v1315_v39, 4 }
 0x185   :  { %v1283_v44 = vrot.slane %v1282_v40, 2  ;;  %v1308_v45 = vadd.f32 %v1307_v41, %v1306_v37 }
 0x186   :  { %v1292_v46 = vrot.slane %v1291_v42, 2  ;;  %v1317_v47 = vadd.f32 %v1316_v43, %v1315_v39 }
 0x187   :  { %v1284_v48 = vadd.f32 %v1283_v44, %v1282_v40  ;;  %v1309_v49 = vrot.slane %v1308_v45, 2 }
 0x188   :  { %v1293_v50 = vadd.f32 %v1292_v46, %v1291_v42  ;;  %v1318_v51 = vrot.slane %v1317_v47, 2 }
 0x189   :  { %v1285_v52 = vrot.slane %v1284_v48, 1  ;;  %v1310_v53 = vadd.f32 %v1309_v49, %v1308_v45 }
 0x18a   :  { %v1294_v54 = vrot.slane %v1293_v50, 1  ;;  %v1319_v55 = vadd.f32 %v1318_v51, %v1317_v47 }
 0x18b   :  { %v1311_v56 = vrot.slane %v1310_v53, 1  ;;  %v1286_v58 = vadd.f32 %v1285_v52, %v1284_v48 }
 0x18c   :  { %v1320_v57 = vrot.slane %v1319_v55, 1  ;;  %v1295_v60 = vadd.f32 %v1294_v54, %v1293_v50 }
 0x18d   :  { %v1312_v59 = vadd.f32 %v1311_v56, %v1310_v53 }
 0x18e   :  { %v1321_v61 = vadd.f32 %v1320_v57, %v1319_v55 }
 0x18f   :  { %v1323_v62 = vsel %vm1322_vm0, %v1286_v58, %v1312_v59 }
 0x190   :  { %v1326_v63 = vsel %vm1325_vm1, %v1323_v62, 0.0  ;;  %v1324_v0 = vsel %vm1322_vm0, %v1295_v60, %v1321_v61 }
 0x191   :  { %1328 = vst [vmem:[%s2348_s4] sm:$0xff] %v1326_v63  ;;  %v1327_v1 = vsel %vm1325_vm1, %v1324_v0, 0.0 }
 0x192   :  { %1329 = vst [vmem:[%s2348_s4 + $0x8] sm:$0xff] %v1327_v1 }

// kernel: celebrity_convnet_forward.21
= control target key start
LH: loop header
LB: loop body
LE: loop exit
PB: predicated region body
PF: predicated region fallthrough
CT: control target
= control target key end

     0   :  { %s4421_s1 = inlined_call_operand.vmem [shape: f32[4096,128], index: 1, kind: input, shape index: {}]   ;;  %s4422_s0 = inlined_call_operand.vmem [shape: f32[8,4096], index: 0, kind: input, shape index: {}]   ;;  %s4423_s2 = inlined_call_operand.vmem [shape: f32[1,128], index: 2, kind: input, shape index: {}]   ;;  %s4424_s3 = inlined_call_operand.vmem [shape: f32[8,128], index: 3, kind: output, shape index: {}]  }
   0x1   :  { %v62_v0 = vld [vmem:[%s4421_s1 + $0x80] sm:$0xff]  ;;  %v63_v1 = vld [vmem:[%s4421_s1 + $0x88] sm:$0xff]  ;;  %v64_v11 = vld [vmem:[%s4421_s1 + $0x90] sm:$0xff] }
   0x2   :  { %v46_v2 = vld [vmem:[%s4421_s1] sm:$0xff]  ;;  %v2251_v3 = vpack.c.bf16 %v63_v1, %v62_v0  ;;  %v47_v4 = vld [vmem:[%s4421_s1 + $0x8] sm:$0xff]  ;;  %v65_v13 = vld [vmem:[%s4421_s1 + $0x98] sm:$0xff] }
   0x3   :  { %v94_v5 = vld [vmem:[%s4421_s1 + $0x180] sm:$0xff]  ;;  %v95_v6 = vld [vmem:[%s4421_s1 + $0x188] sm:$0xff]  ;;  %v2253_v7 = vpack.c.bf16 %v47_v4, %v46_v2  ;;  %v48_v14 = vld [vmem:[%s4421_s1 + $0x10] sm:$0xff]  ;;  %v2255_v16 = vpack.c.bf16 %v65_v13, %v64_v11 }
   0x4   :  { %v2283_v8 = vpack.c.bf16 %v95_v6, %v94_v5  ;;  %v78_v9 = vld [vmem:[%s4421_s1 + $0x100] sm:$0xff]  ;;  %v79_v10 = vld [vmem:[%s4421_s1 + $0x108] sm:$0xff]  ;;  %2252 = vmatprep.subr.bf16.mxu0 %v2251_v3  ;;  %v49_v15 = vld [vmem:[%s4421_s1 + $0x18] sm:$0xff] }
   0x5   :  { %v2285_v12 = vpack.c.bf16 %v79_v10, %v78_v9  ;;  %2254 = vmatpush3.bf16.msra.mxu0 %v2253_v7  ;;  %v2257_v17 = vpack.c.bf16 %v49_v15, %v48_v14  ;;  %v96_v18 = vld [vmem:[%s4421_s1 + $0x190] sm:$0xff]  ;;  %v97_v19 = vld [vmem:[%s4421_s1 + $0x198] sm:$0xff]  ;;  %v66_v23 = vld [vmem:[%s4421_s1 + $0xa0] sm:$0xff] }
   0x6   :  { %2284 = vmatprep.subr.bf16.mxu1 %v2283_v8  ;;  %v80_v20 = vld [vmem:[%s4421_s1 + $0x110] sm:$0xff]  ;;  %v2287_v21 = vpack.c.bf16 %v97_v19, %v96_v18  ;;  %v81_v22 = vld [vmem:[%s4421_s1 + $0x118] sm:$0xff]  ;;  %v67_v24 = vld [vmem:[%s4421_s1 + $0xa8] sm:$0xff]  ;;  %2256 = vmatprep.subr.bf16.mxu0 %v2255_v16 }
   0x7   :  { %2286 = vmatpush3.bf16.msra.mxu1 %v2285_v12  ;;  %v2289_v25 = vpack.c.bf16 %v81_v22, %v80_v20  ;;  %v2259_v26 = vpack.c.bf16 %v67_v24, %v66_v23  ;;  %v50_v27 = vld [vmem:[%s4421_s1 + $0x20] sm:$0xff]  ;;  %v51_v28 = vld [vmem:[%s4421_s1 + $0x28] sm:$0xff]  ;;  %v68_v35 = vld [vmem:[%s4421_s1 + $0xb0] sm:$0xff] }
   0x8   :  { %v98_v29 = vld [vmem:[%s4421_s1 + $0x1a0] sm:$0xff]  ;;  %2288 = vmatprep.subr.bf16.mxu1 %v2287_v21  ;;  %v99_v30 = vld [vmem:[%s4421_s1 + $0x1a8] sm:$0xff]  ;;  %v2261_v33 = vpack.c.bf16 %v51_v28, %v50_v27  ;;  %v69_v36 = vld [vmem:[%s4421_s1 + $0xb8] sm:$0xff] }
   0x9   :  { %v82_v31 = vld [vmem:[%s4421_s1 + $0x120] sm:$0xff]  ;;  %v83_v32 = vld [vmem:[%s4421_s1 + $0x128] sm:$0xff]  ;;  %2258 = vmatpush3.bf16.msra.mxu0 %v2257_v17  ;;  %v2291_v34 = vpack.c.bf16 %v99_v30, %v98_v29  ;;  %v52_v37 = vld [vmem:[%s4421_s1 + $0x30] sm:$0xff]  ;;  %v2263_v39 = vpack.c.bf16 %v69_v36, %v68_v35 }
   0xa   :  { %2260 = vmatprep.subr.bf16.mxu0 %v2259_v26  ;;  %v2293_v38 = vpack.c.bf16 %v83_v32, %v82_v31  ;;  %v53_v40 = vld [vmem:[%s4421_s1 + $0x38] sm:$0xff]  ;;  %v100_v41 = vld [vmem:[%s4421_s1 + $0x1b0] sm:$0xff]  ;;  %v70_v46 = vld [vmem:[%s4421_s1 + $0xc0] sm:$0xff] }
   0xb   :  { %2290 = vmatpush3.bf16.msra.mxu1 %v2289_v25  ;;  %v101_v42 = vld [vmem:[%s4421_s1 + $0x1b8] sm:$0xff]  ;;  %v84_v44 = vld [vmem:[%s4421_s1 + $0x130] sm:$0xff]  ;;  %v71_v47 = vld [vmem:[%s4421_s1 + $0xc8] sm:$0xff]  ;;  %v2265_v48 = vpack.c.bf16 %v53_v40, %v52_v37 }
   0xc   :  { %2292 = vmatprep.subr.bf16.mxu1 %v2291_v34  ;;  %v2295_v43 = vpack.c.bf16 %v101_v42, %v100_v41  ;;  %v85_v45 = vld [vmem:[%s4421_s1 + $0x138] sm:$0xff]  ;;  %v102_v49 = vld [vmem:[%s4421_s1 + $0x1c0] sm:$0xff]  ;;  %v103_v50 = vld [vmem:[%s4421_s1 + $0x1c8] sm:$0xff]  ;;  %v2267_v52 = vpack.c.bf16 %v71_v47, %v70_v46 }
   0xd   :  { %2262 = vmatpush3.bf16.msra.mxu0 %v2261_v33  ;;  %v2297_v51 = vpack.c.bf16 %v85_v45, %v84_v44  ;;  %v54_v53 = vld [vmem:[%s4421_s1 + $0x40] sm:$0xff]  ;;  %v55_v54 = vld [vmem:[%s4421_s1 + $0x48] sm:$0xff]  ;;  %v2299_v56 = vpack.c.bf16 %v103_v50, %v102_v49  ;;  %v72_v58 = vld [vmem:[%s4421_s1 + $0xd0] sm:$0xff] }
   0xe   :  { %2264 = vmatprep.subr.bf16.mxu0 %v2263_v39  ;;  %v86_v55 = vld [vmem:[%s4421_s1 + $0x140] sm:$0xff]  ;;  %v87_v57 = vld [vmem:[%s4421_s1 + $0x148] sm:$0xff]  ;;  %v73_v59 = vld [vmem:[%s4421_s1 + $0xd8] sm:$0xff]  ;;  %v2269_v62 = vpack.c.bf16 %v55_v54, %v54_v53 }
   0xf   :  { %2294 = vmatpush3.bf16.msra.mxu1 %v2293_v38  ;;  %v104_v60 = vld [vmem:[%s4421_s1 + $0x1d0] sm:$0xff]  ;;  %v105_v61 = vld [vmem:[%s4421_s1 + $0x1d8] sm:$0xff]  ;;  %v2301_v63 = vpack.c.bf16 %v87_v57, %v86_v55  ;;  %v2271_v0 = vpack.c.bf16 %v73_v59, %v72_v58  ;;  %v74_v6 = vld [vmem:[%s4421_s1 + $0xe0] sm:$0xff] }
  0x10   :  { %2296 = vmatprep.subr.bf16.mxu1 %v2295_v43  ;;  %v56_v1 = vld [vmem:[%s4421_s1 + $0x50] sm:$0xff]  ;;  %v57_v2 = vld [vmem:[%s4421_s1 + $0x58] sm:$0xff]  ;;  %v2303_v4 = vpack.c.bf16 %v105_v61, %v104_v60  ;;  %v75_v7 = vld [vmem:[%s4421_s1 + $0xe8] sm:$0xff] }
  0x11   :  { %2266 = vmatpush3.bf16.msra.mxu0 %v2265_v48  ;;  %v88_v3 = vld [vmem:[%s4421_s1 + $0x150] sm:$0xff]  ;;  %v89_v5 = vld [vmem:[%s4421_s1 + $0x158] sm:$0xff]  ;;  %v106_v8 = vld [vmem:[%s4421_s1 + $0x1e0] sm:$0xff]  ;;  %v2273_v10 = vpack.c.bf16 %v57_v2, %v56_v1  ;;  %v2275_v14 = vpack.c.bf16 %v75_v7, %v74_v6 }
  0x12   :  { %2268 = vmatprep.subr.bf16.mxu0 %v2267_v52  ;;  %v107_v9 = vld [vmem:[%s4421_s1 + $0x1e8] sm:$0xff]  ;;  %v58_v11 = vld [vmem:[%s4421_s1 + $0x60] sm:$0xff]  ;;  %v2305_v13 = vpack.c.bf16 %v89_v5, %v88_v3  ;;  %v76_v19 = vld [vmem:[%s4421_s1 + $0xf0] sm:$0xff] }
  0x13   :  { %2298 = vmatpush3.bf16.msra.mxu1 %v2297_v51  ;;  %v59_v12 = vld [vmem:[%s4421_s1 + $0x68] sm:$0xff]  ;;  %v90_v15 = vld [vmem:[%s4421_s1 + $0x160] sm:$0xff]  ;;  %v2307_v18 = vpack.c.bf16 %v107_v9, %v106_v8  ;;  %v77_v20 = vld [vmem:[%s4421_s1 + $0xf8] sm:$0xff] }
  0x14   :  { %2300 = vmatprep.subr.bf16.mxu1 %v2299_v56  ;;  %v91_v16 = vld [vmem:[%s4421_s1 + $0x168] sm:$0xff]  ;;  %v17_v21 = vld [vmem:[%s4422_s0 + $0x18] sm:$0xff]  ;;  %v108_v22 = vld [vmem:[%s4421_s1 + $0x1f0] sm:$0xff]  ;;  %v2277_v24 = vpack.c.bf16 %v59_v12, %v58_v11  ;;  %v2279_v26 = vpack.c.bf16 %v77_v20, %v76_v19 }
  0x15   :  { %2270 = vmatpush3.bf16.msra.mxu0 %v2269_v62  ;;  %v15_v17 = vld [vmem:[%s4422_s0 + $0x8] sm:$0xff]  ;;  %v109_v23 = vld [vmem:[%s4421_s1 + $0x1f8] sm:$0xff]  ;;  %699 = vmatprep.mubr.f32.mxu1 %v17_v21  ;;  %v2309_v25 = vpack.c.bf16 %v91_v16, %v90_v15  ;;  %v60_v27 = vld [vmem:[%s4421_s1 + $0x70] sm:$0xff] }
  0x16   :  { %2272 = vmatprep.subr.bf16.mxu0 %v2271_v0  ;;  %629 = vmatprep.mubr.f32.mxu0 %v15_v17  ;;  %v61_v28 = vld [vmem:[%s4421_s1 + $0x78] sm:$0xff]  ;;  %v92_v29 = vld [vmem:[%s4421_s1 + $0x170] sm:$0xff]  ;;  %v2311_v30 = vpack.c.bf16 %v109_v23, %v108_v22  ;;  %v126_v32 = vld [vmem:[%s4421_s1 + $0x280] sm:$0xff] }
  0x17   :  { %2302 = vmatpush3.bf16.msra.mxu1 %v2301_v63  ;;  %v93_v31 = vld [vmem:[%s4421_s1 + $0x178] sm:$0xff]  ;;  %v127_v33 = vld [vmem:[%s4421_s1 + $0x288] sm:$0xff]  ;;  %v158_v34 = vld [vmem:[%s4421_s1 + $0x380] sm:$0xff]  ;;  %v2281_v36 = vpack.c.bf16 %v61_v28, %v60_v27 }
  0x18   :  { %2304 = vmatprep.subr.bf16.mxu1 %v2303_v4  ;;  %v159_v35 = vld [vmem:[%s4421_s1 + $0x388] sm:$0xff]  ;;  %v2313_v37 = vpack.c.bf16 %v93_v31, %v92_v29  ;;  %v2315_v38 = vpack.c.bf16 %v127_v33, %v126_v32  ;;  %v110_v39 = vld [vmem:[%s4421_s1 + $0x200] sm:$0xff]  ;;  %v128_v44 = vld [vmem:[%s4421_s1 + $0x290] sm:$0xff] }
  0x19   :  { %2274 = vmatpush3.bf16.msra.mxu0 %v2273_v10  ;;  %v111_v40 = vld [vmem:[%s4421_s1 + $0x208] sm:$0xff]  ;;  %v142_v41 = vld [vmem:[%s4421_s1 + $0x300] sm:$0xff]  ;;  %v2347_v42 = vpack.c.bf16 %v159_v35, %v158_v34  ;;  %v129_v45 = vld [vmem:[%s4421_s1 + $0x298] sm:$0xff] }
  0x1a   :  { %2276 = vmatprep.subr.bf16.mxu0 %v2275_v14  ;;  %v143_v43 = vld [vmem:[%s4421_s1 + $0x308] sm:$0xff]  ;;  %v160_v46 = vld [vmem:[%s4421_s1 + $0x390] sm:$0xff]  ;;  %v161_v47 = vld [vmem:[%s4421_s1 + $0x398] sm:$0xff]  ;;  %v2317_v49 = vpack.c.bf16 %v111_v40, %v110_v39  ;;  %v2319_v52 = vpack.c.bf16 %v129_v45, %v128_v44 }
  0x1b   :  { %2306 = vmatpush3.bf16.msra.mxu1 %v2305_v13  ;;  %v14_v48 = vld [vmem:[%s4422_s0] sm:$0xff]  ;;  %v16_v50 = vld [vmem:[%s4422_s0 + $0x10] sm:$0xff]  ;;  %v2349_v51 = vpack.c.bf16 %v143_v43, %v142_v41  ;;  %v113_v54 = vld [vmem:[%s4421_s1 + $0x218] sm:$0xff]  ;;  %v2351_v56 = vpack.c.bf16 %v161_v47, %v160_v46 }
  0x1c   :  { %2308 = vmatprep.subr.bf16.mxu1 %v2307_v18  ;;  %v112_v53 = vld [vmem:[%s4421_s1 + $0x210] sm:$0xff]  ;;  %v145_v57 = vld [vmem:[%s4421_s1 + $0x318] sm:$0xff]  ;;  %v130_v58 = vld [vmem:[%s4421_s1 + $0x2a0] sm:$0xff] }
  0x1d   :  { %2278 = vmatpush3.bf16.msra.mxu0 %v2277_v24  ;;  %v144_v55 = vld [vmem:[%s4421_s1 + $0x310] sm:$0xff]  ;;  %v131_v59 = vld [vmem:[%s4421_s1 + $0x2a8] sm:$0xff]  ;;  %v162_v60 = vld [vmem:[%s4421_s1 + $0x3a0] sm:$0xff]  ;;  %v2321_v62 = vpack.c.bf16 %v113_v54, %v112_v53 }
  0x1e   :  { %2280 = vmatprep.subr.bf16.mxu0 %v2279_v26  ;;  %v163_v61 = vld [vmem:[%s4421_s1 + $0x3a8] sm:$0xff]  ;;  %v2353_v63 = vpack.c.bf16 %v145_v57, %v144_v55  ;;  %v2323_v0 = vpack.c.bf16 %v131_v59, %v130_v58  ;;  %v114_v1 = vld [vmem:[%s4421_s1 + $0x220] sm:$0xff]  ;;  %v132_v6 = vld [vmem:[%s4421_s1 + $0x2b0] sm:$0xff] }
  0x1f   :  { %2310 = vmatpush3.bf16.msra.mxu1 %v2309_v25  ;;  %v115_v2 = vld [vmem:[%s4421_s1 + $0x228] sm:$0xff]  ;;  %v146_v3 = vld [vmem:[%s4421_s1 + $0x320] sm:$0xff]  ;;  %v2355_v4 = vpack.c.bf16 %v163_v61, %v162_v60  ;;  %v133_v7 = vld [vmem:[%s4421_s1 + $0x2b8] sm:$0xff] }
  0x20   :  { %2312 = vmatprep.subr.bf16.mxu1 %v2311_v30  ;;  %v147_v5 = vld [vmem:[%s4421_s1 + $0x328] sm:$0xff]  ;;  %v164_v8 = vld [vmem:[%s4421_s1 + $0x3b0] sm:$0xff]  ;;  %v165_v9 = vld [vmem:[%s4421_s1 + $0x3b8] sm:$0xff]  ;;  %v2325_v10 = vpack.c.bf16 %v115_v2, %v114_v1  ;;  %v2327_v12 = vpack.c.bf16 %v133_v7, %v132_v6 }
  0x21   :  { %2282 = vmatpush3.bf16.msra.mxu0 %v2281_v36  ;;  %v2357_v11 = vpack.c.bf16 %v147_v5, %v146_v3  ;;  %v116_v13 = vld [vmem:[%s4421_s1 + $0x230] sm:$0xff]  ;;  %v117_v14 = vld [vmem:[%s4421_s1 + $0x238] sm:$0xff]  ;;  %v2359_v16 = vpack.c.bf16 %v165_v9, %v164_v8  ;;  %v134_v18 = vld [vmem:[%s4421_s1 + $0x2c0] sm:$0xff] }
  0x22   :  { %2316 = vmatprep.subr.bf16.mxu0 %v2315_v38  ;;  %v148_v15 = vld [vmem:[%s4421_s1 + $0x330] sm:$0xff]  ;;  %v149_v17 = vld [vmem:[%s4421_s1 + $0x338] sm:$0xff]  ;;  %v135_v19 = vld [vmem:[%s4421_s1 + $0x2c8] sm:$0xff]  ;;  %v2329_v22 = vpack.c.bf16 %v117_v14, %v116_v13 }
  0x23   :  { %2314 = vmatpush3.bf16.msra.mxu1 %v2313_v37  ;;  %v166_v20 = vld [vmem:[%s4421_s1 + $0x3c0] sm:$0xff]  ;;  %v167_v21 = vld [vmem:[%s4421_s1 + $0x3c8] sm:$0xff]  ;;  %v2361_v25 = vpack.c.bf16 %v149_v17, %v148_v15  ;;  %v2331_v26 = vpack.c.bf16 %v135_v19, %v134_v18  ;;  %v21_v29 = vld [vmem:[%s4422_s0 + $0x38] sm:$0xff] }
  0x24   :  { %2348 = vmatprep.subr.bf16.mxu1 %v2347_v42  ;;  %630 = vmatmul.mubr.f32.vlgmr.msra.gmra.mrb[0].mxu0 %v14_v48  ;;  %v118_v23 = vld [vmem:[%s4421_s1 + $0x240] sm:$0xff]  ;;  %v19_v24 = vld [vmem:[%s4422_s0 + $0x28] sm:$0xff]  ;;  %v2363_v30 = vpack.c.bf16 %v167_v21, %v166_v20  ;;  %v136_v32 = vld [vmem:[%s4421_s1 + $0x2d0] sm:$0xff] }
  0x25   :  { %2318 = vmatpush3.bf16.msra.mxu0 %v2317_v49  ;;  %v119_v27 = vld [vmem:[%s4421_s1 + $0x248] sm:$0xff]  ;;  %v150_v28 = vld [vmem:[%s4421_s1 + $0x340] sm:$0xff]  ;;  %v137_v33 = vld [vmem:[%s4421_s1 + $0x2d8] sm:$0xff]  ;;  %769 = vmatprep.mubr.f32.mxu0 %v19_v24 }
  0x26   :  { %700 = vmatmul.mubr.f32.vlgmr.msra.gmra.mrb[0].mxu1 %v16_v50  ;;  %2320 = vmatprep.subr.bf16.mxu0 %v2319_v52  ;;  %v151_v31 = vld [vmem:[%s4421_s1 + $0x348] sm:$0xff]  ;;  %v168_v34 = vld [vmem:[%s4421_s1 + $0x3d0] sm:$0xff]  ;;  %v169_v35 = vld [vmem:[%s4421_s1 + $0x3d8] sm:$0xff]  ;;  %v2333_v36 = vpack.c.bf16 %v119_v27, %v118_v23  ;;  %v2335_v38 = vpack.c.bf16 %v137_v33, %v136_v32 }
  0x27   :  { %2350 = vmatpush3.bf16.msra.mxu1 %v2349_v51  ;;  %839 = vmatprep.mubr.f32.mxu1 %v21_v29  ;;  %v2365_v37 = vpack.c.bf16 %v151_v31, %v150_v28  ;;  %v120_v39 = vld [vmem:[%s4421_s1 + $0x250] sm:$0xff]  ;;  %v121_v40 = vld [vmem:[%s4421_s1 + $0x258] sm:$0xff]  ;;  %v2367_v42 = vpack.c.bf16 %v169_v35, %v168_v34  ;;  %v138_v44 = vld [vmem:[%s4421_s1 + $0x2e0] sm:$0xff] }
  0x28   :  { %2352 = vmatprep.subr.bf16.mxu1 %v2351_v56  ;;  %v152_v41 = vld [vmem:[%s4421_s1 + $0x350] sm:$0xff]  ;;  %v153_v43 = vld [vmem:[%s4421_s1 + $0x358] sm:$0xff]  ;;  %v139_v45 = vld [vmem:[%s4421_s1 + $0x2e8] sm:$0xff]  ;;  %v2337_v48 = vpack.c.bf16 %v121_v40, %v120_v39 }
  0x29   :  { %2322 = vmatpush3.bf16.msra.mxu0 %v2321_v62  ;;  %v170_v46 = vld [vmem:[%s4421_s1 + $0x3e0] sm:$0xff]  ;;  %v171_v47 = vld [vmem:[%s4421_s1 + $0x3e8] sm:$0xff]  ;;  %v2369_v49 = vpack.c.bf16 %v153_v43, %v152_v41  ;;  %v2339_v50 = vpack.c.bf16 %v139_v45, %v138_v44  ;;  %v140_v56 = vld [vmem:[%s4421_s1 + $0x2f0] sm:$0xff] }
  0x2a   :  { %2324 = vmatprep.subr.bf16.mxu0 %v2323_v0  ;;  %v122_v51 = vld [vmem:[%s4421_s1 + $0x260] sm:$0xff]  ;;  %v123_v52 = vld [vmem:[%s4421_s1 + $0x268] sm:$0xff]  ;;  %v2371_v54 = vpack.c.bf16 %v171_v47, %v170_v46  ;;  %v141_v57 = vld [vmem:[%s4421_s1 + $0x2f8] sm:$0xff] }
  0x2b   :  { %2354 = vmatpush3.bf16.msra.mxu1 %v2353_v63  ;;  %v154_v53 = vld [vmem:[%s4421_s1 + $0x360] sm:$0xff]  ;;  %v155_v55 = vld [vmem:[%s4421_s1 + $0x368] sm:$0xff]  ;;  %v172_v58 = vld [vmem:[%s4421_s1 + $0x3f0] sm:$0xff]  ;;  %v2341_v60 = vpack.c.bf16 %v123_v52, %v122_v51  ;;  %v2343_v62 = vpack.c.bf16 %v141_v57, %v140_v56 }
  0x2c   :  { %2356 = vmatprep.subr.bf16.mxu1 %v2355_v4  ;;  %v173_v59 = vld [vmem:[%s4421_s1 + $0x3f8] sm:$0xff]  ;;  %v2373_v61 = vpack.c.bf16 %v155_v55, %v154_v53  ;;  %v124_v63 = vld [vmem:[%s4421_s1 + $0x270] sm:$0xff]  ;;  %v190_v4 = vld [vmem:[%s4421_s1 + $0x480] sm:$0xff] }
  0x2d   :  { %2326 = vmatpush3.bf16.msra.mxu0 %v2325_v10  ;;  %v125_v0 = vld [vmem:[%s4421_s1 + $0x278] sm:$0xff]  ;;  %v156_v1 = vld [vmem:[%s4421_s1 + $0x370] sm:$0xff]  ;;  %v2375_v2 = vpack.c.bf16 %v173_v59, %v172_v58  ;;  %v191_v5 = vld [vmem:[%s4421_s1 + $0x488] sm:$0xff] }
  0x2e   :  { %2328 = vmatprep.subr.bf16.mxu0 %v2327_v12  ;;  %v157_v3 = vld [vmem:[%s4421_s1 + $0x378] sm:$0xff]  ;;  %v222_v6 = vld [vmem:[%s4421_s1 + $0x580] sm:$0xff]  ;;  %v223_v7 = vld [vmem:[%s4421_s1 + $0x588] sm:$0xff]  ;;  %v2345_v8 = vpack.c.bf16 %v125_v0, %v124_v63  ;;  %v2379_v10 = vpack.c.bf16 %v191_v5, %v190_v4 }
  0x2f   :  { %2358 = vmatpush3.bf16.msra.mxu1 %v2357_v11  ;;  %v2377_v9 = vpack.c.bf16 %v157_v3, %v156_v1  ;;  %v174_v11 = vld [vmem:[%s4421_s1 + $0x400] sm:$0xff]  ;;  %v175_v12 = vld [vmem:[%s4421_s1 + $0x408] sm:$0xff]  ;;  %v2411_v14 = vpack.c.bf16 %v223_v7, %v222_v6  ;;  %v193_v17 = vld [vmem:[%s4421_s1 + $0x498] sm:$0xff] }
  0x30   :  { %2360 = vmatprep.subr.bf16.mxu1 %v2359_v16  ;;  %v206_v13 = vld [vmem:[%s4421_s1 + $0x500] sm:$0xff]  ;;  %v207_v15 = vld [vmem:[%s4421_s1 + $0x508] sm:$0xff]  ;;  %v192_v16 = vld [vmem:[%s4421_s1 + $0x490] sm:$0xff]  ;;  %v2381_v21 = vpack.c.bf16 %v175_v12, %v174_v11 }
  0x31   :  { %2330 = vmatpush3.bf16.msra.mxu0 %v2329_v22  ;;  %v224_v18 = vld [vmem:[%s4421_s1 + $0x590] sm:$0xff]  ;;  %v225_v19 = vld [vmem:[%s4421_s1 + $0x598] sm:$0xff]  ;;  %v18_v20 = vld [vmem:[%s4422_s0 + $0x20] sm:$0xff]  ;;  %v2413_v23 = vpack.c.bf16 %v207_v15, %v206_v13  ;;  %v2383_v24 = vpack.c.bf16 %v193_v17, %v192_v16 }
  0x32   :  { %2332 = vmatprep.subr.bf16.mxu0 %v2331_v26  ;;  %v20_v22 = vld [vmem:[%s4422_s0 + $0x30] sm:$0xff]  ;;  %v177_v26 = vld [vmem:[%s4421_s1 + $0x418] sm:$0xff]  ;;  %v2415_v28 = vpack.c.bf16 %v225_v19, %v224_v18  ;;  %v195_v31 = vld [vmem:[%s4421_s1 + $0x4a8] sm:$0xff] }
  0x33   :  { %2362 = vmatpush3.bf16.msra.mxu1 %v2361_v25  ;;  %v176_v25 = vld [vmem:[%s4421_s1 + $0x410] sm:$0xff]  ;;  %v209_v29 = vld [vmem:[%s4421_s1 + $0x518] sm:$0xff]  ;;  %v226_v32 = vld [vmem:[%s4421_s1 + $0x5a0] sm:$0xff] }
  0x34   :  { %2364 = vmatprep.subr.bf16.mxu1 %v2363_v30  ;;  %v208_v27 = vld [vmem:[%s4421_s1 + $0x510] sm:$0xff]  ;;  %v194_v30 = vld [vmem:[%s4421_s1 + $0x4a0] sm:$0xff]  ;;  %v227_v33 = vld [vmem:[%s4421_s1 + $0x5a8] sm:$0xff]  ;;  %v2385_v35 = vpack.c.bf16 %v177_v26, %v176_v25 }
  0x35   :  { %2334 = vmatpush3.bf16.msra.mxu0 %v2333_v36  ;;  %v23_v34 = vld [vmem:[%s4422_s0 + $0x48] sm:$0xff]  ;;  %v25_v36 = vld [vmem:[%s4422_s0 + $0x58] sm:$0xff]  ;;  %v178_v39 = vld [vmem:[%s4421_s1 + $0x420] sm:$0xff] }
  0x36   :  { %2336 = vmatprep.subr.bf16.mxu0 %v2335_v38  ;;  %v2387_v38 = vpack.c.bf16 %v195_v31, %v194_v30  ;;  %v179_v40 = vld [vmem:[%s4421_s1 + $0x428] sm:$0xff]  ;;  %v210_v41 = vld [vmem:[%s4421_s1 + $0x520] sm:$0xff]  ;;  %v196_v44 = vld [vmem:[%s4421_s1 + $0x4b0] sm:$0xff] }
  0x37   :  { %2366 = vmatpush3.bf16.msra.mxu1 %v2365_v37  ;;  %v2417_v37 = vpack.c.bf16 %v209_v29, %v208_v27  ;;  %v211_v43 = vld [vmem:[%s4421_s1 + $0x528] sm:$0xff]  ;;  %v197_v45 = vld [vmem:[%s4421_s1 + $0x4b8] sm:$0xff]  ;;  %v228_v46 = vld [vmem:[%s4421_s1 + $0x5b0] sm:$0xff] }
  0x38   :  { %2368 = vmatprep.subr.bf16.mxu1 %v2367_v42  ;;  %v2419_v42 = vpack.c.bf16 %v227_v33, %v226_v32  ;;  %v229_v47 = vld [vmem:[%s4421_s1 + $0x5b8] sm:$0xff]  ;;  %v180_v51 = vld [vmem:[%s4421_s1 + $0x430] sm:$0xff]  ;;  %v198_v56 = vld [vmem:[%s4421_s1 + $0x4c0] sm:$0xff] }
  0x39   :  { %2338 = vmatpush3.bf16.msra.mxu0 %v2337_v48  ;;  %v2389_v48 = vpack.c.bf16 %v179_v40, %v178_v39  ;;  %v181_v52 = vld [vmem:[%s4421_s1 + $0x438] sm:$0xff]  ;;  %v212_v53 = vld [vmem:[%s4421_s1 + $0x530] sm:$0xff]  ;;  %v199_v57 = vld [vmem:[%s4421_s1 + $0x4c8] sm:$0xff] }
  0x3a   :  { %2340 = vmatprep.subr.bf16.mxu0 %v2339_v50  ;;  %v2391_v50 = vpack.c.bf16 %v197_v45, %v196_v44  ;;  %v213_v55 = vld [vmem:[%s4421_s1 + $0x538] sm:$0xff]  ;;  %v230_v58 = vld [vmem:[%s4421_s1 + $0x5c0] sm:$0xff]  ;;  %v231_v59 = vld [vmem:[%s4421_s1 + $0x5c8] sm:$0xff] }
  0x3b   :  { %2370 = vmatpush3.bf16.msra.mxu1 %v2369_v49  ;;  %v2421_v49 = vpack.c.bf16 %v211_v43, %v210_v41  ;;  %v182_v63 = vld [vmem:[%s4421_s1 + $0x440] sm:$0xff]  ;;  %v183_v0 = vld [vmem:[%s4421_s1 + $0x448] sm:$0xff]  ;;  %v200_v4 = vld [vmem:[%s4421_s1 + $0x4d0] sm:$0xff] }
  0x3c   :  { %2372 = vmatprep.subr.bf16.mxu1 %v2371_v54  ;;  %v2423_v54 = vpack.c.bf16 %v229_v47, %v228_v46  ;;  %v214_v1 = vld [vmem:[%s4421_s1 + $0x540] sm:$0xff]  ;;  %v215_v3 = vld [vmem:[%s4421_s1 + $0x548] sm:$0xff]  ;;  %v201_v5 = vld [vmem:[%s4421_s1 + $0x4d8] sm:$0xff] }
  0x3d   :  { %2342 = vmatpush3.bf16.msra.mxu0 %v2341_v60  ;;  %v2393_v60 = vpack.c.bf16 %v181_v52, %v180_v51  ;;  %v232_v6 = vld [vmem:[%s4421_s1 + $0x5d0] sm:$0xff]  ;;  %v233_v7 = vld [vmem:[%s4421_s1 + $0x5d8] sm:$0xff]  ;;  %v202_v16 = vld [vmem:[%s4421_s1 + $0x4e0] sm:$0xff] }
  0x3e   :  { %2344 = vmatprep.subr.bf16.mxu0 %v2343_v62  ;;  %v2395_v62 = vpack.c.bf16 %v199_v57, %v198_v56  ;;  %v184_v11 = vld [vmem:[%s4421_s1 + $0x450] sm:$0xff]  ;;  %v185_v12 = vld [vmem:[%s4421_s1 + $0x458] sm:$0xff]  ;;  %v203_v17 = vld [vmem:[%s4421_s1 + $0x4e8] sm:$0xff] }
  0x3f   :  { %2374 = vmatpush3.bf16.msra.mxu1 %v2373_v61  ;;  %v2425_v61 = vpack.c.bf16 %v213_v55, %v212_v53  ;;  %v216_v13 = vld [vmem:[%s4421_s1 + $0x550] sm:$0xff]  ;;  %v217_v15 = vld [vmem:[%s4421_s1 + $0x558] sm:$0xff]  ;;  %v234_v18 = vld [vmem:[%s4421_s1 + $0x5e0] sm:$0xff] }
  0x40   :  { %2376 = vmatprep.subr.bf16.mxu1 %v2375_v2  ;;  %v2427_v2 = vpack.c.bf16 %v231_v59, %v230_v58  ;;  %v235_v19 = vld [vmem:[%s4421_s1 + $0x5e8] sm:$0xff]  ;;  %v218_v25 = vld [vmem:[%s4421_s1 + $0x560] sm:$0xff]  ;;  %v205_v29 = vld [vmem:[%s4421_s1 + $0x4f8] sm:$0xff] }
  0x41   :  { %2346 = vmatpush3.bf16.msra.mxu0 %v2345_v8  ;;  %v2397_v8 = vpack.c.bf16 %v183_v0, %v182_v63  ;;  %v2435_v26 = vpack.c.bf16 %v235_v19, %v234_v18  ;;  %v219_v27 = vld [vmem:[%s4421_s1 + $0x568] sm:$0xff]  ;;  %v236_v30 = vld [vmem:[%s4421_s1 + $0x5f0] sm:$0xff]  ;;  %v237_v31 = vld [vmem:[%s4421_s1 + $0x5f8] sm:$0xff] }
  0x42   :  { %2380 = vmatprep.subr.bf16.mxu0 %v2379_v10  ;;  %v2399_v10 = vpack.c.bf16 %v201_v5, %v200_v4  ;;  %v2437_v33 = vpack.c.bf16 %v219_v27, %v218_v25  ;;  %v221_v39 = vld [vmem:[%s4421_s1 + $0x578] sm:$0xff]  ;;  %v254_v40 = vld [vmem:[%s4421_s1 + $0x680] sm:$0xff]  ;;  %v255_v41 = vld [vmem:[%s4421_s1 + $0x688] sm:$0xff] }
  0x43   :  { %2378 = vmatpush3.bf16.msra.mxu1 %v2377_v9  ;;  %v2429_v9 = vpack.c.bf16 %v215_v3, %v214_v1  ;;  %v287_v43 = vld [vmem:[%s4421_s1 + $0x788] sm:$0xff]  ;;  %v2443_v46 = vpack.c.bf16 %v255_v41, %v254_v40  ;;  %v238_v47 = vld [vmem:[%s4421_s1 + $0x600] sm:$0xff]  ;;  %v256_v52 = vld [vmem:[%s4421_s1 + $0x690] sm:$0xff] }
  0x44   :  { %2412 = vmatprep.subr.bf16.mxu1 %v2411_v14  ;;  %770 = vmatmul.mubr.f32.vlgmr.msra.gmra.mrb[2].mxu0 %v18_v20  ;;  %v2431_v14 = vpack.c.bf16 %v233_v7, %v232_v6  ;;  %v2401_v20 = vpack.c.bf16 %v185_v12, %v184_v11  ;;  %v271_v51 = vld [vmem:[%s4421_s1 + $0x708] sm:$0xff]  ;;  %v257_v53 = vld [vmem:[%s4421_s1 + $0x698] sm:$0xff]  ;;  %v22_v56 = vld [vmem:[%s4422_s0 + $0x40] sm:$0xff] }
  0x45   :  { %2382 = vmatpush3.bf16.msra.mxu0 %v2381_v21  ;;  %909 = vmatprep.mubr.f32.mxu0 %v23_v34  ;;  %v2433_v21 = vpack.c.bf16 %v217_v15, %v216_v13  ;;  %v289_v55 = vld [vmem:[%s4421_s1 + $0x798] sm:$0xff]  ;;  %v24_v58 = vld [vmem:[%s4422_s0 + $0x50] sm:$0xff]  ;;  %v259_v3 = vld [vmem:[%s4421_s1 + $0x6a8] sm:$0xff] }
  0x46   :  { %840 = vmatmul.mubr.f32.vlgmr.msra.gmra.mrb[2].mxu1 %v20_v22  ;;  %2384 = vmatprep.subr.bf16.mxu0 %v2383_v24  ;;  %v2403_v22 = vpack.c.bf16 %v203_v17, %v202_v16  ;;  %v187_v24 = vld [vmem:[%s4421_s1 + $0x468] sm:$0xff]  ;;  %v272_v63 = vld [vmem:[%s4421_s1 + $0x710] sm:$0xff]  ;;  %v273_v1 = vld [vmem:[%s4421_s1 + $0x718] sm:$0xff] }
  0x47   :  { %2414 = vmatpush3.bf16.msra.mxu1 %v2413_v23  ;;  %979 = vmatprep.mubr.f32.mxu1 %v25_v36  ;;  %v186_v23 = vld [vmem:[%s4421_s1 + $0x460] sm:$0xff]  ;;  %v189_v36 = vld [vmem:[%s4421_s1 + $0x478] sm:$0xff]  ;;  %v291_v5 = vld [vmem:[%s4421_s1 + $0x7a8] sm:$0xff] }
  0x48   :  { %2416 = vmatprep.subr.bf16.mxu1 %v2415_v28  ;;  %v204_v28 = vld [vmem:[%s4421_s1 + $0x4f0] sm:$0xff]  ;;  %v2405_v32 = vpack.c.bf16 %v187_v24, %v186_v23  ;;  %v290_v4 = vld [vmem:[%s4421_s1 + $0x7a0] sm:$0xff]  ;;  %v27_v6 = vld [vmem:[%s4422_s0 + $0x68] sm:$0xff] }
  0x49   :  { %2386 = vmatpush3.bf16.msra.mxu0 %v2385_v35  ;;  %v2407_v34 = vpack.c.bf16 %v205_v29, %v204_v28  ;;  %v188_v35 = vld [vmem:[%s4421_s1 + $0x470] sm:$0xff]  ;;  %v242_v11 = vld [vmem:[%s4421_s1 + $0x620] sm:$0xff]  ;;  %v243_v12 = vld [vmem:[%s4421_s1 + $0x628] sm:$0xff] }
  0x4a   :  { %2388 = vmatprep.subr.bf16.mxu0 %v2387_v38  ;;  %v2439_v38 = vpack.c.bf16 %v237_v31, %v236_v30  ;;  %v2409_v44 = vpack.c.bf16 %v189_v36, %v188_v35  ;;  %v274_v13 = vld [vmem:[%s4421_s1 + $0x720] sm:$0xff]  ;;  %v275_v15 = vld [vmem:[%s4421_s1 + $0x728] sm:$0xff]  ;;  %v260_v16 = vld [vmem:[%s4421_s1 + $0x6b0] sm:$0xff] }
  0x4b   :  { %2418 = vmatpush3.bf16.msra.mxu1 %v2417_v37  ;;  %v220_v37 = vld [vmem:[%s4421_s1 + $0x570] sm:$0xff]  ;;  %v261_v17 = vld [vmem:[%s4421_s1 + $0x6b8] sm:$0xff]  ;;  %v262_v28 = vld [vmem:[%s4421_s1 + $0x6c0] sm:$0xff] }
  0x4c   :  { %2420 = vmatprep.subr.bf16.mxu1 %v2419_v42  ;;  %v286_v42 = vld [vmem:[%s4421_s1 + $0x780] sm:$0xff]  ;;  %v2441_v45 = vpack.c.bf16 %v221_v39, %v220_v37  ;;  %v292_v18 = vld [vmem:[%s4421_s1 + $0x7b0] sm:$0xff]  ;;  %v293_v19 = vld [vmem:[%s4421_s1 + $0x7b8] sm:$0xff] }
  0x4d   :  { %2390 = vmatpush3.bf16.msra.mxu0 %v2389_v48  ;;  %v239_v48 = vld [vmem:[%s4421_s1 + $0x608] sm:$0xff]  ;;  %v244_v23 = vld [vmem:[%s4421_s1 + $0x630] sm:$0xff]  ;;  %v245_v24 = vld [vmem:[%s4421_s1 + $0x638] sm:$0xff] }
  0x4e   :  { %2392 = vmatprep.subr.bf16.mxu0 %v2391_v50  ;;  %v2475_v50 = vpack.c.bf16 %v287_v43, %v286_v42  ;;  %v2445_v57 = vpack.c.bf16 %v239_v48, %v238_v47  ;;  %v276_v25 = vld [vmem:[%s4421_s1 + $0x730] sm:$0xff]  ;;  %v277_v27 = vld [vmem:[%s4421_s1 + $0x738] sm:$0xff]  ;;  %v263_v29 = vld [vmem:[%s4421_s1 + $0x6c8] sm:$0xff] }
  0x4f   :  { %2422 = vmatpush3.bf16.msra.mxu1 %v2421_v49  ;;  %v270_v49 = vld [vmem:[%s4421_s1 + $0x700] sm:$0xff]  ;;  %v295_v31 = vld [vmem:[%s4421_s1 + $0x7c8] sm:$0xff]  ;;  %v264_v40 = vld [vmem:[%s4421_s1 + $0x6d0] sm:$0xff] }
  0x50   :  { %2424 = vmatprep.subr.bf16.mxu1 %v2423_v54  ;;  %v288_v54 = vld [vmem:[%s4421_s1 + $0x790] sm:$0xff]  ;;  %v2477_v59 = vpack.c.bf16 %v271_v51, %v270_v49  ;;  %v294_v30 = vld [vmem:[%s4421_s1 + $0x7c0] sm:$0xff]  ;;  %v247_v36 = vld [vmem:[%s4421_s1 + $0x648] sm:$0xff] }
  0x51   :  { %2394 = vmatpush3.bf16.msra.mxu0 %v2393_v60  ;;  %v2447_v60 = vpack.c.bf16 %v257_v53, %v256_v52  ;;  %v2479_v0 = vpack.c.bf16 %v289_v55, %v288_v54  ;;  %v246_v35 = vld [vmem:[%s4421_s1 + $0x640] sm:$0xff]  ;;  %v279_v39 = vld [vmem:[%s4421_s1 + $0x748] sm:$0xff]  ;;  %v265_v41 = vld [vmem:[%s4421_s1 + $0x6d8] sm:$0xff] }
  0x52   :  { %2396 = vmatprep.subr.bf16.mxu0 %v2395_v62  ;;  %v241_v62 = vld [vmem:[%s4421_s1 + $0x618] sm:$0xff]  ;;  %v278_v37 = vld [vmem:[%s4421_s1 + $0x740] sm:$0xff]  ;;  %v296_v42 = vld [vmem:[%s4421_s1 + $0x7d0] sm:$0xff] }
  0x53   :  { %2426 = vmatpush3.bf16.msra.mxu1 %v2425_v61  ;;  %v240_v61 = vld [vmem:[%s4421_s1 + $0x610] sm:$0xff]  ;;  %v297_v43 = vld [vmem:[%s4421_s1 + $0x7d8] sm:$0xff]  ;;  %v266_v52 = vld [vmem:[%s4421_s1 + $0x6e0] sm:$0xff] }
  0x54   :  { %2428 = vmatprep.subr.bf16.mxu1 %v2427_v2  ;;  %v258_v2 = vld [vmem:[%s4421_s1 + $0x6a0] sm:$0xff]  ;;  %v2449_v7 = vpack.c.bf16 %v241_v62, %v240_v61  ;;  %v248_v47 = vld [vmem:[%s4421_s1 + $0x650] sm:$0xff]  ;;  %v249_v48 = vld [vmem:[%s4421_s1 + $0x658] sm:$0xff] }
  0x55   :  { %2398 = vmatpush3.bf16.msra.mxu0 %v2397_v8  ;;  %v29_v8 = vld [vmem:[%s4422_s0 + $0x78] sm:$0xff]  ;;  %v280_v49 = vld [vmem:[%s4421_s1 + $0x750] sm:$0xff]  ;;  %v267_v53 = vld [vmem:[%s4421_s1 + $0x6e8] sm:$0xff] }
  0x56   :  { %2400 = vmatprep.subr.bf16.mxu0 %v2399_v10  ;;  %v2451_v10 = vpack.c.bf16 %v259_v3, %v258_v2  ;;  %v281_v51 = vld [vmem:[%s4421_s1 + $0x758] sm:$0xff]  ;;  %v298_v54 = vld [vmem:[%s4421_s1 + $0x7e0] sm:$0xff]  ;;  %v299_v55 = vld [vmem:[%s4421_s1 + $0x7e8] sm:$0xff] }
  0x57   :  { %2430 = vmatpush3.bf16.msra.mxu1 %v2429_v9  ;;  %v2481_v9 = vpack.c.bf16 %v273_v1, %v272_v63  ;;  %v282_v61 = vld [vmem:[%s4421_s1 + $0x760] sm:$0xff]  ;;  %v2499_v62 = vpack.c.bf16 %v299_v55, %v298_v54  ;;  %v283_v63 = vld [vmem:[%s4421_s1 + $0x768] sm:$0xff]  ;;  %v269_v1 = vld [vmem:[%s4421_s1 + $0x6f8] sm:$0xff] }
  0x58   :  { %2432 = vmatprep.subr.bf16.mxu1 %v2431_v14  ;;  %v2483_v14 = vpack.c.bf16 %v291_v5, %v290_v4  ;;  %v300_v2 = vld [vmem:[%s4421_s1 + $0x7f0] sm:$0xff]  ;;  %v301_v3 = vld [vmem:[%s4421_s1 + $0x7f8] sm:$0xff]  ;;  %v2501_v5 = vpack.c.bf16 %v283_v63, %v282_v61 }
  0x59   :  { %2402 = vmatpush3.bf16.msra.mxu0 %v2401_v20  ;;  %v2453_v20 = vpack.c.bf16 %v243_v12, %v242_v11  ;;  %v285_v11 = vld [vmem:[%s4421_s1 + $0x778] sm:$0xff]  ;;  %v318_v12 = vld [vmem:[%s4421_s1 + $0x880] sm:$0xff]  ;;  %v356_v54 = vld [vmem:[%s4421_s1 + $0x9b0] sm:$0xff] }
  0x5a   :  { %2404 = vmatprep.subr.bf16.mxu0 %v2403_v22  ;;  %v2455_v22 = vpack.c.bf16 %v261_v17, %v260_v16  ;;  %v357_v55 = vld [vmem:[%s4421_s1 + $0x9b8] sm:$0xff]  ;;  %v340_v61 = vld [vmem:[%s4421_s1 + $0x930] sm:$0xff] }
  0x5b   :  { %2434 = vmatpush3.bf16.msra.mxu1 %v2433_v21  ;;  %v2485_v21 = vpack.c.bf16 %v275_v15, %v274_v13  ;;  %v319_v13 = vld [vmem:[%s4421_s1 + $0x888] sm:$0xff]  ;;  %v341_v63 = vld [vmem:[%s4421_s1 + $0x938] sm:$0xff] }
  0x5c   :  { %2436 = vmatprep.subr.bf16.mxu1 %v2435_v26  ;;  %v2487_v26 = vpack.c.bf16 %v293_v19, %v292_v18  ;;  %v351_v15 = vld [vmem:[%s4421_s1 + $0x988] sm:$0xff]  ;;  %v2507_v18 = vpack.c.bf16 %v319_v13, %v318_v12  ;;  %v302_v19 = vld [vmem:[%s4421_s1 + $0x800] sm:$0xff]  ;;  %v328_v12 = vld [vmem:[%s4421_s1 + $0x8d0] sm:$0xff] }
  0x5d   :  { %2406 = vmatpush3.bf16.msra.mxu0 %v2405_v32  ;;  %v2457_v32 = vpack.c.bf16 %v245_v24, %v244_v23  ;;  %v335_v23 = vld [vmem:[%s4421_s1 + $0x908] sm:$0xff]  ;;  %v320_v24 = vld [vmem:[%s4421_s1 + $0x890] sm:$0xff]  ;;  %v329_v13 = vld [vmem:[%s4421_s1 + $0x8d8] sm:$0xff] }
  0x5e   :  { %2408 = vmatprep.subr.bf16.mxu0 %v2407_v34  ;;  %v2459_v34 = vpack.c.bf16 %v263_v29, %v262_v28  ;;  %v26_v28 = vld [vmem:[%s4422_s0 + $0x60] sm:$0xff] }
  0x5f   :  { %2438 = vmatpush3.bf16.msra.mxu1 %v2437_v33  ;;  %v2489_v33 = vpack.c.bf16 %v277_v27, %v276_v25  ;;  %v321_v25 = vld [vmem:[%s4421_s1 + $0x898] sm:$0xff] }
  0x60   :  { %2440 = vmatprep.subr.bf16.mxu1 %v2439_v38  ;;  %v2491_v38 = vpack.c.bf16 %v295_v31, %v294_v30  ;;  %v353_v27 = vld [vmem:[%s4421_s1 + $0x998] sm:$0xff]  ;;  %v28_v30 = vld [vmem:[%s4422_s0 + $0x70] sm:$0xff] }
  0x61   :  { %2410 = vmatpush3.bf16.msra.mxu0 %v2409_v44  ;;  %v2461_v44 = vpack.c.bf16 %v247_v36, %v246_v35  ;;  %v336_v35 = vld [vmem:[%s4421_s1 + $0x910] sm:$0xff] }
  0x62   :  { %2444 = vmatprep.subr.bf16.mxu0 %v2443_v46  ;;  %v2463_v46 = vpack.c.bf16 %v265_v41, %v264_v40  ;;  %v354_v40 = vld [vmem:[%s4421_s1 + $0x9a0] sm:$0xff]  ;;  %v355_v41 = vld [vmem:[%s4421_s1 + $0x9a8] sm:$0xff] }
  0x63   :  { %2442 = vmatpush3.bf16.msra.mxu1 %v2441_v45  ;;  %v2493_v45 = vpack.c.bf16 %v279_v39, %v278_v37  ;;  %v337_v37 = vld [vmem:[%s4421_s1 + $0x918] sm:$0xff]  ;;  %v323_v39 = vld [vmem:[%s4421_s1 + $0x8a8] sm:$0xff] }
  0x64   :  { %2476 = vmatprep.subr.bf16.mxu1 %v2475_v50  ;;  %910 = vmatmul.mubr.f32.vlgmr.msra.gmra.mrb[4].mxu0 %v22_v56  ;;  %v2495_v50 = vpack.c.bf16 %v297_v43, %v296_v42  ;;  %v2465_v56 = vpack.c.bf16 %v249_v48, %v248_v47  ;;  %v31_v42 = vld [vmem:[%s4422_s0 + $0x88] sm:$0xff]  ;;  %v306_v47 = vld [vmem:[%s4421_s1 + $0x820] sm:$0xff] }
  0x65   :  { %2446 = vmatpush3.bf16.msra.mxu0 %v2445_v57  ;;  %1049 = vmatprep.mubr.f32.mxu0 %v27_v6  ;;  %v2497_v57 = vpack.c.bf16 %v281_v51, %v280_v49  ;;  %v307_v48 = vld [vmem:[%s4421_s1 + $0x828] sm:$0xff]  ;;  %v338_v49 = vld [vmem:[%s4421_s1 + $0x920] sm:$0xff] }
  0x66   :  { %980 = vmatmul.mubr.f32.vlgmr.msra.gmra.mrb[4].mxu1 %v24_v58  ;;  %2448 = vmatprep.subr.bf16.mxu0 %v2447_v60  ;;  %v2467_v58 = vpack.c.bf16 %v267_v53, %v266_v52  ;;  %v251_v60 = vld [vmem:[%s4421_s1 + $0x668] sm:$0xff]  ;;  %v324_v52 = vld [vmem:[%s4421_s1 + $0x8b0] sm:$0xff]  ;;  %v325_v53 = vld [vmem:[%s4421_s1 + $0x8b8] sm:$0xff] }
  0x67   :  { %2478 = vmatpush3.bf16.msra.mxu1 %v2477_v59  ;;  %1119 = vmatprep.mubr.f32.mxu1 %v29_v8  ;;  %v250_v59 = vld [vmem:[%s4421_s1 + $0x660] sm:$0xff]  ;;  %v253_v8 = vld [vmem:[%s4421_s1 + $0x678] sm:$0xff]  ;;  %v339_v51 = vld [vmem:[%s4421_s1 + $0x928] sm:$0xff] }
  0x68   :  { %2480 = vmatprep.subr.bf16.mxu1 %v2479_v0  ;;  %v268_v0 = vld [vmem:[%s4421_s1 + $0x6f0] sm:$0xff]  ;;  %v2469_v4 = vpack.c.bf16 %v251_v60, %v250_v59  ;;  %v309_v60 = vld [vmem:[%s4421_s1 + $0x838] sm:$0xff] }
  0x69   :  { %2450 = vmatpush3.bf16.msra.mxu0 %v2449_v7  ;;  %v2471_v6 = vpack.c.bf16 %v269_v1, %v268_v0  ;;  %v252_v7 = vld [vmem:[%s4421_s1 + $0x670] sm:$0xff]  ;;  %v326_v0 = vld [vmem:[%s4421_s1 + $0x8c0] sm:$0xff]  ;;  %v327_v1 = vld [vmem:[%s4421_s1 + $0x8c8] sm:$0xff] }
  0x6a   :  { %2452 = vmatprep.subr.bf16.mxu0 %v2451_v10  ;;  %v2503_v10 = vpack.c.bf16 %v301_v3, %v300_v2  ;;  %v2473_v16 = vpack.c.bf16 %v253_v8, %v252_v7  ;;  %v308_v59 = vld [vmem:[%s4421_s1 + $0x830] sm:$0xff]  ;;  %v358_v2 = vld [vmem:[%s4421_s1 + $0x9c0] sm:$0xff]  ;;  %v359_v3 = vld [vmem:[%s4421_s1 + $0x9c8] sm:$0xff] }
  0x6b   :  { %2482 = vmatpush3.bf16.msra.mxu1 %v2481_v9  ;;  %v284_v9 = vld [vmem:[%s4421_s1 + $0x770] sm:$0xff]  ;;  %v310_v7 = vld [vmem:[%s4421_s1 + $0x840] sm:$0xff]  ;;  %v311_v8 = vld [vmem:[%s4421_s1 + $0x848] sm:$0xff] }
  0x6c   :  { %2484 = vmatprep.subr.bf16.mxu1 %v2483_v14  ;;  %v350_v14 = vld [vmem:[%s4421_s1 + $0x980] sm:$0xff]  ;;  %v2505_v17 = vpack.c.bf16 %v285_v11, %v284_v9  ;;  %v343_v11 = vld [vmem:[%s4421_s1 + $0x948] sm:$0xff] }
  0x6d   :  { %2454 = vmatpush3.bf16.msra.mxu0 %v2453_v20  ;;  %v303_v20 = vld [vmem:[%s4421_s1 + $0x808] sm:$0xff]  ;;  %v342_v9 = vld [vmem:[%s4421_s1 + $0x940] sm:$0xff] }
  0x6e   :  { %2456 = vmatprep.subr.bf16.mxu0 %v2455_v22  ;;  %v2539_v22 = vpack.c.bf16 %v351_v15, %v350_v14  ;;  %v2509_v29 = vpack.c.bf16 %v303_v20, %v302_v19  ;;  %v360_v14 = vld [vmem:[%s4421_s1 + $0x9d0] sm:$0xff]  ;;  %v361_v15 = vld [vmem:[%s4421_s1 + $0x9d8] sm:$0xff] }
  0x6f   :  { %2486 = vmatpush3.bf16.msra.mxu1 %v2485_v21  ;;  %v334_v21 = vld [vmem:[%s4421_s1 + $0x900] sm:$0xff]  ;;  %v312_v19 = vld [vmem:[%s4421_s1 + $0x850] sm:$0xff]  ;;  %v313_v20 = vld [vmem:[%s4421_s1 + $0x858] sm:$0xff] }
  0x70   :  { %2488 = vmatprep.subr.bf16.mxu1 %v2487_v26  ;;  %v352_v26 = vld [vmem:[%s4421_s1 + $0x990] sm:$0xff]  ;;  %v2541_v31 = vpack.c.bf16 %v335_v23, %v334_v21  ;;  %v345_v23 = vld [vmem:[%s4421_s1 + $0x958] sm:$0xff] }
  0x71   :  { %2458 = vmatpush3.bf16.msra.mxu0 %v2457_v32  ;;  %v2511_v32 = vpack.c.bf16 %v321_v25, %v320_v24  ;;  %v2543_v36 = vpack.c.bf16 %v353_v27, %v352_v26  ;;  %v344_v21 = vld [vmem:[%s4421_s1 + $0x950] sm:$0xff]  ;;  %v330_v24 = vld [vmem:[%s4421_s1 + $0x8e0] sm:$0xff]  ;;  %v331_v25 = vld [vmem:[%s4421_s1 + $0x8e8] sm:$0xff] }
  0x72   :  { %2460 = vmatprep.subr.bf16.mxu0 %v2459_v34  ;;  %v305_v34 = vld [vmem:[%s4421_s1 + $0x818] sm:$0xff]  ;;  %v362_v26 = vld [vmem:[%s4421_s1 + $0x9e0] sm:$0xff]  ;;  %v363_v27 = vld [vmem:[%s4421_s1 + $0x9e8] sm:$0xff] }
  0x73   :  { %2490 = vmatpush3.bf16.msra.mxu1 %v2489_v33  ;;  %v304_v33 = vld [vmem:[%s4421_s1 + $0x810] sm:$0xff] }
  0x74   :  { %2492 = vmatprep.subr.bf16.mxu1 %v2491_v38  ;;  %v322_v38 = vld [vmem:[%s4421_s1 + $0x8a0] sm:$0xff]  ;;  %v2513_v43 = vpack.c.bf16 %v305_v34, %v304_v33  ;;  %v2563_v34 = vpack.c.bf16 %v363_v27, %v362_v26  ;;  %v420_v26 = vld [vmem:[%s4421_s1 + $0xbb0] sm:$0xff]  ;;  %v421_v27 = vld [vmem:[%s4421_s1 + $0xbb8] sm:$0xff] }
  0x75   :  { %2462 = vmatpush3.bf16.msra.mxu0 %v2461_v44  ;;  %v33_v44 = vld [vmem:[%s4422_s0 + $0x98] sm:$0xff]  ;;  %v346_v33 = vld [vmem:[%s4421_s1 + $0x960] sm:$0xff] }
  0x76   :  { %2464 = vmatprep.subr.bf16.mxu0 %v2463_v46  ;;  %v2515_v46 = vpack.c.bf16 %v323_v39, %v322_v38  ;;  %v364_v38 = vld [vmem:[%s4421_s1 + $0x9f0] sm:$0xff]  ;;  %v365_v39 = vld [vmem:[%s4421_s1 + $0x9f8] sm:$0xff] }
  0x77   :  { %2494 = vmatpush3.bf16.msra.mxu1 %v2493_v45  ;;  %v2545_v45 = vpack.c.bf16 %v337_v37, %v336_v35  ;;  %v347_v35 = vld [vmem:[%s4421_s1 + $0x968] sm:$0xff]  ;;  %v333_v37 = vld [vmem:[%s4421_s1 + $0x8f8] sm:$0xff] }
  0x78   :  { %2496 = vmatprep.subr.bf16.mxu1 %v2495_v50  ;;  %v2547_v50 = vpack.c.bf16 %v355_v41, %v354_v40  ;;  %v2565_v41 = vpack.c.bf16 %v347_v35, %v346_v33  ;;  %v404_v33 = vld [vmem:[%s4421_s1 + $0xb30] sm:$0xff]  ;;  %v405_v35 = vld [vmem:[%s4421_s1 + $0xb38] sm:$0xff] }
  0x79   :  { %2466 = vmatpush3.bf16.msra.mxu0 %v2465_v56  ;;  %v2517_v56 = vpack.c.bf16 %v307_v48, %v306_v47  ;;  %v349_v47 = vld [vmem:[%s4421_s1 + $0x978] sm:$0xff]  ;;  %v382_v48 = vld [vmem:[%s4421_s1 + $0xa80] sm:$0xff] }
  0x7a   :  { %2468 = vmatprep.subr.bf16.mxu0 %v2467_v58  ;;  %v2519_v58 = vpack.c.bf16 %v325_v53, %v324_v52 }
  0x7b   :  { %2498 = vmatpush3.bf16.msra.mxu1 %v2497_v57  ;;  %v2549_v57 = vpack.c.bf16 %v339_v51, %v338_v49  ;;  %v383_v49 = vld [vmem:[%s4421_s1 + $0xa88] sm:$0xff] }
  0x7c   :  { %2500 = vmatprep.subr.bf16.mxu1 %v2499_v62  ;;  %v2551_v62 = vpack.c.bf16 %v357_v55, %v356_v54  ;;  %v415_v51 = vld [vmem:[%s4421_s1 + $0xb88] sm:$0xff]  ;;  %v2571_v54 = vpack.c.bf16 %v383_v49, %v382_v48  ;;  %v366_v55 = vld [vmem:[%s4421_s1 + $0xa00] sm:$0xff]  ;;  %v392_v48 = vld [vmem:[%s4421_s1 + $0xad0] sm:$0xff] }
  0x7d   :  { %2470 = vmatpush3.bf16.msra.mxu0 %v2469_v4  ;;  %v2521_v4 = vpack.c.bf16 %v309_v60, %v308_v59  ;;  %v399_v59 = vld [vmem:[%s4421_s1 + $0xb08] sm:$0xff]  ;;  %v384_v60 = vld [vmem:[%s4421_s1 + $0xa90] sm:$0xff]  ;;  %v393_v49 = vld [vmem:[%s4421_s1 + $0xad8] sm:$0xff] }
  0x7e   :  { %2472 = vmatprep.subr.bf16.mxu0 %v2471_v6  ;;  %v2523_v6 = vpack.c.bf16 %v327_v1, %v326_v0  ;;  %v30_v0 = vld [vmem:[%s4422_s0 + $0x80] sm:$0xff] }
  0x7f   :  { %2502 = vmatpush3.bf16.msra.mxu1 %v2501_v5  ;;  %v2553_v5 = vpack.c.bf16 %v341_v63, %v340_v61  ;;  %v385_v61 = vld [vmem:[%s4421_s1 + $0xa98] sm:$0xff] }
  0x80   :  { %2504 = vmatprep.subr.bf16.mxu1 %v2503_v10  ;;  %v2555_v10 = vpack.c.bf16 %v359_v3, %v358_v2  ;;  %v417_v63 = vld [vmem:[%s4421_s1 + $0xb98] sm:$0xff]  ;;  %v32_v2 = vld [vmem:[%s4422_s0 + $0x90] sm:$0xff] }
  0x81   :  { %2474 = vmatpush3.bf16.msra.mxu0 %v2473_v16  ;;  %v2525_v16 = vpack.c.bf16 %v311_v8, %v310_v7  ;;  %v400_v7 = vld [vmem:[%s4421_s1 + $0xb10] sm:$0xff] }
  0x82   :  { %2508 = vmatprep.subr.bf16.mxu0 %v2507_v18  ;;  %v2527_v18 = vpack.c.bf16 %v329_v13, %v328_v12  ;;  %v418_v12 = vld [vmem:[%s4421_s1 + $0xba0] sm:$0xff]  ;;  %v419_v13 = vld [vmem:[%s4421_s1 + $0xba8] sm:$0xff] }
  0x83   :  { %2506 = vmatpush3.bf16.msra.mxu1 %v2505_v17  ;;  %v2557_v17 = vpack.c.bf16 %v343_v11, %v342_v9  ;;  %v401_v9 = vld [vmem:[%s4421_s1 + $0xb18] sm:$0xff]  ;;  %v387_v11 = vld [vmem:[%s4421_s1 + $0xaa8] sm:$0xff] }
  0x84   :  { %2540 = vmatprep.subr.bf16.mxu1 %v2539_v22  ;;  %1050 = vmatmul.mubr.f32.vlgmr.msra.gmra.mrb[6].mxu0 %v26_v28  ;;  %v2559_v22 = vpack.c.bf16 %v361_v15, %v360_v14  ;;  %v2529_v28 = vpack.c.bf16 %v313_v20, %v312_v19  ;;  %v35_v14 = vld [vmem:[%s4422_s0 + $0xa8] sm:$0xff]  ;;  %v370_v19 = vld [vmem:[%s4421_s1 + $0xa20] sm:$0xff] }
  0x85   :  { %2510 = vmatpush3.bf16.msra.mxu0 %v2509_v29  ;;  %1189 = vmatprep.mubr.f32.mxu0 %v31_v42  ;;  %v2561_v29 = vpack.c.bf16 %v345_v23, %v344_v21  ;;  %v371_v20 = vld [vmem:[%s4421_s1 + $0xa28] sm:$0xff]  ;;  %v402_v21 = vld [vmem:[%s4421_s1 + $0xb20] sm:$0xff] }
  0x86   :  { %1120 = vmatmul.mubr.f32.vlgmr.msra.gmra.mrb[6].mxu1 %v28_v30  ;;  %2512 = vmatprep.subr.bf16.mxu0 %v2511_v32  ;;  %v2531_v30 = vpack.c.bf16 %v331_v25, %v330_v24  ;;  %v315_v32 = vld [vmem:[%s4421_s1 + $0x868] sm:$0xff]  ;;  %v388_v24 = vld [vmem:[%s4421_s1 + $0xab0] sm:$0xff]  ;;  %v389_v25 = vld [vmem:[%s4421_s1 + $0xab8] sm:$0xff] }
  0x87   :  { %2542 = vmatpush3.bf16.msra.mxu1 %v2541_v31  ;;  %1259 = vmatprep.mubr.f32.mxu1 %v33_v44  ;;  %v314_v31 = vld [vmem:[%s4421_s1 + $0x860] sm:$0xff]  ;;  %v317_v44 = vld [vmem:[%s4421_s1 + $0x878] sm:$0xff]  ;;  %v403_v23 = vld [vmem:[%s4421_s1 + $0xb28] sm:$0xff] }
  0x88   :  { %2544 = vmatprep.subr.bf16.mxu1 %v2543_v36  ;;  %v332_v36 = vld [vmem:[%s4421_s1 + $0x8f0] sm:$0xff]  ;;  %v2533_v40 = vpack.c.bf16 %v315_v32, %v314_v31  ;;  %v373_v32 = vld [vmem:[%s4421_s1 + $0xa38] sm:$0xff] }
  0x89   :  { %2514 = vmatpush3.bf16.msra.mxu0 %v2513_v43  ;;  %v2535_v42 = vpack.c.bf16 %v333_v37, %v332_v36  ;;  %v316_v43 = vld [vmem:[%s4421_s1 + $0x870] sm:$0xff]  ;;  %v390_v36 = vld [vmem:[%s4421_s1 + $0xac0] sm:$0xff]  ;;  %v391_v37 = vld [vmem:[%s4421_s1 + $0xac8] sm:$0xff] }
  0x8a   :  { %2516 = vmatprep.subr.bf16.mxu0 %v2515_v46  ;;  %v2567_v46 = vpack.c.bf16 %v365_v39, %v364_v38  ;;  %v2537_v52 = vpack.c.bf16 %v317_v44, %v316_v43  ;;  %v372_v31 = vld [vmem:[%s4421_s1 + $0xa30] sm:$0xff]  ;;  %v422_v38 = vld [vmem:[%s4421_s1 + $0xbc0] sm:$0xff]  ;;  %v423_v39 = vld [vmem:[%s4421_s1 + $0xbc8] sm:$0xff] }
  0x8b   :  { %2546 = vmatpush3.bf16.msra.mxu1 %v2545_v45  ;;  %v348_v45 = vld [vmem:[%s4421_s1 + $0x970] sm:$0xff]  ;;  %v374_v43 = vld [vmem:[%s4421_s1 + $0xa40] sm:$0xff]  ;;  %v375_v44 = vld [vmem:[%s4421_s1 + $0xa48] sm:$0xff] }
  0x8c   :  { %2548 = vmatprep.subr.bf16.mxu1 %v2547_v50  ;;  %v414_v50 = vld [vmem:[%s4421_s1 + $0xb80] sm:$0xff]  ;;  %v2569_v53 = vpack.c.bf16 %v349_v47, %v348_v45  ;;  %v407_v47 = vld [vmem:[%s4421_s1 + $0xb48] sm:$0xff] }
  0x8d   :  { %2518 = vmatpush3.bf16.msra.mxu0 %v2517_v56  ;;  %v367_v56 = vld [vmem:[%s4421_s1 + $0xa08] sm:$0xff]  ;;  %v406_v45 = vld [vmem:[%s4421_s1 + $0xb40] sm:$0xff] }
  0x8e   :  { %2520 = vmatprep.subr.bf16.mxu0 %v2519_v58  ;;  %v2603_v58 = vpack.c.bf16 %v415_v51, %v414_v50  ;;  %v2573_v1 = vpack.c.bf16 %v367_v56, %v366_v55  ;;  %v424_v50 = vld [vmem:[%s4421_s1 + $0xbd0] sm:$0xff]  ;;  %v425_v51 = vld [vmem:[%s4421_s1 + $0xbd8] sm:$0xff] }
  0x8f   :  { %2550 = vmatpush3.bf16.msra.mxu1 %v2549_v57  ;;  %v398_v57 = vld [vmem:[%s4421_s1 + $0xb00] sm:$0xff]  ;;  %v376_v55 = vld [vmem:[%s4421_s1 + $0xa50] sm:$0xff]  ;;  %v377_v56 = vld [vmem:[%s4421_s1 + $0xa58] sm:$0xff] }
  0x90   :  { %2552 = vmatprep.subr.bf16.mxu1 %v2551_v62  ;;  %v416_v62 = vld [vmem:[%s4421_s1 + $0xb90] sm:$0xff]  ;;  %v2605_v3 = vpack.c.bf16 %v399_v59, %v398_v57  ;;  %v409_v59 = vld [vmem:[%s4421_s1 + $0xb58] sm:$0xff] }
  0x91   :  { %2522 = vmatpush3.bf16.msra.mxu0 %v2521_v4  ;;  %v2575_v4 = vpack.c.bf16 %v385_v61, %v384_v60  ;;  %v2607_v8 = vpack.c.bf16 %v417_v63, %v416_v62  ;;  %v408_v57 = vld [vmem:[%s4421_s1 + $0xb50] sm:$0xff]  ;;  %v394_v60 = vld [vmem:[%s4421_s1 + $0xae0] sm:$0xff]  ;;  %v395_v61 = vld [vmem:[%s4421_s1 + $0xae8] sm:$0xff] }
  0x92   :  { %2524 = vmatprep.subr.bf16.mxu0 %v2523_v6  ;;  %v369_v6 = vld [vmem:[%s4421_s1 + $0xa18] sm:$0xff]  ;;  %v426_v62 = vld [vmem:[%s4421_s1 + $0xbe0] sm:$0xff]  ;;  %v427_v63 = vld [vmem:[%s4421_s1 + $0xbe8] sm:$0xff] }
  0x93   :  { %2554 = vmatpush3.bf16.msra.mxu1 %v2553_v5  ;;  %v368_v5 = vld [vmem:[%s4421_s1 + $0xa10] sm:$0xff] }
  0x94   :  { %2556 = vmatprep.subr.bf16.mxu1 %v2555_v10  ;;  %v386_v10 = vld [vmem:[%s4421_s1 + $0xaa0] sm:$0xff]  ;;  %v2577_v15 = vpack.c.bf16 %v369_v6, %v368_v5  ;;  %v2627_v6 = vpack.c.bf16 %v427_v63, %v426_v62  ;;  %v484_v62 = vld [vmem:[%s4421_s1 + $0xdb0] sm:$0xff]  ;;  %v485_v63 = vld [vmem:[%s4421_s1 + $0xdb8] sm:$0xff] }
  0x95   :  { %2526 = vmatpush3.bf16.msra.mxu0 %v2525_v16  ;;  %v37_v16 = vld [vmem:[%s4422_s0 + $0xb8] sm:$0xff]  ;;  %v410_v5 = vld [vmem:[%s4421_s1 + $0xb60] sm:$0xff] }
  0x96   :  { %2528 = vmatprep.subr.bf16.mxu0 %v2527_v18  ;;  %v2579_v18 = vpack.c.bf16 %v387_v11, %v386_v10  ;;  %v428_v10 = vld [vmem:[%s4421_s1 + $0xbf0] sm:$0xff]  ;;  %v429_v11 = vld [vmem:[%s4421_s1 + $0xbf8] sm:$0xff] }
  0x97   :  { %2558 = vmatpush3.bf16.msra.mxu1 %v2557_v17  ;;  %v2609_v17 = vpack.c.bf16 %v401_v9, %v400_v7  ;;  %v411_v7 = vld [vmem:[%s4421_s1 + $0xb68] sm:$0xff]  ;;  %v397_v9 = vld [vmem:[%s4421_s1 + $0xaf8] sm:$0xff] }
  0x98   :  { %2560 = vmatprep.subr.bf16.mxu1 %v2559_v22  ;;  %v2611_v22 = vpack.c.bf16 %v419_v13, %v418_v12  ;;  %v2629_v13 = vpack.c.bf16 %v411_v7, %v410_v5  ;;  %v468_v5 = vld [vmem:[%s4421_s1 + $0xd30] sm:$0xff]  ;;  %v469_v7 = vld [vmem:[%s4421_s1 + $0xd38] sm:$0xff] }
  0x99   :  { %2530 = vmatpush3.bf16.msra.mxu0 %v2529_v28  ;;  %v2581_v28 = vpack.c.bf16 %v371_v20, %v370_v19  ;;  %v413_v19 = vld [vmem:[%s4421_s1 + $0xb78] sm:$0xff]  ;;  %v446_v20 = vld [vmem:[%s4421_s1 + $0xc80] sm:$0xff] }
  0x9a   :  { %2532 = vmatprep.subr.bf16.mxu0 %v2531_v30  ;;  %v2583_v30 = vpack.c.bf16 %v389_v25, %v388_v24 }
  0x9b   :  { %2562 = vmatpush3.bf16.msra.mxu1 %v2561_v29  ;;  %v2613_v29 = vpack.c.bf16 %v403_v23, %v402_v21  ;;  %v447_v21 = vld [vmem:[%s4421_s1 + $0xc88] sm:$0xff] }
  0x9c   :  { %2564 = vmatprep.subr.bf16.mxu1 %v2563_v34  ;;  %v2615_v34 = vpack.c.bf16 %v421_v27, %v420_v26  ;;  %v479_v23 = vld [vmem:[%s4421_s1 + $0xd88] sm:$0xff]  ;;  %v2635_v26 = vpack.c.bf16 %v447_v21, %v446_v20  ;;  %v430_v27 = vld [vmem:[%s4421_s1 + $0xc00] sm:$0xff]  ;;  %v456_v20 = vld [vmem:[%s4421_s1 + $0xcd0] sm:$0xff] }
  0x9d   :  { %2534 = vmatpush3.bf16.msra.mxu0 %v2533_v40  ;;  %v2585_v40 = vpack.c.bf16 %v373_v32, %v372_v31  ;;  %v463_v31 = vld [vmem:[%s4421_s1 + $0xd08] sm:$0xff]  ;;  %v448_v32 = vld [vmem:[%s4421_s1 + $0xc90] sm:$0xff]  ;;  %v457_v21 = vld [vmem:[%s4421_s1 + $0xcd8] sm:$0xff] }
  0x9e   :  { %2536 = vmatprep.subr.bf16.mxu0 %v2535_v42  ;;  %v2587_v42 = vpack.c.bf16 %v391_v37, %v390_v36  ;;  %v34_v36 = vld [vmem:[%s4422_s0 + $0xa0] sm:$0xff] }
  0x9f   :  { %2566 = vmatpush3.bf16.msra.mxu1 %v2565_v41  ;;  %v2617_v41 = vpack.c.bf16 %v405_v35, %v404_v33  ;;  %v449_v33 = vld [vmem:[%s4421_s1 + $0xc98] sm:$0xff] }
  0xa0   :  { %2568 = vmatprep.subr.bf16.mxu1 %v2567_v46  ;;  %v2619_v46 = vpack.c.bf16 %v423_v39, %v422_v38  ;;  %v481_v35 = vld [vmem:[%s4421_s1 + $0xd98] sm:$0xff]  ;;  %v36_v38 = vld [vmem:[%s4422_s0 + $0xb0] sm:$0xff] }
  0xa1   :  { %2538 = vmatpush3.bf16.msra.mxu0 %v2537_v52  ;;  %v2589_v52 = vpack.c.bf16 %v375_v44, %v374_v43  ;;  %v464_v43 = vld [vmem:[%s4421_s1 + $0xd10] sm:$0xff] }
  0xa2   :  { %2572 = vmatprep.subr.bf16.mxu0 %v2571_v54  ;;  %v2591_v54 = vpack.c.bf16 %v393_v49, %v392_v48  ;;  %v482_v48 = vld [vmem:[%s4421_s1 + $0xda0] sm:$0xff]  ;;  %v483_v49 = vld [vmem:[%s4421_s1 + $0xda8] sm:$0xff] }
  0xa3   :  { %2570 = vmatpush3.bf16.msra.mxu1 %v2569_v53  ;;  %v2621_v53 = vpack.c.bf16 %v407_v47, %v406_v45  ;;  %v465_v45 = vld [vmem:[%s4421_s1 + $0xd18] sm:$0xff]  ;;  %v451_v47 = vld [vmem:[%s4421_s1 + $0xca8] sm:$0xff] }
  0xa4   :  { %2604 = vmatprep.subr.bf16.mxu1 %v2603_v58  ;;  %1190 = vmatmul.mubr.f32.vlgmr.msra.gmra.mrb[8].mxu0 %v30_v0  ;;  %v2623_v58 = vpack.c.bf16 %v425_v51, %v424_v50  ;;  %v2593_v0 = vpack.c.bf16 %v377_v56, %v376_v55  ;;  %v39_v50 = vld [vmem:[%s4422_s0 + $0xc8] sm:$0xff]  ;;  %v434_v55 = vld [vmem:[%s4421_s1 + $0xc20] sm:$0xff] }
  0xa5   :  { %2574 = vmatpush3.bf16.msra.mxu0 %v2573_v1  ;;  %1329 = vmatprep.mubr.f32.mxu0 %v35_v14  ;;  %v2625_v1 = vpack.c.bf16 %v409_v59, %v408_v57  ;;  %v435_v56 = vld [vmem:[%s4421_s1 + $0xc28] sm:$0xff]  ;;  %v466_v57 = vld [vmem:[%s4421_s1 + $0xd20] sm:$0xff] }
  0xa6   :  { %1260 = vmatmul.mubr.f32.vlgmr.msra.gmra.mrb[8].mxu1 %v32_v2  ;;  %2576 = vmatprep.subr.bf16.mxu0 %v2575_v4  ;;  %v2595_v2 = vpack.c.bf16 %v395_v61, %v394_v60  ;;  %v379_v4 = vld [vmem:[%s4421_s1 + $0xa68] sm:$0xff]  ;;  %v452_v60 = vld [vmem:[%s4421_s1 + $0xcb0] sm:$0xff]  ;;  %v453_v61 = vld [vmem:[%s4421_s1 + $0xcb8] sm:$0xff] }
  0xa7   :  { %2606 = vmatpush3.bf16.msra.mxu1 %v2605_v3  ;;  %1399 = vmatprep.mubr.f32.mxu1 %v37_v16  ;;  %v378_v3 = vld [vmem:[%s4421_s1 + $0xa60] sm:$0xff]  ;;  %v381_v16 = vld [vmem:[%s4421_s1 + $0xa78] sm:$0xff]  ;;  %v467_v59 = vld [vmem:[%s4421_s1 + $0xd28] sm:$0xff] }
  0xa8   :  { %2608 = vmatprep.subr.bf16.mxu1 %v2607_v8  ;;  %v396_v8 = vld [vmem:[%s4421_s1 + $0xaf0] sm:$0xff]  ;;  %v2597_v12 = vpack.c.bf16 %v379_v4, %v378_v3  ;;  %v437_v4 = vld [vmem:[%s4421_s1 + $0xc38] sm:$0xff] }
  0xa9   :  { %2578 = vmatpush3.bf16.msra.mxu0 %v2577_v15  ;;  %v2599_v14 = vpack.c.bf16 %v397_v9, %v396_v8  ;;  %v380_v15 = vld [vmem:[%s4421_s1 + $0xa70] sm:$0xff]  ;;  %v454_v8 = vld [vmem:[%s4421_s1 + $0xcc0] sm:$0xff]  ;;  %v455_v9 = vld [vmem:[%s4421_s1 + $0xcc8] sm:$0xff] }
  0xaa   :  { %2580 = vmatprep.subr.bf16.mxu0 %v2579_v18  ;;  %v2631_v18 = vpack.c.bf16 %v429_v11, %v428_v10  ;;  %v2601_v24 = vpack.c.bf16 %v381_v16, %v380_v15  ;;  %v436_v3 = vld [vmem:[%s4421_s1 + $0xc30] sm:$0xff]  ;;  %v486_v10 = vld [vmem:[%s4421_s1 + $0xdc0] sm:$0xff]  ;;  %v487_v11 = vld [vmem:[%s4421_s1 + $0xdc8] sm:$0xff] }
  0xab   :  { %2610 = vmatpush3.bf16.msra.mxu1 %v2609_v17  ;;  %v412_v17 = vld [vmem:[%s4421_s1 + $0xb70] sm:$0xff]  ;;  %v438_v15 = vld [vmem:[%s4421_s1 + $0xc40] sm:$0xff]  ;;  %v439_v16 = vld [vmem:[%s4421_s1 + $0xc48] sm:$0xff] }
  0xac   :  { %2612 = vmatprep.subr.bf16.mxu1 %v2611_v22  ;;  %v478_v22 = vld [vmem:[%s4421_s1 + $0xd80] sm:$0xff]  ;;  %v2633_v25 = vpack.c.bf16 %v413_v19, %v412_v17  ;;  %v471_v19 = vld [vmem:[%s4421_s1 + $0xd48] sm:$0xff] }
  0xad   :  { %2582 = vmatpush3.bf16.msra.mxu0 %v2581_v28  ;;  %v431_v28 = vld [vmem:[%s4421_s1 + $0xc08] sm:$0xff]  ;;  %v470_v17 = vld [vmem:[%s4421_s1 + $0xd40] sm:$0xff] }
  0xae   :  { %2584 = vmatprep.subr.bf16.mxu0 %v2583_v30  ;;  %v2667_v30 = vpack.c.bf16 %v479_v23, %v478_v22  ;;  %v2637_v37 = vpack.c.bf16 %v431_v28, %v430_v27  ;;  %v488_v22 = vld [vmem:[%s4421_s1 + $0xdd0] sm:$0xff]  ;;  %v489_v23 = vld [vmem:[%s4421_s1 + $0xdd8] sm:$0xff] }
  0xaf   :  { %2614 = vmatpush3.bf16.msra.mxu1 %v2613_v29  ;;  %v462_v29 = vld [vmem:[%s4421_s1 + $0xd00] sm:$0xff]  ;;  %v440_v27 = vld [vmem:[%s4421_s1 + $0xc50] sm:$0xff]  ;;  %v441_v28 = vld [vmem:[%s4421_s1 + $0xc58] sm:$0xff] }
  0xb0   :  { %2616 = vmatprep.subr.bf16.mxu1 %v2615_v34  ;;  %v480_v34 = vld [vmem:[%s4421_s1 + $0xd90] sm:$0xff]  ;;  %v2669_v39 = vpack.c.bf16 %v463_v31, %v462_v29  ;;  %v473_v31 = vld [vmem:[%s4421_s1 + $0xd58] sm:$0xff] }
  0xb1   :  { %2586 = vmatpush3.bf16.msra.mxu0 %v2585_v40  ;;  %v2639_v40 = vpack.c.bf16 %v449_v33, %v448_v32  ;;  %v2671_v44 = vpack.c.bf16 %v481_v35, %v480_v34  ;;  %v472_v29 = vld [vmem:[%s4421_s1 + $0xd50] sm:$0xff]  ;;  %v458_v32 = vld [vmem:[%s4421_s1 + $0xce0] sm:$0xff]  ;;  %v459_v33 = vld [vmem:[%s4421_s1 + $0xce8] sm:$0xff] }
  0xb2   :  { %2588 = vmatprep.subr.bf16.mxu0 %v2587_v42  ;;  %v433_v42 = vld [vmem:[%s4421_s1 + $0xc18] sm:$0xff]  ;;  %v490_v34 = vld [vmem:[%s4421_s1 + $0xde0] sm:$0xff]  ;;  %v491_v35 = vld [vmem:[%s4421_s1 + $0xde8] sm:$0xff] }
  0xb3   :  { %2618 = vmatpush3.bf16.msra.mxu1 %v2617_v41  ;;  %v432_v41 = vld [vmem:[%s4421_s1 + $0xc10] sm:$0xff] }
  0xb4   :  { %2620 = vmatprep.subr.bf16.mxu1 %v2619_v46  ;;  %v450_v46 = vld [vmem:[%s4421_s1 + $0xca0] sm:$0xff]  ;;  %v2641_v51 = vpack.c.bf16 %v433_v42, %v432_v41  ;;  %v2691_v42 = vpack.c.bf16 %v491_v35, %v490_v34  ;;  %v548_v34 = vld [vmem:[%s4421_s1 + $0xfb0] sm:$0xff]  ;;  %v549_v35 = vld [vmem:[%s4421_s1 + $0xfb8] sm:$0xff] }
  0xb5   :  { %2590 = vmatpush3.bf16.msra.mxu0 %v2589_v52  ;;  %v41_v52 = vld [vmem:[%s4422_s0 + $0xd8] sm:$0xff]  ;;  %v474_v41 = vld [vmem:[%s4421_s1 + $0xd60] sm:$0xff] }
  0xb6   :  { %2592 = vmatprep.subr.bf16.mxu0 %v2591_v54  ;;  %v2643_v54 = vpack.c.bf16 %v451_v47, %v450_v46  ;;  %v492_v46 = vld [vmem:[%s4421_s1 + $0xdf0] sm:$0xff]  ;;  %v493_v47 = vld [vmem:[%s4421_s1 + $0xdf8] sm:$0xff] }
  0xb7   :  { %2622 = vmatpush3.bf16.msra.mxu1 %v2621_v53  ;;  %v2673_v53 = vpack.c.bf16 %v465_v45, %v464_v43  ;;  %v475_v43 = vld [vmem:[%s4421_s1 + $0xd68] sm:$0xff]  ;;  %v461_v45 = vld [vmem:[%s4421_s1 + $0xcf8] sm:$0xff] }
  0xb8   :  { %2624 = vmatprep.subr.bf16.mxu1 %v2623_v58  ;;  %v2675_v58 = vpack.c.bf16 %v483_v49, %v482_v48  ;;  %v2693_v49 = vpack.c.bf16 %v475_v43, %v474_v41  ;;  %v532_v41 = vld [vmem:[%s4421_s1 + $0xf30] sm:$0xff]  ;;  %v533_v43 = vld [vmem:[%s4421_s1 + $0xf38] sm:$0xff] }
  0xb9   :  { %2594 = vmatpush3.bf16.msra.mxu0 %v2593_v0  ;;  %v2645_v0 = vpack.c.bf16 %v435_v56, %v434_v55  ;;  %v477_v55 = vld [vmem:[%s4421_s1 + $0xd78] sm:$0xff]  ;;  %v510_v56 = vld [vmem:[%s4421_s1 + $0xe80] sm:$0xff] }
  0xba   :  { %2596 = vmatprep.subr.bf16.mxu0 %v2595_v2  ;;  %v2647_v2 = vpack.c.bf16 %v453_v61, %v452_v60 }
  0xbb   :  { %2626 = vmatpush3.bf16.msra.mxu1 %v2625_v1  ;;  %v2677_v1 = vpack.c.bf16 %v467_v59, %v466_v57  ;;  %v511_v57 = vld [vmem:[%s4421_s1 + $0xe88] sm:$0xff] }
  0xbc   :  { %2628 = vmatprep.subr.bf16.mxu1 %v2627_v6  ;;  %v2679_v6 = vpack.c.bf16 %v485_v63, %v484_v62  ;;  %v543_v59 = vld [vmem:[%s4421_s1 + $0xf88] sm:$0xff]  ;;  %v2699_v62 = vpack.c.bf16 %v511_v57, %v510_v56  ;;  %v494_v63 = vld [vmem:[%s4421_s1 + $0xe00] sm:$0xff]  ;;  %v520_v56 = vld [vmem:[%s4421_s1 + $0xed0] sm:$0xff] }
  0xbd   :  { %2598 = vmatpush3.bf16.msra.mxu0 %v2597_v12  ;;  %v2649_v12 = vpack.c.bf16 %v437_v4, %v436_v3  ;;  %v527_v3 = vld [vmem:[%s4421_s1 + $0xf08] sm:$0xff]  ;;  %v512_v4 = vld [vmem:[%s4421_s1 + $0xe90] sm:$0xff]  ;;  %v521_v57 = vld [vmem:[%s4421_s1 + $0xed8] sm:$0xff] }
  0xbe   :  { %2600 = vmatprep.subr.bf16.mxu0 %v2599_v14  ;;  %v2651_v14 = vpack.c.bf16 %v455_v9, %v454_v8  ;;  %v38_v8 = vld [vmem:[%s4422_s0 + $0xc0] sm:$0xff] }
  0xbf   :  { %2630 = vmatpush3.bf16.msra.mxu1 %v2629_v13  ;;  %v2681_v13 = vpack.c.bf16 %v469_v7, %v468_v5  ;;  %v513_v5 = vld [vmem:[%s4421_s1 + $0xe98] sm:$0xff] }
  0xc0   :  { %2632 = vmatprep.subr.bf16.mxu1 %v2631_v18  ;;  %v2683_v18 = vpack.c.bf16 %v487_v11, %v486_v10  ;;  %v545_v7 = vld [vmem:[%s4421_s1 + $0xf98] sm:$0xff]  ;;  %v40_v10 = vld [vmem:[%s4422_s0 + $0xd0] sm:$0xff] }
  0xc1   :  { %2602 = vmatpush3.bf16.msra.mxu0 %v2601_v24  ;;  %v2653_v24 = vpack.c.bf16 %v439_v16, %v438_v15  ;;  %v528_v15 = vld [vmem:[%s4421_s1 + $0xf10] sm:$0xff] }
  0xc2   :  { %2636 = vmatprep.subr.bf16.mxu0 %v2635_v26  ;;  %v2655_v26 = vpack.c.bf16 %v457_v21, %v456_v20  ;;  %v546_v20 = vld [vmem:[%s4421_s1 + $0xfa0] sm:$0xff]  ;;  %v547_v21 = vld [vmem:[%s4421_s1 + $0xfa8] sm:$0xff] }
  0xc3   :  { %2634 = vmatpush3.bf16.msra.mxu1 %v2633_v25  ;;  %v2685_v25 = vpack.c.bf16 %v471_v19, %v470_v17  ;;  %v529_v17 = vld [vmem:[%s4421_s1 + $0xf18] sm:$0xff]  ;;  %v515_v19 = vld [vmem:[%s4421_s1 + $0xea8] sm:$0xff] }
  0xc4   :  { %2668 = vmatprep.subr.bf16.mxu1 %v2667_v30  ;;  %1330 = vmatmul.mubr.f32.vlgmr.msra.gmra.mrb[10].mxu0 %v34_v36  ;;  %v2687_v30 = vpack.c.bf16 %v489_v23, %v488_v22  ;;  %v2657_v36 = vpack.c.bf16 %v441_v28, %v440_v27  ;;  %v43_v22 = vld [vmem:[%s4422_s0 + $0xe8] sm:$0xff]  ;;  %v498_v27 = vld [vmem:[%s4421_s1 + $0xe20] sm:$0xff] }
  0xc5   :  { %2638 = vmatpush3.bf16.msra.mxu0 %v2637_v37  ;;  %1469 = vmatprep.mubr.f32.mxu0 %v39_v50  ;;  %v2689_v37 = vpack.c.bf16 %v473_v31, %v472_v29  ;;  %v499_v28 = vld [vmem:[%s4421_s1 + $0xe28] sm:$0xff]  ;;  %v530_v29 = vld [vmem:[%s4421_s1 + $0xf20] sm:$0xff] }
  0xc6   :  { %1400 = vmatmul.mubr.f32.vlgmr.msra.gmra.mrb[10].mxu1 %v36_v38  ;;  %2640 = vmatprep.subr.bf16.mxu0 %v2639_v40  ;;  %v2659_v38 = vpack.c.bf16 %v459_v33, %v458_v32  ;;  %v443_v40 = vld [vmem:[%s4421_s1 + $0xc68] sm:$0xff]  ;;  %v516_v32 = vld [vmem:[%s4421_s1 + $0xeb0] sm:$0xff]  ;;  %v517_v33 = vld [vmem:[%s4421_s1 + $0xeb8] sm:$0xff] }
  0xc7   :  { %2670 = vmatpush3.bf16.msra.mxu1 %v2669_v39  ;;  %1539 = vmatprep.mubr.f32.mxu1 %v41_v52  ;;  %v442_v39 = vld [vmem:[%s4421_s1 + $0xc60] sm:$0xff]  ;;  %v445_v52 = vld [vmem:[%s4421_s1 + $0xc78] sm:$0xff]  ;;  %v531_v31 = vld [vmem:[%s4421_s1 + $0xf28] sm:$0xff] }
  0xc8   :  { %2672 = vmatprep.subr.bf16.mxu1 %v2671_v44  ;;  %v460_v44 = vld [vmem:[%s4421_s1 + $0xcf0] sm:$0xff]  ;;  %v2661_v48 = vpack.c.bf16 %v443_v40, %v442_v39  ;;  %v501_v40 = vld [vmem:[%s4421_s1 + $0xe38] sm:$0xff] }
  0xc9   :  { %2642 = vmatpush3.bf16.msra.mxu0 %v2641_v51  ;;  %v2663_v50 = vpack.c.bf16 %v461_v45, %v460_v44  ;;  %v444_v51 = vld [vmem:[%s4421_s1 + $0xc70] sm:$0xff]  ;;  %v518_v44 = vld [vmem:[%s4421_s1 + $0xec0] sm:$0xff]  ;;  %v519_v45 = vld [vmem:[%s4421_s1 + $0xec8] sm:$0xff] }
  0xca   :  { %2644 = vmatprep.subr.bf16.mxu0 %v2643_v54  ;;  %v2695_v54 = vpack.c.bf16 %v493_v47, %v492_v46  ;;  %v2665_v60 = vpack.c.bf16 %v445_v52, %v444_v51  ;;  %v500_v39 = vld [vmem:[%s4421_s1 + $0xe30] sm:$0xff]  ;;  %v550_v46 = vld [vmem:[%s4421_s1 + $0xfc0] sm:$0xff]  ;;  %v551_v47 = vld [vmem:[%s4421_s1 + $0xfc8] sm:$0xff] }
  0xcb   :  { %2674 = vmatpush3.bf16.msra.mxu1 %v2673_v53  ;;  %v476_v53 = vld [vmem:[%s4421_s1 + $0xd70] sm:$0xff]  ;;  %v502_v51 = vld [vmem:[%s4421_s1 + $0xe40] sm:$0xff]  ;;  %v503_v52 = vld [vmem:[%s4421_s1 + $0xe48] sm:$0xff] }
  0xcc   :  { %2676 = vmatprep.subr.bf16.mxu1 %v2675_v58  ;;  %v542_v58 = vld [vmem:[%s4421_s1 + $0xf80] sm:$0xff]  ;;  %v2697_v61 = vpack.c.bf16 %v477_v55, %v476_v53  ;;  %v535_v55 = vld [vmem:[%s4421_s1 + $0xf48] sm:$0xff] }
  0xcd   :  { %2646 = vmatpush3.bf16.msra.mxu0 %v2645_v0  ;;  %v495_v0 = vld [vmem:[%s4421_s1 + $0xe08] sm:$0xff]  ;;  %v534_v53 = vld [vmem:[%s4421_s1 + $0xf40] sm:$0xff] }
  0xce   :  { %2648 = vmatprep.subr.bf16.mxu0 %v2647_v2  ;;  %v2731_v2 = vpack.c.bf16 %v543_v59, %v542_v58  ;;  %v2701_v9 = vpack.c.bf16 %v495_v0, %v494_v63  ;;  %v552_v58 = vld [vmem:[%s4421_s1 + $0xfd0] sm:$0xff]  ;;  %v553_v59 = vld [vmem:[%s4421_s1 + $0xfd8] sm:$0xff] }
  0xcf   :  { %2678 = vmatpush3.bf16.msra.mxu1 %v2677_v1  ;;  %v526_v1 = vld [vmem:[%s4421_s1 + $0xf00] sm:$0xff]  ;;  %v504_v63 = vld [vmem:[%s4421_s1 + $0xe50] sm:$0xff]  ;;  %v505_v0 = vld [vmem:[%s4421_s1 + $0xe58] sm:$0xff] }
  0xd0   :  { %2680 = vmatprep.subr.bf16.mxu1 %v2679_v6  ;;  %v544_v6 = vld [vmem:[%s4421_s1 + $0xf90] sm:$0xff]  ;;  %v2733_v11 = vpack.c.bf16 %v527_v3, %v526_v1  ;;  %v537_v3 = vld [vmem:[%s4421_s1 + $0xf58] sm:$0xff] }
  0xd1   :  { %2650 = vmatpush3.bf16.msra.mxu0 %v2649_v12  ;;  %v2703_v12 = vpack.c.bf16 %v513_v5, %v512_v4  ;;  %v2735_v16 = vpack.c.bf16 %v545_v7, %v544_v6  ;;  %v536_v1 = vld [vmem:[%s4421_s1 + $0xf50] sm:$0xff]  ;;  %v522_v4 = vld [vmem:[%s4421_s1 + $0xee0] sm:$0xff]  ;;  %v523_v5 = vld [vmem:[%s4421_s1 + $0xee8] sm:$0xff] }
  0xd2   :  { %2652 = vmatprep.subr.bf16.mxu0 %v2651_v14  ;;  %v497_v14 = vld [vmem:[%s4421_s1 + $0xe18] sm:$0xff]  ;;  %v554_v6 = vld [vmem:[%s4421_s1 + $0xfe0] sm:$0xff]  ;;  %v555_v7 = vld [vmem:[%s4421_s1 + $0xfe8] sm:$0xff] }
  0xd3   :  { %2682 = vmatpush3.bf16.msra.mxu1 %v2681_v13  ;;  %v496_v13 = vld [vmem:[%s4421_s1 + $0xe10] sm:$0xff] }
  0xd4   :  { %2684 = vmatprep.subr.bf16.mxu1 %v2683_v18  ;;  %v514_v18 = vld [vmem:[%s4421_s1 + $0xea0] sm:$0xff]  ;;  %v2705_v23 = vpack.c.bf16 %v497_v14, %v496_v13 }
  0xd5   :  { %2654 = vmatpush3.bf16.msra.mxu0 %v2653_v24  ;;  %v45_v24 = vld [vmem:[%s4422_s0 + $0xf8] sm:$0xff]  ;;  %v538_v13 = vld [vmem:[%s4421_s1 + $0xf60] sm:$0xff] }
  0xd6   :  { %2656 = vmatprep.subr.bf16.mxu0 %v2655_v26  ;;  %v2707_v26 = vpack.c.bf16 %v515_v19, %v514_v18  ;;  %v525_v18 = vld [vmem:[%s4421_s1 + $0xef8] sm:$0xff]  ;;  %v1690_v19 = vld [vmem:[%s4423_s2] ss:$0 sm:$0xff] }
  0xd7   :  { %2686 = vmatpush3.bf16.msra.mxu1 %v2685_v25  ;;  %v2737_v25 = vpack.c.bf16 %v529_v17, %v528_v15  ;;  %v2755_v15 = vpack.c.bf16 %v555_v7, %v554_v6  ;;  %v524_v17 = vld [vmem:[%s4421_s1 + $0xef0] sm:$0xff] }
  0xd8   :  { %2688 = vmatprep.subr.bf16.mxu1 %v2687_v30  ;;  %v2739_v30 = vpack.c.bf16 %v547_v21, %v546_v20 }
  0xd9   :  { %2658 = vmatpush3.bf16.msra.mxu0 %v2657_v36  ;;  %v2709_v36 = vpack.c.bf16 %v499_v28, %v498_v27 }
  0xda   :  { %2660 = vmatprep.subr.bf16.mxu0 %v2659_v38  ;;  %v2711_v38 = vpack.c.bf16 %v517_v33, %v516_v32 }
  0xdb   :  { %2690 = vmatpush3.bf16.msra.mxu1 %v2689_v37  ;;  %v2741_v37 = vpack.c.bf16 %v531_v31, %v530_v29  ;;  %v2727_v29 = vpack.c.bf16 %v525_v18, %v524_v17  ;;  %v509_v31 = vld [vmem:[%s4421_s1 + $0xe78] sm:$0xff] }
  0xdc   :  { %2692 = vmatprep.subr.bf16.mxu1 %v2691_v42  ;;  %v2743_v42 = vpack.c.bf16 %v549_v35, %v548_v34  ;;  %v540_v34 = vld [vmem:[%s4421_s1 + $0xf70] sm:$0xff]  ;;  %v541_v35 = vld [vmem:[%s4421_s1 + $0xf78] sm:$0xff] }
  0xdd   :  { %2662 = vmatpush3.bf16.msra.mxu0 %v2661_v48  ;;  %v2713_v48 = vpack.c.bf16 %v501_v40, %v500_v39  ;;  %v42_v39 = vld [vmem:[%s4422_s0 + $0xe0] sm:$0xff]  ;;  %v44_v40 = vld [vmem:[%s4422_s0 + $0xf0] sm:$0xff] }
  0xde   :  { %2664 = vmatprep.subr.bf16.mxu0 %v2663_v50  ;;  %v2715_v50 = vpack.c.bf16 %v519_v45, %v518_v44 }
  0xdf   :  { %2694 = vmatpush3.bf16.msra.mxu1 %v2693_v49  ;;  %v2745_v49 = vpack.c.bf16 %v533_v43, %v532_v41 }
  0xe0   :  { %2696 = vmatprep.subr.bf16.mxu1 %v2695_v54  ;;  %v2747_v54 = vpack.c.bf16 %v551_v47, %v550_v46 }
  0xe1   :  { %2666 = vmatpush3.bf16.msra.mxu0 %v2665_v60  ;;  %v2717_v60 = vpack.c.bf16 %v503_v52, %v502_v51 }
  0xe2   :  { %2700 = vmatprep.subr.bf16.mxu0 %v2699_v62  ;;  %v2719_v62 = vpack.c.bf16 %v521_v57, %v520_v56 }
  0xe3   :  { %2698 = vmatpush3.bf16.msra.mxu1 %v2697_v61  ;;  %v2749_v61 = vpack.c.bf16 %v535_v55, %v534_v53 }
  0xe4   :  { %2732 = vmatprep.subr.bf16.mxu1 %v2731_v2  ;;  %1470 = vmatmul.mubr.f32.vlgmr.msra.gmra.mrb[12].mxu0 %v38_v8  ;;  %v2751_v2 = vpack.c.bf16 %v553_v59, %v552_v58  ;;  %v2721_v8 = vpack.c.bf16 %v505_v0, %v504_v63 }
  0xe5   :  { %2702 = vmatpush3.bf16.msra.mxu0 %v2701_v9  ;;  %1609 = vmatprep.mubr.f32.mxu0 %v43_v22  ;;  %v2753_v9 = vpack.c.bf16 %v537_v3, %v536_v1  ;;  %v556_v22 = vld [vmem:[%s4421_s1 + $0xff0] sm:$0xff] }
  0xe6   :  { %1540 = vmatmul.mubr.f32.vlgmr.msra.gmra.mrb[12].mxu1 %v40_v10  ;;  %2704 = vmatprep.subr.bf16.mxu0 %v2703_v12  ;;  %v2723_v10 = vpack.c.bf16 %v523_v5, %v522_v4  ;;  %v507_v12 = vld [vmem:[%s4421_s1 + $0xe68] sm:$0xff] }
  0xe7   :  { %2734 = vmatpush3.bf16.msra.mxu1 %v2733_v11  ;;  %1679 = vmatprep.mubr.f32.mxu1 %v45_v24  ;;  %v506_v11 = vld [vmem:[%s4421_s1 + $0xe60] sm:$0xff] }
  0xe8   :  { %2736 = vmatprep.subr.bf16.mxu1 %v2735_v16  ;;  %v539_v16 = vld [vmem:[%s4421_s1 + $0xf68] sm:$0xff] }
  0xe9   :  { %2706 = vmatpush3.bf16.msra.mxu0 %v2705_v23  ;;  %v557_v23 = vld [vmem:[%s4421_s1 + $0xff8] sm:$0xff]  ;;  %v2757_v28 = vpack.c.bf16 %v539_v16, %v538_v13 }
  0xea   :  { %2708 = vmatprep.subr.bf16.mxu0 %v2707_v26  ;;  %v2725_v26 = vpack.c.bf16 %v507_v12, %v506_v11  ;;  %v2759_v33 = vpack.c.bf16 %v557_v23, %v556_v22 }
  0xeb   :  { %2738 = vmatpush3.bf16.msra.mxu1 %v2737_v25 }
  0xec   :  { %2740 = vmatprep.subr.bf16.mxu1 %v2739_v30  ;;  %v508_v30 = vld [vmem:[%s4421_s1 + $0xe70] sm:$0xff] }
  0xed   :  { %2710 = vmatpush3.bf16.msra.mxu0 %v2709_v36 }
  0xee   :  { %2712 = vmatprep.subr.bf16.mxu0 %v2711_v38  ;;  %v2761_v38 = vpack.c.bf16 %v541_v35, %v540_v34 }
  0xef   :  { %2742 = vmatpush3.bf16.msra.mxu1 %v2741_v37  ;;  %v2729_v37 = vpack.c.bf16 %v509_v31, %v508_v30 }
  0xf0   :  { %2744 = vmatprep.subr.bf16.mxu1 %v2743_v42 }
  0xf1   :  { %2714 = vmatpush3.bf16.msra.mxu0 %v2713_v48 }
  0xf2   :  { %2716 = vmatprep.subr.bf16.mxu0 %v2715_v50 }
  0xf3   :  { %2746 = vmatpush3.bf16.msra.mxu1 %v2745_v49 }
  0xf4   :  { %2748 = vmatprep.subr.bf16.mxu1 %v2747_v54 }
  0xf5   :  { %2718 = vmatpush3.bf16.msra.mxu0 %v2717_v60 }
  0xf6   :  { %2720 = vmatprep.subr.bf16.mxu0 %v2719_v62 }
  0xf7   :  { %2750 = vmatpush3.bf16.msra.mxu1 %v2749_v61  ;;  %v1723_v14 = vpop.f32.mrb[0].mxu0 }
  0xf8   :  { %2752 = vmatprep.subr.bf16.mxu1 %v2751_v2  ;;  %v1724_v20 = vpop.f32.mrb[1].mxu0 }
  0xf9   :  { %v1758_v21 = vpop.f32.mrb[0].mxu1  ;;  %v1725_v24 = vadd.f32 %v1724_v20, %v1723_v14  ;;  %2722 = vmatpush3.bf16.msra.mxu0 %v2721_v8 }
  0xfa   :  { %v1759_v25 = vpop.f32.mrb[1].mxu1  ;;  %2724 = vmatprep.subr.bf16.mxu0 %v2723_v10 }
  0xfb   :  { %v1760_v27 = vadd.f32 %v1759_v25, %v1758_v21  ;;  %2754 = vmatpush3.bf16.msra.mxu1 %v2753_v9  ;;  %v632_v32 = vadd.f32 %v1725_v24, %v1690_v19 }
  0xfc   :  { %2756 = vmatprep.subr.bf16.mxu1 %v2755_v15 }
  0xfd   :  { %v702_v36 = vadd.f32 %v1760_v27, %v632_v32  ;;  %2726 = vmatpush3.bf16.msra.mxu0 %v2725_v26 }
  0xfe   :  { %2728 = vmatprep.subr.bf16.mxu0 %v2727_v29 }
  0xff   :  { %2758 = vmatpush3.bf16.msra.mxu1 %v2757_v28 }
 0x100   :  { %2760 = vmatprep.subr.bf16.mxu1 %v2759_v33 }
 0x101   :  { %2730 = vmatpush3.bf16.msra.mxu0 %v2729_v37 }
 0x103   :  { %2762 = vmatpush3.bf16.msra.mxu1 %v2761_v38 }
 0x104   :  { %1610 = vmatmul.mubr.f32.vlgmr.msra.gmra.mrb[14].mxu0 %v42_v39 }
 0x106   :  { %1680 = vmatmul.mubr.f32.vlgmr.msra.gmra.mrb[14].mxu1 %v44_v40 }
 0x117   :  { %v1793_v41 = vpop.f32.mrb[2].mxu0 }
 0x118   :  { %v1794_v42 = vpop.f32.mrb[3].mxu0 }
 0x119   :  { %v1828_v43 = vpop.f32.mrb[2].mxu1  ;;  %v1795_v44 = vadd.f32 %v1794_v42, %v1793_v41 }
 0x11a   :  { %v1829_v45 = vpop.f32.mrb[3].mxu1 }
 0x11b   :  { %v1830_v46 = vadd.f32 %v1829_v45, %v1828_v43  ;;  %v772_v47 = vadd.f32 %v1795_v44, %v702_v36 }
 0x11d   :  { %v842_v48 = vadd.f32 %v1830_v46, %v772_v47 }
 0x137   :  { %v1863_v49 = vpop.f32.mrb[4].mxu0 }
 0x138   :  { %v1864_v50 = vpop.f32.mrb[5].mxu0 }
 0x139   :  { %v1898_v51 = vpop.f32.mrb[4].mxu1  ;;  %v1865_v52 = vadd.f32 %v1864_v50, %v1863_v49 }
 0x13a   :  { %v1899_v53 = vpop.f32.mrb[5].mxu1 }
 0x13b   :  { %v1900_v54 = vadd.f32 %v1899_v53, %v1898_v51  ;;  %v912_v55 = vadd.f32 %v1865_v52, %v842_v48 }
 0x13d   :  { %v982_v56 = vadd.f32 %v1900_v54, %v912_v55 }
 0x157   :  { %v1933_v57 = vpop.f32.mrb[6].mxu0 }
 0x158   :  { %v1934_v58 = vpop.f32.mrb[7].mxu0 }
 0x159   :  { %v1968_v59 = vpop.f32.mrb[6].mxu1  ;;  %v1935_v60 = vadd.f32 %v1934_v58, %v1933_v57 }
 0x15a   :  { %v1969_v61 = vpop.f32.mrb[7].mxu1 }
 0x15b   :  { %v1970_v62 = vadd.f32 %v1969_v61, %v1968_v59  ;;  %v1052_v63 = vadd.f32 %v1935_v60, %v982_v56 }
 0x15d   :  { %v1122_v0 = vadd.f32 %v1970_v62, %v1052_v63 }
 0x177   :  { %v2003_v1 = vpop.f32.mrb[8].mxu0 }
 0x178   :  { %v2004_v2 = vpop.f32.mrb[9].mxu0 }
 0x179   :  { %v2038_v3 = vpop.f32.mrb[8].mxu1  ;;  %v2005_v4 = vadd.f32 %v2004_v2, %v2003_v1 }
 0x17a   :  { %v2039_v5 = vpop.f32.mrb[9].mxu1 }
 0x17b   :  { %v2040_v6 = vadd.f32 %v2039_v5, %v2038_v3  ;;  %v1192_v7 = vadd.f32 %v2005_v4, %v1122_v0 }
 0x17d   :  { %v1262_v8 = vadd.f32 %v2040_v6, %v1192_v7 }
 0x197   :  { %v2073_v9 = vpop.f32.mrb[10].mxu0 }
 0x198   :  { %v2074_v10 = vpop.f32.mrb[11].mxu0 }
 0x199   :  { %v2108_v11 = vpop.f32.mrb[10].mxu1  ;;  %v2075_v12 = vadd.f32 %v2074_v10, %v2073_v9 }
 0x19a   :  { %v2109_v13 = vpop.f32.mrb[11].mxu1 }
 0x19b   :  { %v2110_v14 = vadd.f32 %v2109_v13, %v2108_v11  ;;  %v1332_v15 = vadd.f32 %v2075_v12, %v1262_v8 }
 0x19d   :  { %v1402_v16 = vadd.f32 %v2110_v14, %v1332_v15 }
 0x1b7   :  { %v2143_v17 = vpop.f32.mrb[12].mxu0 }
 0x1b8   :  { %v2144_v18 = vpop.f32.mrb[13].mxu0 }
 0x1b9   :  { %v2178_v19 = vpop.f32.mrb[12].mxu1  ;;  %v2145_v20 = vadd.f32 %v2144_v18, %v2143_v17 }
 0x1ba   :  { %v2179_v21 = vpop.f32.mrb[13].mxu1 }
 0x1bb   :  { %v2180_v22 = vadd.f32 %v2179_v21, %v2178_v19  ;;  %v1472_v23 = vadd.f32 %v2145_v20, %v1402_v16 }
 0x1bd   :  { %v1542_v24 = vadd.f32 %v2180_v22, %v1472_v23 }
 0x1d7   :  { %v2213_v25 = vpop.f32.mrb[14].mxu0 }
 0x1d8   :  { %v2214_v26 = vpop.f32.mrb[15].mxu0 }
 0x1d9   :  { %v2248_v27 = vpop.f32.mrb[14].mxu1  ;;  %v2215_v28 = vadd.f32 %v2214_v26, %v2213_v25 }
 0x1da   :  { %v2249_v29 = vpop.f32.mrb[15].mxu1 }
 0x1db   :  { %v2250_v30 = vadd.f32 %v2249_v29, %v2248_v27  ;;  %v1612_v31 = vadd.f32 %v2215_v28, %v1542_v24 }
 0x1dd   :  { %v1682_v32 = vadd.f32 %v2250_v30, %v1612_v31 }
 0x1df   :  { %1685 = vst [vmem:[%s4424_s3] sm:$0xff] %v1682_v32 }

</bundles_post_ra>
